<compile_context>
chip_gen: v6e
topology: v6e:2x2x1
jax: 0.10.0
libtpu: 0.0.40
codegen_flags: <defaults>
</compile_context>

<pallas_src>
import jax
import jax.numpy as jnp
from jax import lax
from jax.experimental import pallas as pl
from jax.experimental.pallas import tpu as pltpu

_SQRT_2_OVER_PI = 0.7978845608028654


# ---------------------------------------------------------------------------
# Small math helpers (usable both inside the Pallas kernel and in the pure-JAX
# reference).
# ---------------------------------------------------------------------------
def _gelu(x):
    # TODO(synk): nn.GELU() defaults to the exact erf form; the tanh
    # approximation is used here because it maps onto the TPU EUP tanh unit.
    return 0.5 * x * (1.0 + jnp.tanh(_SQRT_2_OVER_PI * (x + 0.044715 * x * x * x)))


def _layernorm(x, gamma, beta, eps=1e-5):
    mu = jnp.mean(x, axis=-1, keepdims=True)
    var = jnp.mean(jnp.square(x - mu), axis=-1, keepdims=True)
    return (x - mu) * lax.rsqrt(var + eps) * gamma + beta


def _matmul(a, b):
    # f32 operands, f32 accumulation (portable; MXU still used on TPU).
    return jnp.dot(a.astype(jnp.float32), b.astype(jnp.float32),
                   preferred_element_type=jnp.float32)


# ---------------------------------------------------------------------------
# The fused ViT kernel (one grid step == one image).
# ---------------------------------------------------------------------------
def _make_vit_kernel(depth, heads, scale):
    def kernel(patches_ref, pe_w_ref, pe_b_ref, cls_ref, pos_ref,
               ln1_g_ref, ln1_b_ref, q_w_ref, k_w_ref, v_w_ref, o_w_ref, o_b_ref,
               ln2_g_ref, ln2_b_ref, f1_w_ref, f1_b_ref, f2_w_ref, f2_b_ref,
               h1_w_ref, h1_b_ref, h2_w_ref, h2_b_ref,
               o_ref, x_scr):
        # --- patch embedding + [CLS] token + positional embedding -----------
        # patches_ref[0]: (S, patch_dim); row 0 is a host-side zero row that is
        # replaced by the CLS token below (keeps every slice offset-0 aligned).
        emb = _matmul(patches_ref[0], pe_w_ref[...]) + pe_b_ref[...]
        x_scr[...] = emb + pos_ref[...]
        x_scr[0:1, :] = cls_ref[...] + pos_ref[0:1, :]

        for l in range(depth):
            x = x_scr[...]                                        # (S, D) f32

            # --- Residual(PreNorm(MultiHeadSelfAttention)) -------------------
            h = _layernorm(x, ln1_g_ref[l], ln1_b_ref[l])
            attn = o_b_ref[l]                                     # (1, D) broadcast
            for hd in range(heads):
                q = _matmul(h, q_w_ref[l, hd])                    # (S, dh)
                k = _matmul(h, k_w_ref[l, hd])                    # (S, dh)
                v = _matmul(h, v_w_ref[l, hd])                    # (S, dh)
                dots = _matmul(q, k.T) * scale                    # (S, S)
                m = jnp.max(dots, axis=-1, keepdims=True)
                e = jnp.exp(dots - m)
                p = e / jnp.sum(e, axis=-1, keepdims=True)
                ov = _matmul(p, v)                                # (S, dh)
                attn = attn + _matmul(ov, o_w_ref[l, hd])         # (S, D)
            x = x + attn

            # --- Residual(PreNorm(fnn_cell)) ---------------------------------
            h = _layernorm(x, ln2_g_ref[l], ln2_b_ref[l])
            f = _gelu(_matmul(h, f1_w_ref[l]) + f1_b_ref[l])
            f = _matmul(f, f2_w_ref[l]) + f2_b_ref[l]
            x_scr[...] = x + f

        # --- mlp_head on the CLS token (num_cls lane-padded to 128) ---------
        cls_out = x_scr[0:1, :]
        hc = _gelu(_matmul(cls_out, h1_w_ref[...]) + h1_b_ref[...])
        logits = _matmul(hc, h2_w_ref[...]) + h2_b_ref[...]
        o_ref[0] = logits.astype(o_ref.dtype)

    return kernel


# ---------------------------------------------------------------------------
# Host-side glue.
# ---------------------------------------------------------------------------
def _extract_patches(img, patch_size):
    # Rearrange('b c (h p1) (w p2) -> b (h w) (p1 p2 c)') plus a leading zero
    # row per image that the kernel overwrites with the CLS token.
    b, c, hgt, wid = img.shape
    gh, gw = hgt // patch_size, wid // patch_size
    x = img.reshape(b, c, gh, patch_size, gw, patch_size)
    x = jnp.transpose(x, (0, 2, 4, 3, 5, 1))            # b h w p1 p2 c
    x = x.reshape(b, gh * gw, patch_size * patch_size * c)
    return jnp.pad(x, ((0, 0), (1, 0), (0, 0)))


def _const_spec(shape):
    # Whole array resident in VMEM; same block for every grid step -> no re-DMA.
    return pl.BlockSpec(shape, lambda i: (0,) * len(shape))


_WEIGHT_ORDER = ("pe_w", "pe_b", "cls", "pos",
                 "ln1_g", "ln1_b", "q_w", "k_w", "v_w", "o_w", "o_b",
                 "ln2_g", "ln2_b", "f1_w", "f1_b", "f2_w", "f2_b",
                 "h1_w", "h1_b", "h2_w", "h2_b")


def build_vit_forward(*, image_size, patch_size, input_channel, att_dim,
                      depth, heads, mlp_dim, num_cls):
    num_patches = (image_size // patch_size) ** 2
    patch_dim = input_channel * patch_size ** 2
    seq = num_patches + 1
    num_cls_pad = -(-num_cls // 128) * 128
    kernel = _make_vit_kernel(depth, heads, float(att_dim) ** -0.5)

    def forward(params, img):
        batch = img.shape[0]
        patches = _extract_patches(img.astype(jnp.float32), patch_size)  # (B,S,P)
        weights = [params[name] for name in _WEIGHT_ORDER]

        in_specs = [pl.BlockSpec((1, seq, patch_dim), lambda i: (i, 0, 0))]
        in_specs += [_const_spec(w.shape) for w in weights]

        # Advisory cost estimate (per image, then scaled by batch).
        flops = 2 * seq * patch_dim * att_dim
        flops += depth * (2 * seq * att_dim * 3 * att_dim      # q, k, v projections
                          + 4 * seq * seq * att_dim            # dots + att @ v
                          + 2 * seq * att_dim * att_dim        # to_out
                          + 4 * seq * att_dim * mlp_dim)       # MLP
        flops += 2 * att_dim * mlp_dim + 2 * mlp_dim * num_cls_pad
        transcendentals = depth * (heads * seq * seq + seq * mlp_dim) + mlp_dim
        bytes_accessed = 4 * patches.size + 4 * batch * num_cls_pad
        bytes_accessed += sum(w.size * w.dtype.itemsize for w in weights)

        logits_pad = pl.pallas_call(
            kernel,
            out_shape=jax.ShapeDtypeStruct((batch, 1, num_cls_pad), jnp.float32),
            grid=(batch,),
            in_specs=in_specs,
            out_specs=pl.BlockSpec((1, 1, num_cls_pad), lambda i: (i, 0, 0)),
            scratch_shapes=[pltpu.VMEM((seq, att_dim), jnp.float32)],
            compiler_params=pltpu.CompilerParams(
                dimension_semantics=("parallel",)),
            cost_estimate=pl.CostEstimate(
                flops=batch * flops,
                transcendentals=batch * transcendentals,
                bytes_accessed=int(bytes_accessed)),
        )(patches, *weights)
        return logits_pad[:, 0, :num_cls]

    return forward


# ---------------------------------------------------------------------------
# Deterministic parameter construction (shapes from the PyTorch __init__).
# ---------------------------------------------------------------------------
def _linear_init(key, fan_in, fan_out):
    kw, kb = jax.random.split(key)
    w = jax.random.normal(kw, (fan_in, fan_out), jnp.float32) / jnp.sqrt(float(fan_in))
    b = 0.02 * jax.random.normal(kb, (1, fan_out), jnp.float32)
    return w, b


def make_vit_params(key, *, image_size, patch_size, input_channel, att_dim,
                    depth, heads, mlp_dim, num_cls):
    assert att_dim % heads == 0
    num_patches = (image_size // patch_size) ** 2
    patch_dim = input_channel * patch_size ** 2
    seq = num_patches + 1
    dh = att_dim // heads
    num_cls_pad = -(-num_cls // 128) * 128

    k_pe, k_cls, k_pos, k_h1, k_h2, k_layers = jax.random.split(key, 6)

    pe_w, pe_b = _linear_init(k_pe, patch_dim, att_dim)
    cls_tok = jax.random.normal(k_cls, (1, att_dim), jnp.float32)
    pos_emb = jax.random.normal(k_pos, (seq, att_dim), jnp.float32)

    ones = jnp.ones((1, att_dim), jnp.float32)
    zeros = jnp.zeros((1, att_dim), jnp.float32)
    q_w, k_w, v_w, o_w, o_b = [], [], [], [], []
    f1_w, f1_b, f2_w, f2_b = [], [], [], []
    for lk in jax.random.split(k_layers, depth):
        k_qkv, k_out, k_f1, k_f2 = jax.random.split(lk, 4)
        # to_qkv: Linear(dim, 3*dim, bias=False); output laid out as (qkv, h, d)
        # per rearrange 'b n (qkv h d) -> qkv b h n d'.
        wqkv = (jax.random.normal(k_qkv, (att_dim, 3 * att_dim), jnp.float32)
                / jnp.sqrt(float(att_dim)))
        per_head = wqkv.reshape(att_dim, 3, heads, dh)            # (in, qkv, h, dh)
        q_w.append(jnp.transpose(per_head[:, 0], (1, 0, 2)))
        k_w.append(jnp.transpose(per_head[:, 1], (1, 0, 2)))
        v_w.append(jnp.transpose(per_head[:, 2], (1, 0, 2)))
        wo, bo = _linear_init(k_out, att_dim, att_dim)
        # to_out rows [h*dh:(h+1)*dh] multiply head h of the concatenated output.
        o_w.append(wo.reshape(heads, dh, att_dim))
        o_b.append(bo)
        w1, b1 = _linear_init(k_f1, att_dim, mlp_dim)
        w2, b2 = _linear_init(k_f2, mlp_dim, att_dim)
        f1_w.append(w1); f1_b.append(b1); f2_w.append(w2); f2_b.append(b2)

    h1_w, h1_b = _linear_init(k_h1, att_dim, mlp_dim)
    h2_w, h2_b = _linear_init(k_h2, mlp_dim, num_cls)
    # Lane-pad the classifier output to a multiple of 128 (lane-dense store).
    h2_w = jnp.pad(h2_w, ((0, 0), (0, num_cls_pad - num_cls)))
    h2_b = jnp.pad(h2_b, ((0, 0), (0, num_cls_pad - num_cls)))

    stack = lambda xs: jnp.stack(xs, axis=0)
    return {
        "pe_w": pe_w, "pe_b": pe_b, "cls": cls_tok, "pos": pos_emb,
        "ln1_g": jnp.stack([ones] * depth), "ln1_b": jnp.stack([zeros] * depth),
        "q_w": stack(q_w), "k_w": stack(k_w), "v_w": stack(v_w),
        "o_w": stack(o_w), "o_b": stack(o_b),
        "ln2_g": jnp.stack([ones] * depth), "ln2_b": jnp.stack([zeros] * depth),
        "f1_w": stack(f1_w), "f1_b": stack(f1_b),
        "f2_w": stack(f2_w), "f2_b": stack(f2_b),
        "h1_w": h1_w, "h1_b": h1_b,
        "h2_w": h2_w, "h2_b": h2_b,
    }


# ---------------------------------------------------------------------------
# Pure-JAX reference (same weights, f32 math) for a sanity check.
# ---------------------------------------------------------------------------
def reference_forward(params, img, *, patch_size, depth, heads, num_cls, att_dim):
    scale = float(att_dim) ** -0.5
    patches = _extract_patches(img.astype(jnp.float32), patch_size)    # (B, S, P)
    x = patches @ params["pe_w"] + params["pe_b"]
    x = x.at[:, 0, :].set(params["cls"][0])
    x = x + params["pos"][None]
    for l in range(depth):
        h = _layernorm(x, params["ln1_g"][l], params["ln1_b"][l])
        attn = params["o_b"][l][None]
        for hd in range(heads):
            q = h @ params["q_w"][l, hd]
            k = h @ params["k_w"][l, hd]
            v = h @ params["v_w"][l, hd]
            dots = jnp.einsum("bid,bjd->bij", q, k) * scale
            p = jax.nn.softmax(dots, axis=-1)
            attn = attn + jnp.einsum("bij,bjd->bid", p, v) @ params["o_w"][l, hd]
        x = x + attn
        h = _layernorm(x, params["ln2_g"][l], params["ln2_b"][l])
        f = _gelu(h @ params["f1_w"][l] + params["f1_b"][l])
        x = x + (f @ params["f2_w"][l] + params["f2_b"][l])
    cls_out = x[:, 0, :]
    hc = _gelu(cls_out @ params["h1_w"] + params["h1_b"])
    logits = hc @ params["h2_w"] + params["h2_b"]
    return logits[:, :num_cls]


# ---------------------------------------------------------------------------
if __name__ == "__main__":
    image_size, patch_size, input_channel = 16, 4, 4
    att_dim, depth, heads, mlp_dim, num_cls = 32, 2, 2, 64, 10
    batch = 2

    key = jax.random.PRNGKey(0)
    k_param, k_img = jax.random.split(key)
    params = make_vit_params(
        k_param, image_size=image_size, patch_size=patch_size,
        input_channel=input_channel, att_dim=att_dim, depth=depth,
        heads=heads, mlp_dim=mlp_dim, num_cls=num_cls)
    img = jax.random.normal(
        k_img, (batch, input_channel, image_size, image_size), jnp.float32)

    forward = jax.jit(build_vit_forward(
        image_size=image_size, patch_size=patch_size, input_channel=input_channel,
        att_dim=att_dim, depth=depth, heads=heads, mlp_dim=mlp_dim,
        num_cls=num_cls))
    logits = forward(params, img)
    jax.block_until_ready(logits)

    assert logits.shape == (batch, num_cls)
    assert bool(jnp.all(jnp.isfinite(logits)))

    ref = reference_forward(params, img, patch_size=patch_size, depth=depth,
                            heads=heads, num_cls=num_cls, att_dim=att_dim)
    max_diff = float(jnp.max(jnp.abs(logits - ref)))
    assert bool(jnp.allclose(logits, ref, atol=5e-3, rtol=5e-3)), (
        "max abs diff vs reference = %f" % max_diff)

    print("KERNEL_OK")
</pallas_src>

<mosaic_0001>
module attributes {stable_mosaic.version = 11 : i64} {
  func.func @kernel(%arg0: i32, %arg1: memref<1x17x64xf32, #tpu.memory_space<vmem>>, %arg2: memref<64x32xf32, #tpu.memory_space<vmem>>, %arg3: memref<1x32xf32, #tpu.memory_space<vmem>>, %arg4: memref<1x32xf32, #tpu.memory_space<vmem>>, %arg5: memref<17x32xf32, #tpu.memory_space<vmem>>, %arg6: memref<2x1x32xf32, #tpu.memory_space<vmem>>, %arg7: memref<2x1x32xf32, #tpu.memory_space<vmem>>, %arg8: memref<2x2x32x16xf32, #tpu.memory_space<vmem>>, %arg9: memref<2x2x32x16xf32, #tpu.memory_space<vmem>>, %arg10: memref<2x2x32x16xf32, #tpu.memory_space<vmem>>, %arg11: memref<2x2x16x32xf32, #tpu.memory_space<vmem>>, %arg12: memref<2x1x32xf32, #tpu.memory_space<vmem>>, %arg13: memref<2x1x32xf32, #tpu.memory_space<vmem>>, %arg14: memref<2x1x32xf32, #tpu.memory_space<vmem>>, %arg15: memref<2x32x64xf32, #tpu.memory_space<vmem>>, %arg16: memref<2x1x64xf32, #tpu.memory_space<vmem>>, %arg17: memref<2x64x32xf32, #tpu.memory_space<vmem>>, %arg18: memref<2x1x32xf32, #tpu.memory_space<vmem>>, %arg19: memref<32x64xf32, #tpu.memory_space<vmem>>, %arg20: memref<1x64xf32, #tpu.memory_space<vmem>>, %arg21: memref<64x128xf32, #tpu.memory_space<vmem>>, %arg22: memref<1x128xf32, #tpu.memory_space<vmem>>, %arg23: memref<1x1x128xf32, #tpu.memory_space<vmem>>, %arg24: memref<17x32xf32, #tpu.memory_space<vmem>>) attributes {dimension_semantics = [#tpu.dimension_semantics<parallel>], iteration_bounds = array<i64: 2>, scalar_prefetch = 0 : i64, scratch_operands = 1 : i64, tpu.core_type = #tpu.core_type<tc>, window_params = [{transform_indices = @transform_0, window_bounds = array<i64: 1, 17, 64>}, {pipeline_mode = #tpu.pipeline_mode<synchronous>, transform_indices = @transform_1, window_bounds = array<i64: 64, 32>}, {pipeline_mode = #tpu.pipeline_mode<synchronous>, transform_indices = @transform_2, window_bounds = array<i64: 1, 32>}, {pipeline_mode = #tpu.pipeline_mode<synchronous>, transform_indices = @transform_3, window_bounds = array<i64: 1, 32>}, {pipeline_mode = #tpu.pipeline_mode<synchronous>, transform_indices = @transform_4, window_bounds = array<i64: 17, 32>}, {pipeline_mode = #tpu.pipeline_mode<synchronous>, transform_indices = @transform_5, window_bounds = array<i64: 2, 1, 32>}, {pipeline_mode = #tpu.pipeline_mode<synchronous>, transform_indices = @transform_6, window_bounds = array<i64: 2, 1, 32>}, {pipeline_mode = #tpu.pipeline_mode<synchronous>, transform_indices = @transform_7, window_bounds = array<i64: 2, 2, 32, 16>}, {pipeline_mode = #tpu.pipeline_mode<synchronous>, transform_indices = @transform_8, window_bounds = array<i64: 2, 2, 32, 16>}, {pipeline_mode = #tpu.pipeline_mode<synchronous>, transform_indices = @transform_9, window_bounds = array<i64: 2, 2, 32, 16>}, {pipeline_mode = #tpu.pipeline_mode<synchronous>, transform_indices = @transform_10, window_bounds = array<i64: 2, 2, 16, 32>}, {pipeline_mode = #tpu.pipeline_mode<synchronous>, transform_indices = @transform_11, window_bounds = array<i64: 2, 1, 32>}, {pipeline_mode = #tpu.pipeline_mode<synchronous>, transform_indices = @transform_12, window_bounds = array<i64: 2, 1, 32>}, {pipeline_mode = #tpu.pipeline_mode<synchronous>, transform_indices = @transform_13, window_bounds = array<i64: 2, 1, 32>}, {pipeline_mode = #tpu.pipeline_mode<synchronous>, transform_indices = @transform_14, window_bounds = array<i64: 2, 32, 64>}, {pipeline_mode = #tpu.pipeline_mode<synchronous>, transform_indices = @transform_15, window_bounds = array<i64: 2, 1, 64>}, {pipeline_mode = #tpu.pipeline_mode<synchronous>, transform_indices = @transform_16, window_bounds = array<i64: 2, 64, 32>}, {pipeline_mode = #tpu.pipeline_mode<synchronous>, transform_indices = @transform_17, window_bounds = array<i64: 2, 1, 32>}, {pipeline_mode = #tpu.pipeline_mode<synchronous>, transform_indices = @transform_18, window_bounds = array<i64: 32, 64>}, {pipeline_mode = #tpu.pipeline_mode<synchronous>, transform_indices = @transform_19, window_bounds = array<i64: 1, 64>}, {pipeline_mode = #tpu.pipeline_mode<synchronous>, transform_indices = @transform_20, window_bounds = array<i64: 64, 128>}, {pipeline_mode = #tpu.pipeline_mode<synchronous>, transform_indices = @transform_21, window_bounds = array<i64: 1, 128>}, {transform_indices = @transform_22, window_bounds = array<i64: 1, 1, 128>}]} {
    %c0 = arith.constant 0 : index
    %c0_0 = arith.constant 0 : index
    %c0_1 = arith.constant 0 : index
    %0 = vector.load %arg1[%c0, %c0_0, %c0_1] : memref<1x17x64xf32, #tpu.memory_space<vmem>>, vector<1x17x64xf32>
    %1 = vector.shape_cast %0 : vector<1x17x64xf32> to vector<17x64xf32>
    %c0_2 = arith.constant 0 : index
    %c0_3 = arith.constant 0 : index
    %2 = vector.load %arg2[%c0_2, %c0_3] : memref<64x32xf32, #tpu.memory_space<vmem>>, vector<64x32xf32>
    %cst = arith.constant dense<0.000000e+00> : vector<17x32xf32>
    %3 = tpu.matmul %1, %2, %cst {dimension_numbers = #tpu.dot_dimension_numbers<[1], [0], [0], [1], [0, 0, 1, 1], [], []>} : vector<17x64xf32>, vector<64x32xf32>, vector<17x32xf32> -> vector<17x32xf32>
    %c0_4 = arith.constant 0 : index
    %c0_5 = arith.constant 0 : index
    %4 = vector.load %arg3[%c0_4, %c0_5] : memref<1x32xf32, #tpu.memory_space<vmem>>, vector<1x32xf32>
    %5 = vector.broadcast %4 : vector<1x32xf32> to vector<17x32xf32>
    %6 = arith.addf %3, %5 : vector<17x32xf32>
    %c0_6 = arith.constant 0 : index
    %c0_7 = arith.constant 0 : index
    %7 = vector.load %arg5[%c0_6, %c0_7] : memref<17x32xf32, #tpu.memory_space<vmem>>, vector<17x32xf32>
    %8 = arith.addf %6, %7 : vector<17x32xf32>
    %c0_8 = arith.constant 0 : index
    %c0_9 = arith.constant 0 : index
    %9 = vector.load %arg24[%c0_8, %c0_9] : memref<17x32xf32, #tpu.memory_space<vmem>>, vector<17x32xf32>
    tpu.vector_store %arg24[%c0_8, %c0_9], %8 {strides = array<i32>} : memref<17x32xf32, #tpu.memory_space<vmem>>, vector<17x32xf32>,
    %c0_10 = arith.constant 0 : index
    %c0_11 = arith.constant 0 : index
    %10 = vector.load %arg4[%c0_10, %c0_11] : memref<1x32xf32, #tpu.memory_space<vmem>>, vector<1x32xf32>
    %c0_12 = arith.constant 0 : index
    %c0_13 = arith.constant 0 : index
    %11 = vector.load %arg5[%c0_12, %c0_13] : memref<17x32xf32, #tpu.memory_space<vmem>>, vector<1x32xf32>
    %12 = arith.addf %10, %11 : vector<1x32xf32>
    %c0_14 = arith.constant 0 : index
    %c0_15 = arith.constant 0 : index
    %13 = vector.load %arg24[%c0_14, %c0_15] : memref<17x32xf32, #tpu.memory_space<vmem>>, vector<1x32xf32>
    tpu.vector_store %arg24[%c0_14, %c0_15], %12 {strides = array<i32>} : memref<17x32xf32, #tpu.memory_space<vmem>>, vector<1x32xf32>,
    %c0_16 = arith.constant 0 : index
    %c0_17 = arith.constant 0 : index
    %14 = vector.load %arg24[%c0_16, %c0_17] : memref<17x32xf32, #tpu.memory_space<vmem>>, vector<17x32xf32>
    %c0_18 = arith.constant 0 : index
    %c0_19 = arith.constant 0 : index
    %c0_20 = arith.constant 0 : index
    %15 = vector.load %arg6[%c0_18, %c0_19, %c0_20] : memref<2x1x32xf32, #tpu.memory_space<vmem>>, vector<1x1x32xf32>
    %16 = vector.shape_cast %15 : vector<1x1x32xf32> to vector<1x32xf32>
    %c0_21 = arith.constant 0 : index
    %c0_22 = arith.constant 0 : index
    %c0_23 = arith.constant 0 : index
    %17 = vector.load %arg7[%c0_21, %c0_22, %c0_23] : memref<2x1x32xf32, #tpu.memory_space<vmem>>, vector<1x1x32xf32>
    %18 = vector.shape_cast %17 : vector<1x1x32xf32> to vector<1x32xf32>
    %cst_24 = arith.constant dense<0.000000e+00> : vector<17xf32>
    %19 = vector.multi_reduction <add>, %14, %cst_24 [1] : vector<17x32xf32> to vector<17xf32>
    %20 = vector.shape_cast %19 : vector<17xf32> to vector<17x1xf32>
    %cst_25 = arith.constant 3.200000e+01 : f32
    %21 = vector.broadcast %cst_25 : f32 to vector<17x1xf32>
    %22 = arith.divf %20, %21 : vector<17x1xf32>
    %23 = vector.broadcast %22 : vector<17x1xf32> to vector<17x32xf32>
    %24 = arith.subf %14, %23 : vector<17x32xf32>
    %25 = arith.mulf %24, %24 : vector<17x32xf32>
    %cst_26 = arith.constant dense<0.000000e+00> : vector<17xf32>
    %26 = vector.multi_reduction <add>, %25, %cst_26 [1] : vector<17x32xf32> to vector<17xf32>
    %27 = vector.shape_cast %26 : vector<17xf32> to vector<17x1xf32>
    %cst_27 = arith.constant 3.200000e+01 : f32
    %28 = vector.broadcast %cst_27 : f32 to vector<17x1xf32>
    %29 = arith.divf %27, %28 : vector<17x1xf32>
    %30 = vector.broadcast %22 : vector<17x1xf32> to vector<17x32xf32>
    %31 = arith.subf %14, %30 : vector<17x32xf32>
    %cst_28 = arith.constant 9.99999974E-6 : f32
    %32 = vector.broadcast %cst_28 : f32 to vector<17x1xf32>
    %33 = arith.addf %29, %32 : vector<17x1xf32>
    %34 = math.rsqrt %33 : vector<17x1xf32>
    %35 = vector.broadcast %34 : vector<17x1xf32> to vector<17x32xf32>
    %36 = arith.mulf %31, %35 : vector<17x32xf32>
    %37 = vector.broadcast %16 : vector<1x32xf32> to vector<17x32xf32>
    %38 = arith.mulf %36, %37 : vector<17x32xf32>
    %39 = vector.broadcast %18 : vector<1x32xf32> to vector<17x32xf32>
    %40 = arith.addf %38, %39 : vector<17x32xf32>
    %c0_29 = arith.constant 0 : index
    %c0_30 = arith.constant 0 : index
    %c0_31 = arith.constant 0 : index
    %41 = vector.load %arg12[%c0_29, %c0_30, %c0_31] : memref<2x1x32xf32, #tpu.memory_space<vmem>>, vector<1x1x32xf32>
    %42 = vector.shape_cast %41 : vector<1x1x32xf32> to vector<1x32xf32>
    %c0_32 = arith.constant 0 : index
    %c0_33 = arith.constant 0 : index
    %c0_34 = arith.constant 0 : index
    %c0_35 = arith.constant 0 : index
    %43 = vector.load %arg8[%c0_32, %c0_33, %c0_34, %c0_35] : memref<2x2x32x16xf32, #tpu.memory_space<vmem>>, vector<1x1x32x16xf32>
    %44 = vector.shape_cast %43 : vector<1x1x32x16xf32> to vector<32x16xf32>
    %cst_36 = arith.constant dense<0.000000e+00> : vector<17x16xf32>
    %45 = tpu.matmul %40, %44, %cst_36 {dimension_numbers = #tpu.dot_dimension_numbers<[1], [0], [0], [1], [0, 0, 1, 1], [], []>} : vector<17x32xf32>, vector<32x16xf32>, vector<17x16xf32> -> vector<17x16xf32>
    %c0_37 = arith.constant 0 : index
    %c0_38 = arith.constant 0 : index
    %c0_39 = arith.constant 0 : index
    %c0_40 = arith.constant 0 : index
    %46 = vector.load %arg9[%c0_37, %c0_38, %c0_39, %c0_40] : memref<2x2x32x16xf32, #tpu.memory_space<vmem>>, vector<1x1x32x16xf32>
    %47 = vector.shape_cast %46 : vector<1x1x32x16xf32> to vector<32x16xf32>
    %cst_41 = arith.constant dense<0.000000e+00> : vector<17x16xf32>
    %48 = tpu.matmul %40, %47, %cst_41 {dimension_numbers = #tpu.dot_dimension_numbers<[1], [0], [0], [1], [0, 0, 1, 1], [], []>} : vector<17x32xf32>, vector<32x16xf32>, vector<17x16xf32> -> vector<17x16xf32>
    %c0_42 = arith.constant 0 : index
    %c0_43 = arith.constant 0 : index
    %c0_44 = arith.constant 0 : index
    %c0_45 = arith.constant 0 : index
    %49 = vector.load %arg10[%c0_42, %c0_43, %c0_44, %c0_45] : memref<2x2x32x16xf32, #tpu.memory_space<vmem>>, vector<1x1x32x16xf32>
    %50 = vector.shape_cast %49 : vector<1x1x32x16xf32> to vector<32x16xf32>
    %cst_46 = arith.constant dense<0.000000e+00> : vector<17x16xf32>
    %51 = tpu.matmul %40, %50, %cst_46 {dimension_numbers = #tpu.dot_dimension_numbers<[1], [0], [0], [1], [0, 0, 1, 1], [], []>} : vector<17x32xf32>, vector<32x16xf32>, vector<17x16xf32> -> vector<17x16xf32>
    %52 = tpu.transpose %48, [1, 0] : vector<17x16xf32> -> vector<16x17xf32>
    %cst_47 = arith.constant dense<0.000000e+00> : vector<17x17xf32>
    %53 = tpu.matmul %45, %52, %cst_47 {dimension_numbers = #tpu.dot_dimension_numbers<[1], [0], [0], [1], [0, 0, 1, 1], [], []>} : vector<17x16xf32>, vector<16x17xf32>, vector<17x17xf32> -> vector<17x17xf32>
    %cst_48 = arith.constant 0.176776692 : f32
    %54 = vector.broadcast %cst_48 : f32 to vector<17x17xf32>
    %55 = arith.mulf %53, %54 : vector<17x17xf32>
    %cst_49 = arith.constant dense<0xFF800000> : vector<17xf32>
    %56 = vector.multi_reduction <maximumf>, %55, %cst_49 [1] : vector<17x17xf32> to vector<17xf32>
    %57 = vector.shape_cast %56 : vector<17xf32> to vector<17x1xf32>
    %58 = vector.broadcast %57 : vector<17x1xf32> to vector<17x17xf32>
    %59 = arith.subf %55, %58 : vector<17x17xf32>
    %60 = math.exp %59 : vector<17x17xf32>
    %cst_50 = arith.constant dense<0.000000e+00> : vector<17xf32>
    %61 = vector.multi_reduction <add>, %60, %cst_50 [1] : vector<17x17xf32> to vector<17xf32>
    %62 = vector.shape_cast %61 : vector<17xf32> to vector<17x1xf32>
    %63 = vector.broadcast %62 : vector<17x1xf32> to vector<17x17xf32>
    %64 = arith.divf %60, %63 : vector<17x17xf32>
    %cst_51 = arith.constant dense<0.000000e+00> : vector<17x16xf32>
    %65 = tpu.matmul %64, %51, %cst_51 {dimension_numbers = #tpu.dot_dimension_numbers<[1], [0], [0], [1], [0, 0, 1, 1], [], []>} : vector<17x17xf32>, vector<17x16xf32>, vector<17x16xf32> -> vector<17x16xf32>
    %c0_52 = arith.constant 0 : index
    %c0_53 = arith.constant 0 : index
    %c0_54 = arith.constant 0 : index
    %c0_55 = arith.constant 0 : index
    %66 = vector.load %arg11[%c0_52, %c0_53, %c0_54, %c0_55] : memref<2x2x16x32xf32, #tpu.memory_space<vmem>>, vector<1x1x16x32xf32>
    %67 = vector.shape_cast %66 : vector<1x1x16x32xf32> to vector<16x32xf32>
    %cst_56 = arith.constant dense<0.000000e+00> : vector<17x32xf32>
    %68 = tpu.matmul %65, %67, %cst_56 {dimension_numbers = #tpu.dot_dimension_numbers<[1], [0], [0], [1], [0, 0, 1, 1], [], []>} : vector<17x16xf32>, vector<16x32xf32>, vector<17x32xf32> -> vector<17x32xf32>
    %69 = vector.broadcast %42 : vector<1x32xf32> to vector<17x32xf32>
    %70 = arith.addf %69, %68 : vector<17x32xf32>
    %c0_57 = arith.constant 0 : index
    %c1 = arith.constant 1 : index
    %c0_58 = arith.constant 0 : index
    %c0_59 = arith.constant 0 : index
    %71 = vector.load %arg8[%c0_57, %c1, %c0_58, %c0_59] : memref<2x2x32x16xf32, #tpu.memory_space<vmem>>, vector<1x1x32x16xf32>
    %72 = vector.shape_cast %71 : vector<1x1x32x16xf32> to vector<32x16xf32>
    %cst_60 = arith.constant dense<0.000000e+00> : vector<17x16xf32>
    %73 = tpu.matmul %40, %72, %cst_60 {dimension_numbers = #tpu.dot_dimension_numbers<[1], [0], [0], [1], [0, 0, 1, 1], [], []>} : vector<17x32xf32>, vector<32x16xf32>, vector<17x16xf32> -> vector<17x16xf32>
    %c0_61 = arith.constant 0 : index
    %c1_62 = arith.constant 1 : index
    %c0_63 = arith.constant 0 : index
    %c0_64 = arith.constant 0 : index
    %74 = vector.load %arg9[%c0_61, %c1_62, %c0_63, %c0_64] : memref<2x2x32x16xf32, #tpu.memory_space<vmem>>, vector<1x1x32x16xf32>
    %75 = vector.shape_cast %74 : vector<1x1x32x16xf32> to vector<32x16xf32>
    %cst_65 = arith.constant dense<0.000000e+00> : vector<17x16xf32>
    %76 = tpu.matmul %40, %75, %cst_65 {dimension_numbers = #tpu.dot_dimension_numbers<[1], [0], [0], [1], [0, 0, 1, 1], [], []>} : vector<17x32xf32>, vector<32x16xf32>, vector<17x16xf32> -> vector<17x16xf32>
    %c0_66 = arith.constant 0 : index
    %c1_67 = arith.constant 1 : index
    %c0_68 = arith.constant 0 : index
    %c0_69 = arith.constant 0 : index
    %77 = vector.load %arg10[%c0_66, %c1_67, %c0_68, %c0_69] : memref<2x2x32x16xf32, #tpu.memory_space<vmem>>, vector<1x1x32x16xf32>
    %78 = vector.shape_cast %77 : vector<1x1x32x16xf32> to vector<32x16xf32>
    %cst_70 = arith.constant dense<0.000000e+00> : vector<17x16xf32>
    %79 = tpu.matmul %40, %78, %cst_70 {dimension_numbers = #tpu.dot_dimension_numbers<[1], [0], [0], [1], [0, 0, 1, 1], [], []>} : vector<17x32xf32>, vector<32x16xf32>, vector<17x16xf32> -> vector<17x16xf32>
    %80 = tpu.transpose %76, [1, 0] : vector<17x16xf32> -> vector<16x17xf32>
    %cst_71 = arith.constant dense<0.000000e+00> : vector<17x17xf32>
    %81 = tpu.matmul %73, %80, %cst_71 {dimension_numbers = #tpu.dot_dimension_numbers<[1], [0], [0], [1], [0, 0, 1, 1], [], []>} : vector<17x16xf32>, vector<16x17xf32>, vector<17x17xf32> -> vector<17x17xf32>
    %cst_72 = arith.constant 0.176776692 : f32
    %82 = vector.broadcast %cst_72 : f32 to vector<17x17xf32>
    %83 = arith.mulf %81, %82 : vector<17x17xf32>
    %cst_73 = arith.constant dense<0xFF800000> : vector<17xf32>
    %84 = vector.multi_reduction <maximumf>, %83, %cst_73 [1] : vector<17x17xf32> to vector<17xf32>
    %85 = vector.shape_cast %84 : vector<17xf32> to vector<17x1xf32>
    %86 = vector.broadcast %85 : vector<17x1xf32> to vector<17x17xf32>
    %87 = arith.subf %83, %86 : vector<17x17xf32>
    %88 = math.exp %87 : vector<17x17xf32>
    %cst_74 = arith.constant dense<0.000000e+00> : vector<17xf32>
    %89 = vector.multi_reduction <add>, %88, %cst_74 [1] : vector<17x17xf32> to vector<17xf32>
    %90 = vector.shape_cast %89 : vector<17xf32> to vector<17x1xf32>
    %91 = vector.broadcast %90 : vector<17x1xf32> to vector<17x17xf32>
    %92 = arith.divf %88, %91 : vector<17x17xf32>
    %cst_75 = arith.constant dense<0.000000e+00> : vector<17x16xf32>
    %93 = tpu.matmul %92, %79, %cst_75 {dimension_numbers = #tpu.dot_dimension_numbers<[1], [0], [0], [1], [0, 0, 1, 1], [], []>} : vector<17x17xf32>, vector<17x16xf32>, vector<17x16xf32> -> vector<17x16xf32>
    %c0_76 = arith.constant 0 : index
    %c1_77 = arith.constant 1 : index
    %c0_78 = arith.constant 0 : index
    %c0_79 = arith.constant 0 : index
    %94 = vector.load %arg11[%c0_76, %c1_77, %c0_78, %c0_79] : memref<2x2x16x32xf32, #tpu.memory_space<vmem>>, vector<1x1x16x32xf32>
    %95 = vector.shape_cast %94 : vector<1x1x16x32xf32> to vector<16x32xf32>
    %cst_80 = arith.constant dense<0.000000e+00> : vector<17x32xf32>
    %96 = tpu.matmul %93, %95, %cst_80 {dimension_numbers = #tpu.dot_dimension_numbers<[1], [0], [0], [1], [0, 0, 1, 1], [], []>} : vector<17x16xf32>, vector<16x32xf32>, vector<17x32xf32> -> vector<17x32xf32>
    %97 = arith.addf %70, %96 : vector<17x32xf32>
    %98 = arith.addf %14, %97 : vector<17x32xf32>
    %c0_81 = arith.constant 0 : index
    %c0_82 = arith.constant 0 : index
    %c0_83 = arith.constant 0 : index
    %99 = vector.load %arg13[%c0_81, %c0_82, %c0_83] : memref<2x1x32xf32, #tpu.memory_space<vmem>>, vector<1x1x32xf32>
    %100 = vector.shape_cast %99 : vector<1x1x32xf32> to vector<1x32xf32>
    %c0_84 = arith.constant 0 : index
    %c0_85 = arith.constant 0 : index
    %c0_86 = arith.constant 0 : index
    %101 = vector.load %arg14[%c0_84, %c0_85, %c0_86] : memref<2x1x32xf32, #tpu.memory_space<vmem>>, vector<1x1x32xf32>
    %102 = vector.shape_cast %101 : vector<1x1x32xf32> to vector<1x32xf32>
    %cst_87 = arith.constant dense<0.000000e+00> : vector<17xf32>
    %103 = vector.multi_reduction <add>, %98, %cst_87 [1] : vector<17x32xf32> to vector<17xf32>
    %104 = vector.shape_cast %103 : vector<17xf32> to vector<17x1xf32>
    %cst_88 = arith.constant 3.200000e+01 : f32
    %105 = vector.broadcast %cst_88 : f32 to vector<17x1xf32>
    %106 = arith.divf %104, %105 : vector<17x1xf32>
    %107 = vector.broadcast %106 : vector<17x1xf32> to vector<17x32xf32>
    %108 = arith.subf %98, %107 : vector<17x32xf32>
    %109 = arith.mulf %108, %108 : vector<17x32xf32>
    %cst_89 = arith.constant dense<0.000000e+00> : vector<17xf32>
    %110 = vector.multi_reduction <add>, %109, %cst_89 [1] : vector<17x32xf32> to vector<17xf32>
    %111 = vector.shape_cast %110 : vector<17xf32> to vector<17x1xf32>
    %cst_90 = arith.constant 3.200000e+01 : f32
    %112 = vector.broadcast %cst_90 : f32 to vector<17x1xf32>
    %113 = arith.divf %111, %112 : vector<17x1xf32>
    %114 = vector.broadcast %106 : vector<17x1xf32> to vector<17x32xf32>
    %115 = arith.subf %98, %114 : vector<17x32xf32>
    %cst_91 = arith.constant 9.99999974E-6 : f32
    %116 = vector.broadcast %cst_91 : f32 to vector<17x1xf32>
    %117 = arith.addf %113, %116 : vector<17x1xf32>
    %118 = math.rsqrt %117 : vector<17x1xf32>
    %119 = vector.broadcast %118 : vector<17x1xf32> to vector<17x32xf32>
    %120 = arith.mulf %115, %119 : vector<17x32xf32>
    %121 = vector.broadcast %100 : vector<1x32xf32> to vector<17x32xf32>
    %122 = arith.mulf %120, %121 : vector<17x32xf32>
    %123 = vector.broadcast %102 : vector<1x32xf32> to vector<17x32xf32>
    %124 = arith.addf %122, %123 : vector<17x32xf32>
    %c0_92 = arith.constant 0 : index
    %c0_93 = arith.constant 0 : index
    %c0_94 = arith.constant 0 : index
    %125 = vector.load %arg15[%c0_92, %c0_93, %c0_94] : memref<2x32x64xf32, #tpu.memory_space<vmem>>, vector<1x32x64xf32>
    %126 = vector.shape_cast %125 : vector<1x32x64xf32> to vector<32x64xf32>
    %cst_95 = arith.constant dense<0.000000e+00> : vector<17x64xf32>
    %127 = tpu.matmul %124, %126, %cst_95 {dimension_numbers = #tpu.dot_dimension_numbers<[1], [0], [0], [1], [0, 0, 1, 1], [], []>} : vector<17x32xf32>, vector<32x64xf32>, vector<17x64xf32> -> vector<17x64xf32>
    %c0_96 = arith.constant 0 : index
    %c0_97 = arith.constant 0 : index
    %c0_98 = arith.constant 0 : index
    %128 = vector.load %arg16[%c0_96, %c0_97, %c0_98] : memref<2x1x64xf32, #tpu.memory_space<vmem>>, vector<1x1x64xf32>
    %129 = vector.shape_cast %128 : vector<1x1x64xf32> to vector<1x64xf32>
    %130 = vector.broadcast %129 : vector<1x64xf32> to vector<17x64xf32>
    %131 = arith.addf %127, %130 : vector<17x64xf32>
    %cst_99 = arith.constant 5.000000e-01 : f32
    %132 = vector.broadcast %cst_99 : f32 to vector<17x64xf32>
    %133 = arith.mulf %132, %131 : vector<17x64xf32>
    %cst_100 = arith.constant 4.471500e-02 : f32
    %134 = vector.broadcast %cst_100 : f32 to vector<17x64xf32>
    %135 = arith.mulf %134, %131 : vector<17x64xf32>
    %136 = arith.mulf %135, %131 : vector<17x64xf32>
    %137 = arith.mulf %136, %131 : vector<17x64xf32>
    %138 = arith.addf %131, %137 : vector<17x64xf32>
    %cst_101 = arith.constant 0.797884583 : f32
    %139 = vector.broadcast %cst_101 : f32 to vector<17x64xf32>
    %140 = arith.mulf %139, %138 : vector<17x64xf32>
    %141 = math.tanh %140 : vector<17x64xf32>
    %cst_102 = arith.constant 1.000000e+00 : f32
    %142 = vector.broadcast %cst_102 : f32 to vector<17x64xf32>
    %143 = arith.addf %142, %141 : vector<17x64xf32>
    %144 = arith.mulf %133, %143 : vector<17x64xf32>
    %c0_103 = arith.constant 0 : index
    %c0_104 = arith.constant 0 : index
    %c0_105 = arith.constant 0 : index
    %145 = vector.load %arg17[%c0_103, %c0_104, %c0_105] : memref<2x64x32xf32, #tpu.memory_space<vmem>>, vector<1x64x32xf32>
    %146 = vector.shape_cast %145 : vector<1x64x32xf32> to vector<64x32xf32>
    %cst_106 = arith.constant dense<0.000000e+00> : vector<17x32xf32>
    %147 = tpu.matmul %144, %146, %cst_106 {dimension_numbers = #tpu.dot_dimension_numbers<[1], [0], [0], [1], [0, 0, 1, 1], [], []>} : vector<17x64xf32>, vector<64x32xf32>, vector<17x32xf32> -> vector<17x32xf32>
    %c0_107 = arith.constant 0 : index
    %c0_108 = arith.constant 0 : index
    %c0_109 = arith.constant 0 : index
    %148 = vector.load %arg18[%c0_107, %c0_108, %c0_109] : memref<2x1x32xf32, #tpu.memory_space<vmem>>, vector<1x1x32xf32>
    %149 = vector.shape_cast %148 : vector<1x1x32xf32> to vector<1x32xf32>
    %150 = vector.broadcast %149 : vector<1x32xf32> to vector<17x32xf32>
    %151 = arith.addf %147, %150 : vector<17x32xf32>
    %152 = arith.addf %98, %151 : vector<17x32xf32>
    %c0_110 = arith.constant 0 : index
    %c0_111 = arith.constant 0 : index
    %153 = vector.load %arg24[%c0_110, %c0_111] : memref<17x32xf32, #tpu.memory_space<vmem>>, vector<17x32xf32>
    tpu.vector_store %arg24[%c0_110, %c0_111], %152 {strides = array<i32>} : memref<17x32xf32, #tpu.memory_space<vmem>>, vector<17x32xf32>,
    %c0_112 = arith.constant 0 : index
    %c0_113 = arith.constant 0 : index
    %154 = vector.load %arg24[%c0_112, %c0_113] : memref<17x32xf32, #tpu.memory_space<vmem>>, vector<17x32xf32>
    %c1_114 = arith.constant 1 : index
    %c0_115 = arith.constant 0 : index
    %c0_116 = arith.constant 0 : index
    %155 = vector.load %arg6[%c1_114, %c0_115, %c0_116] : memref<2x1x32xf32, #tpu.memory_space<vmem>>, vector<1x1x32xf32>
    %156 = vector.shape_cast %155 : vector<1x1x32xf32> to vector<1x32xf32>
    %c1_117 = arith.constant 1 : index
    %c0_118 = arith.constant 0 : index
    %c0_119 = arith.constant 0 : index
    %157 = vector.load %arg7[%c1_117, %c0_118, %c0_119] : memref<2x1x32xf32, #tpu.memory_space<vmem>>, vector<1x1x32xf32>
    %158 = vector.shape_cast %157 : vector<1x1x32xf32> to vector<1x32xf32>
    %cst_120 = arith.constant dense<0.000000e+00> : vector<17xf32>
    %159 = vector.multi_reduction <add>, %154, %cst_120 [1] : vector<17x32xf32> to vector<17xf32>
    %160 = vector.shape_cast %159 : vector<17xf32> to vector<17x1xf32>
    %cst_121 = arith.constant 3.200000e+01 : f32
    %161 = vector.broadcast %cst_121 : f32 to vector<17x1xf32>
    %162 = arith.divf %160, %161 : vector<17x1xf32>
    %163 = vector.broadcast %162 : vector<17x1xf32> to vector<17x32xf32>
    %164 = arith.subf %154, %163 : vector<17x32xf32>
    %165 = arith.mulf %164, %164 : vector<17x32xf32>
    %cst_122 = arith.constant dense<0.000000e+00> : vector<17xf32>
    %166 = vector.multi_reduction <add>, %165, %cst_122 [1] : vector<17x32xf32> to vector<17xf32>
    %167 = vector.shape_cast %166 : vector<17xf32> to vector<17x1xf32>
    %cst_123 = arith.constant 3.200000e+01 : f32
    %168 = vector.broadcast %cst_123 : f32 to vector<17x1xf32>
    %169 = arith.divf %167, %168 : vector<17x1xf32>
    %170 = vector.broadcast %162 : vector<17x1xf32> to vector<17x32xf32>
    %171 = arith.subf %154, %170 : vector<17x32xf32>
    %cst_124 = arith.constant 9.99999974E-6 : f32
    %172 = vector.broadcast %cst_124 : f32 to vector<17x1xf32>
    %173 = arith.addf %169, %172 : vector<17x1xf32>
    %174 = math.rsqrt %173 : vector<17x1xf32>
    %175 = vector.broadcast %174 : vector<17x1xf32> to vector<17x32xf32>
    %176 = arith.mulf %171, %175 : vector<17x32xf32>
    %177 = vector.broadcast %156 : vector<1x32xf32> to vector<17x32xf32>
    %178 = arith.mulf %176, %177 : vector<17x32xf32>
    %179 = vector.broadcast %158 : vector<1x32xf32> to vector<17x32xf32>
    %180 = arith.addf %178, %179 : vector<17x32xf32>
    %c1_125 = arith.constant 1 : index
    %c0_126 = arith.constant 0 : index
    %c0_127 = arith.constant 0 : index
    %181 = vector.load %arg12[%c1_125, %c0_126, %c0_127] : memref<2x1x32xf32, #tpu.memory_space<vmem>>, vector<1x1x32xf32>
    %182 = vector.shape_cast %181 : vector<1x1x32xf32> to vector<1x32xf32>
    %c1_128 = arith.constant 1 : index
    %c0_129 = arith.constant 0 : index
    %c0_130 = arith.constant 0 : index
    %c0_131 = arith.constant 0 : index
    %183 = vector.load %arg8[%c1_128, %c0_129, %c0_130, %c0_131] : memref<2x2x32x16xf32, #tpu.memory_space<vmem>>, vector<1x1x32x16xf32>
    %184 = vector.shape_cast %183 : vector<1x1x32x16xf32> to vector<32x16xf32>
    %cst_132 = arith.constant dense<0.000000e+00> : vector<17x16xf32>
    %185 = tpu.matmul %180, %184, %cst_132 {dimension_numbers = #tpu.dot_dimension_numbers<[1], [0], [0], [1], [0, 0, 1, 1], [], []>} : vector<17x32xf32>, vector<32x16xf32>, vector<17x16xf32> -> vector<17x16xf32>
    %c1_133 = arith.constant 1 : index
    %c0_134 = arith.constant 0 : index
    %c0_135 = arith.constant 0 : index
    %c0_136 = arith.constant 0 : index
    %186 = vector.load %arg9[%c1_133, %c0_134, %c0_135, %c0_136] : memref<2x2x32x16xf32, #tpu.memory_space<vmem>>, vector<1x1x32x16xf32>
    %187 = vector.shape_cast %186 : vector<1x1x32x16xf32> to vector<32x16xf32>
    %cst_137 = arith.constant dense<0.000000e+00> : vector<17x16xf32>
    %188 = tpu.matmul %180, %187, %cst_137 {dimension_numbers = #tpu.dot_dimension_numbers<[1], [0], [0], [1], [0, 0, 1, 1], [], []>} : vector<17x32xf32>, vector<32x16xf32>, vector<17x16xf32> -> vector<17x16xf32>
    %c1_138 = arith.constant 1 : index
    %c0_139 = arith.constant 0 : index
    %c0_140 = arith.constant 0 : index
    %c0_141 = arith.constant 0 : index
    %189 = vector.load %arg10[%c1_138, %c0_139, %c0_140, %c0_141] : memref<2x2x32x16xf32, #tpu.memory_space<vmem>>, vector<1x1x32x16xf32>
    %190 = vector.shape_cast %189 : vector<1x1x32x16xf32> to vector<32x16xf32>
    %cst_142 = arith.constant dense<0.000000e+00> : vector<17x16xf32>
    %191 = tpu.matmul %180, %190, %cst_142 {dimension_numbers = #tpu.dot_dimension_numbers<[1], [0], [0], [1], [0, 0, 1, 1], [], []>} : vector<17x32xf32>, vector<32x16xf32>, vector<17x16xf32> -> vector<17x16xf32>
    %192 = tpu.transpose %188, [1, 0] : vector<17x16xf32> -> vector<16x17xf32>
    %cst_143 = arith.constant dense<0.000000e+00> : vector<17x17xf32>
    %193 = tpu.matmul %185, %192, %cst_143 {dimension_numbers = #tpu.dot_dimension_numbers<[1], [0], [0], [1], [0, 0, 1, 1], [], []>} : vector<17x16xf32>, vector<16x17xf32>, vector<17x17xf32> -> vector<17x17xf32>
    %cst_144 = arith.constant 0.176776692 : f32
    %194 = vector.broadcast %cst_144 : f32 to vector<17x17xf32>
    %195 = arith.mulf %193, %194 : vector<17x17xf32>
    %cst_145 = arith.constant dense<0xFF800000> : vector<17xf32>
    %196 = vector.multi_reduction <maximumf>, %195, %cst_145 [1] : vector<17x17xf32> to vector<17xf32>
    %197 = vector.shape_cast %196 : vector<17xf32> to vector<17x1xf32>
    %198 = vector.broadcast %197 : vector<17x1xf32> to vector<17x17xf32>
    %199 = arith.subf %195, %198 : vector<17x17xf32>
    %200 = math.exp %199 : vector<17x17xf32>
    %cst_146 = arith.constant dense<0.000000e+00> : vector<17xf32>
    %201 = vector.multi_reduction <add>, %200, %cst_146 [1] : vector<17x17xf32> to vector<17xf32>
    %202 = vector.shape_cast %201 : vector<17xf32> to vector<17x1xf32>
    %203 = vector.broadcast %202 : vector<17x1xf32> to vector<17x17xf32>
    %204 = arith.divf %200, %203 : vector<17x17xf32>
    %cst_147 = arith.constant dense<0.000000e+00> : vector<17x16xf32>
    %205 = tpu.matmul %204, %191, %cst_147 {dimension_numbers = #tpu.dot_dimension_numbers<[1], [0], [0], [1], [0, 0, 1, 1], [], []>} : vector<17x17xf32>, vector<17x16xf32>, vector<17x16xf32> -> vector<17x16xf32>
    %c1_148 = arith.constant 1 : index
    %c0_149 = arith.constant 0 : index
    %c0_150 = arith.constant 0 : index
    %c0_151 = arith.constant 0 : index
    %206 = vector.load %arg11[%c1_148, %c0_149, %c0_150, %c0_151] : memref<2x2x16x32xf32, #tpu.memory_space<vmem>>, vector<1x1x16x32xf32>
    %207 = vector.shape_cast %206 : vector<1x1x16x32xf32> to vector<16x32xf32>
    %cst_152 = arith.constant dense<0.000000e+00> : vector<17x32xf32>
    %208 = tpu.matmul %205, %207, %cst_152 {dimension_numbers = #tpu.dot_dimension_numbers<[1], [0], [0], [1], [0, 0, 1, 1], [], []>} : vector<17x16xf32>, vector<16x32xf32>, vector<17x32xf32> -> vector<17x32xf32>
    %209 = vector.broadcast %182 : vector<1x32xf32> to vector<17x32xf32>
    %210 = arith.addf %209, %208 : vector<17x32xf32>
    %c1_153 = arith.constant 1 : index
    %c1_154 = arith.constant 1 : index
    %c0_155 = arith.constant 0 : index
    %c0_156 = arith.constant 0 : index
    %211 = vector.load %arg8[%c1_153, %c1_154, %c0_155, %c0_156] : memref<2x2x32x16xf32, #tpu.memory_space<vmem>>, vector<1x1x32x16xf32>
    %212 = vector.shape_cast %211 : vector<1x1x32x16xf32> to vector<32x16xf32>
    %cst_157 = arith.constant dense<0.000000e+00> : vector<17x16xf32>
    %213 = tpu.matmul %180, %212, %cst_157 {dimension_numbers = #tpu.dot_dimension_numbers<[1], [0], [0], [1], [0, 0, 1, 1], [], []>} : vector<17x32xf32>, vector<32x16xf32>, vector<17x16xf32> -> vector<17x16xf32>
    %c1_158 = arith.constant 1 : index
    %c1_159 = arith.constant 1 : index
    %c0_160 = arith.constant 0 : index
    %c0_161 = arith.constant 0 : index
    %214 = vector.load %arg9[%c1_158, %c1_159, %c0_160, %c0_161] : memref<2x2x32x16xf32, #tpu.memory_space<vmem>>, vector<1x1x32x16xf32>
    %215 = vector.shape_cast %214 : vector<1x1x32x16xf32> to vector<32x16xf32>
    %cst_162 = arith.constant dense<0.000000e+00> : vector<17x16xf32>
    %216 = tpu.matmul %180, %215, %cst_162 {dimension_numbers = #tpu.dot_dimension_numbers<[1], [0], [0], [1], [0, 0, 1, 1], [], []>} : vector<17x32xf32>, vector<32x16xf32>, vector<17x16xf32> -> vector<17x16xf32>
    %c1_163 = arith.constant 1 : index
    %c1_164 = arith.constant 1 : index
    %c0_165 = arith.constant 0 : index
    %c0_166 = arith.constant 0 : index
    %217 = vector.load %arg10[%c1_163, %c1_164, %c0_165, %c0_166] : memref<2x2x32x16xf32, #tpu.memory_space<vmem>>, vector<1x1x32x16xf32>
    %218 = vector.shape_cast %217 : vector<1x1x32x16xf32> to vector<32x16xf32>
    %cst_167 = arith.constant dense<0.000000e+00> : vector<17x16xf32>
    %219 = tpu.matmul %180, %218, %cst_167 {dimension_numbers = #tpu.dot_dimension_numbers<[1], [0], [0], [1], [0, 0, 1, 1], [], []>} : vector<17x32xf32>, vector<32x16xf32>, vector<17x16xf32> -> vector<17x16xf32>
    %220 = tpu.transpose %216, [1, 0] : vector<17x16xf32> -> vector<16x17xf32>
    %cst_168 = arith.constant dense<0.000000e+00> : vector<17x17xf32>
    %221 = tpu.matmul %213, %220, %cst_168 {dimension_numbers = #tpu.dot_dimension_numbers<[1], [0], [0], [1], [0, 0, 1, 1], [], []>} : vector<17x16xf32>, vector<16x17xf32>, vector<17x17xf32> -> vector<17x17xf32>
    %cst_169 = arith.constant 0.176776692 : f32
    %222 = vector.broadcast %cst_169 : f32 to vector<17x17xf32>
    %223 = arith.mulf %221, %222 : vector<17x17xf32>
    %cst_170 = arith.constant dense<0xFF800000> : vector<17xf32>
    %224 = vector.multi_reduction <maximumf>, %223, %cst_170 [1] : vector<17x17xf32> to vector<17xf32>
    %225 = vector.shape_cast %224 : vector<17xf32> to vector<17x1xf32>
    %226 = vector.broadcast %225 : vector<17x1xf32> to vector<17x17xf32>
    %227 = arith.subf %223, %226 : vector<17x17xf32>
    %228 = math.exp %227 : vector<17x17xf32>
    %cst_171 = arith.constant dense<0.000000e+00> : vector<17xf32>
    %229 = vector.multi_reduction <add>, %228, %cst_171 [1] : vector<17x17xf32> to vector<17xf32>
    %230 = vector.shape_cast %229 : vector<17xf32> to vector<17x1xf32>
    %231 = vector.broadcast %230 : vector<17x1xf32> to vector<17x17xf32>
    %232 = arith.divf %228, %231 : vector<17x17xf32>
    %cst_172 = arith.constant dense<0.000000e+00> : vector<17x16xf32>
    %233 = tpu.matmul %232, %219, %cst_172 {dimension_numbers = #tpu.dot_dimension_numbers<[1], [0], [0], [1], [0, 0, 1, 1], [], []>} : vector<17x17xf32>, vector<17x16xf32>, vector<17x16xf32> -> vector<17x16xf32>
    %c1_173 = arith.constant 1 : index
    %c1_174 = arith.constant 1 : index
    %c0_175 = arith.constant 0 : index
    %c0_176 = arith.constant 0 : index
    %234 = vector.load %arg11[%c1_173, %c1_174, %c0_175, %c0_176] : memref<2x2x16x32xf32, #tpu.memory_space<vmem>>, vector<1x1x16x32xf32>
    %235 = vector.shape_cast %234 : vector<1x1x16x32xf32> to vector<16x32xf32>
    %cst_177 = arith.constant dense<0.000000e+00> : vector<17x32xf32>
    %236 = tpu.matmul %233, %235, %cst_177 {dimension_numbers = #tpu.dot_dimension_numbers<[1], [0], [0], [1], [0, 0, 1, 1], [], []>} : vector<17x16xf32>, vector<16x32xf32>, vector<17x32xf32> -> vector<17x32xf32>
    %237 = arith.addf %210, %236 : vector<17x32xf32>
    %238 = arith.addf %154, %237 : vector<17x32xf32>
    %c1_178 = arith.constant 1 : index
    %c0_179 = arith.constant 0 : index
    %c0_180 = arith.constant 0 : index
    %239 = vector.load %arg13[%c1_178, %c0_179, %c0_180] : memref<2x1x32xf32, #tpu.memory_space<vmem>>, vector<1x1x32xf32>
    %240 = vector.shape_cast %239 : vector<1x1x32xf32> to vector<1x32xf32>
    %c1_181 = arith.constant 1 : index
    %c0_182 = arith.constant 0 : index
    %c0_183 = arith.constant 0 : index
    %241 = vector.load %arg14[%c1_181, %c0_182, %c0_183] : memref<2x1x32xf32, #tpu.memory_space<vmem>>, vector<1x1x32xf32>
    %242 = vector.shape_cast %241 : vector<1x1x32xf32> to vector<1x32xf32>
    %cst_184 = arith.constant dense<0.000000e+00> : vector<17xf32>
    %243 = vector.multi_reduction <add>, %238, %cst_184 [1] : vector<17x32xf32> to vector<17xf32>
    %244 = vector.shape_cast %243 : vector<17xf32> to vector<17x1xf32>
    %cst_185 = arith.constant 3.200000e+01 : f32
    %245 = vector.broadcast %cst_185 : f32 to vector<17x1xf32>
    %246 = arith.divf %244, %245 : vector<17x1xf32>
    %247 = vector.broadcast %246 : vector<17x1xf32> to vector<17x32xf32>
    %248 = arith.subf %238, %247 : vector<17x32xf32>
    %249 = arith.mulf %248, %248 : vector<17x32xf32>
    %cst_186 = arith.constant dense<0.000000e+00> : vector<17xf32>
    %250 = vector.multi_reduction <add>, %249, %cst_186 [1] : vector<17x32xf32> to vector<17xf32>
    %251 = vector.shape_cast %250 : vector<17xf32> to vector<17x1xf32>
    %cst_187 = arith.constant 3.200000e+01 : f32
    %252 = vector.broadcast %cst_187 : f32 to vector<17x1xf32>
    %253 = arith.divf %251, %252 : vector<17x1xf32>
    %254 = vector.broadcast %246 : vector<17x1xf32> to vector<17x32xf32>
    %255 = arith.subf %238, %254 : vector<17x32xf32>
    %cst_188 = arith.constant 9.99999974E-6 : f32
    %256 = vector.broadcast %cst_188 : f32 to vector<17x1xf32>
    %257 = arith.addf %253, %256 : vector<17x1xf32>
    %258 = math.rsqrt %257 : vector<17x1xf32>
    %259 = vector.broadcast %258 : vector<17x1xf32> to vector<17x32xf32>
    %260 = arith.mulf %255, %259 : vector<17x32xf32>
    %261 = vector.broadcast %240 : vector<1x32xf32> to vector<17x32xf32>
    %262 = arith.mulf %260, %261 : vector<17x32xf32>
    %263 = vector.broadcast %242 : vector<1x32xf32> to vector<17x32xf32>
    %264 = arith.addf %262, %263 : vector<17x32xf32>
    %c1_189 = arith.constant 1 : index
    %c0_190 = arith.constant 0 : index
    %c0_191 = arith.constant 0 : index
    %265 = vector.load %arg15[%c1_189, %c0_190, %c0_191] : memref<2x32x64xf32, #tpu.memory_space<vmem>>, vector<1x32x64xf32>
    %266 = vector.shape_cast %265 : vector<1x32x64xf32> to vector<32x64xf32>
    %cst_192 = arith.constant dense<0.000000e+00> : vector<17x64xf32>
    %267 = tpu.matmul %264, %266, %cst_192 {dimension_numbers = #tpu.dot_dimension_numbers<[1], [0], [0], [1], [0, 0, 1, 1], [], []>} : vector<17x32xf32>, vector<32x64xf32>, vector<17x64xf32> -> vector<17x64xf32>
    %c1_193 = arith.constant 1 : index
    %c0_194 = arith.constant 0 : index
    %c0_195 = arith.constant 0 : index
    %268 = vector.load %arg16[%c1_193, %c0_194, %c0_195] : memref<2x1x64xf32, #tpu.memory_space<vmem>>, vector<1x1x64xf32>
    %269 = vector.shape_cast %268 : vector<1x1x64xf32> to vector<1x64xf32>
    %270 = vector.broadcast %269 : vector<1x64xf32> to vector<17x64xf32>
    %271 = arith.addf %267, %270 : vector<17x64xf32>
    %cst_196 = arith.constant 5.000000e-01 : f32
    %272 = vector.broadcast %cst_196 : f32 to vector<17x64xf32>
    %273 = arith.mulf %272, %271 : vector<17x64xf32>
    %cst_197 = arith.constant 4.471500e-02 : f32
    %274 = vector.broadcast %cst_197 : f32 to vector<17x64xf32>
    %275 = arith.mulf %274, %271 : vector<17x64xf32>
    %276 = arith.mulf %275, %271 : vector<17x64xf32>
    %277 = arith.mulf %276, %271 : vector<17x64xf32>
    %278 = arith.addf %271, %277 : vector<17x64xf32>
    %cst_198 = arith.constant 0.797884583 : f32
    %279 = vector.broadcast %cst_198 : f32 to vector<17x64xf32>
    %280 = arith.mulf %279, %278 : vector<17x64xf32>
    %281 = math.tanh %280 : vector<17x64xf32>
    %cst_199 = arith.constant 1.000000e+00 : f32
    %282 = vector.broadcast %cst_199 : f32 to vector<17x64xf32>
    %283 = arith.addf %282, %281 : vector<17x64xf32>
    %284 = arith.mulf %273, %283 : vector<17x64xf32>
    %c1_200 = arith.constant 1 : index
    %c0_201 = arith.constant 0 : index
    %c0_202 = arith.constant 0 : index
    %285 = vector.load %arg17[%c1_200, %c0_201, %c0_202] : memref<2x64x32xf32, #tpu.memory_space<vmem>>, vector<1x64x32xf32>
    %286 = vector.shape_cast %285 : vector<1x64x32xf32> to vector<64x32xf32>
    %cst_203 = arith.constant dense<0.000000e+00> : vector<17x32xf32>
    %287 = tpu.matmul %284, %286, %cst_203 {dimension_numbers = #tpu.dot_dimension_numbers<[1], [0], [0], [1], [0, 0, 1, 1], [], []>} : vector<17x64xf32>, vector<64x32xf32>, vector<17x32xf32> -> vector<17x32xf32>
    %c1_204 = arith.constant 1 : index
    %c0_205 = arith.constant 0 : index
    %c0_206 = arith.constant 0 : index
    %288 = vector.load %arg18[%c1_204, %c0_205, %c0_206] : memref<2x1x32xf32, #tpu.memory_space<vmem>>, vector<1x1x32xf32>
    %289 = vector.shape_cast %288 : vector<1x1x32xf32> to vector<1x32xf32>
    %290 = vector.broadcast %289 : vector<1x32xf32> to vector<17x32xf32>
    %291 = arith.addf %287, %290 : vector<17x32xf32>
    %292 = arith.addf %238, %291 : vector<17x32xf32>
    %c0_207 = arith.constant 0 : index
    %c0_208 = arith.constant 0 : index
    %293 = vector.load %arg24[%c0_207, %c0_208] : memref<17x32xf32, #tpu.memory_space<vmem>>, vector<17x32xf32>
    tpu.vector_store %arg24[%c0_207, %c0_208], %292 {strides = array<i32>} : memref<17x32xf32, #tpu.memory_space<vmem>>, vector<17x32xf32>,
    %c0_209 = arith.constant 0 : index
    %c0_210 = arith.constant 0 : index
    %294 = vector.load %arg24[%c0_209, %c0_210] : memref<17x32xf32, #tpu.memory_space<vmem>>, vector<1x32xf32>
    %c0_211 = arith.constant 0 : index
    %c0_212 = arith.constant 0 : index
    %295 = vector.load %arg19[%c0_211, %c0_212] : memref<32x64xf32, #tpu.memory_space<vmem>>, vector<32x64xf32>
    %cst_213 = arith.constant dense<0.000000e+00> : vector<1x64xf32>
    %296 = tpu.matmul %294, %295, %cst_213 {dimension_numbers = #tpu.dot_dimension_numbers<[1], [0], [0], [1], [0, 0, 1, 1], [], []>} : vector<1x32xf32>, vector<32x64xf32>, vector<1x64xf32> -> vector<1x64xf32>
    %c0_214 = arith.constant 0 : index
    %c0_215 = arith.constant 0 : index
    %297 = vector.load %arg20[%c0_214, %c0_215] : memref<1x64xf32, #tpu.memory_space<vmem>>, vector<1x64xf32>
    %298 = arith.addf %296, %297 : vector<1x64xf32>
    %cst_216 = arith.constant 5.000000e-01 : f32
    %299 = vector.broadcast %cst_216 : f32 to vector<1x64xf32>
    %300 = arith.mulf %299, %298 : vector<1x64xf32>
    %cst_217 = arith.constant 4.471500e-02 : f32
    %301 = vector.broadcast %cst_217 : f32 to vector<1x64xf32>
    %302 = arith.mulf %301, %298 : vector<1x64xf32>
    %303 = arith.mulf %302, %298 : vector<1x64xf32>
    %304 = arith.mulf %303, %298 : vector<1x64xf32>
    %305 = arith.addf %298, %304 : vector<1x64xf32>
    %cst_218 = arith.constant 0.797884583 : f32
    %306 = vector.broadcast %cst_218 : f32 to vector<1x64xf32>
    %307 = arith.mulf %306, %305 : vector<1x64xf32>
    %308 = math.tanh %307 : vector<1x64xf32>
    %cst_219 = arith.constant 1.000000e+00 : f32
    %309 = vector.broadcast %cst_219 : f32 to vector<1x64xf32>
    %310 = arith.addf %309, %308 : vector<1x64xf32>
    %311 = arith.mulf %300, %310 : vector<1x64xf32>
    %c0_220 = arith.constant 0 : index
    %c0_221 = arith.constant 0 : index
    %312 = vector.load %arg21[%c0_220, %c0_221] : memref<64x128xf32, #tpu.memory_space<vmem>>, vector<64x128xf32>
    %cst_222 = arith.constant dense<0.000000e+00> : vector<1x128xf32>
    %313 = tpu.matmul %311, %312, %cst_222 {dimension_numbers = #tpu.dot_dimension_numbers<[1], [0], [0], [1], [0, 0, 1, 1], [], []>} : vector<1x64xf32>, vector<64x128xf32>, vector<1x128xf32> -> vector<1x128xf32>
    %c0_223 = arith.constant 0 : index
    %c0_224 = arith.constant 0 : index
    %314 = vector.load %arg22[%c0_223, %c0_224] : memref<1x128xf32, #tpu.memory_space<vmem>>, vector<1x128xf32>
    %315 = arith.addf %313, %314 : vector<1x128xf32>
    %c0_225 = arith.constant 0 : index
    %c0_226 = arith.constant 0 : index
    %c0_227 = arith.constant 0 : index
    %316 = vector.load %arg23[%c0_225, %c0_226, %c0_227] : memref<1x1x128xf32, #tpu.memory_space<vmem>>, vector<1x1x128xf32>
    %317 = vector.shape_cast %316 : vector<1x1x128xf32> to vector<1x128xf32>
    %318 = vector.shape_cast %315 : vector<1x128xf32> to vector<1x1x128xf32>
    tpu.vector_store %arg23[%c0_225, %c0_226, %c0_227], %318 {strides = array<i32>} : memref<1x1x128xf32, #tpu.memory_space<vmem>>, vector<1x1x128xf32>,
    return
  }
  func.func @transform_0(%arg0: i32) -> (i32, i32, i32) {
    %c0_i32 = arith.constant 0 : i32
    %c0_i32_0 = arith.constant 0 : i32
    %c0_i32_1 = arith.constant 0 : i32
    return %arg0, %c0_i32, %c0_i32_0 : i32, i32, i32
  }
  func.func @transform_1(%arg0: i32) -> (i32, i32) {
    %c0_i32 = arith.constant 0 : i32
    %c0_i32_0 = arith.constant 0 : i32
    %c0_i32_1 = arith.constant 0 : i32
    return %c0_i32, %c0_i32_0 : i32, i32
  }
  func.func @transform_2(%arg0: i32) -> (i32, i32) {
    %c0_i32 = arith.constant 0 : i32
    %c0_i32_0 = arith.constant 0 : i32
    %c0_i32_1 = arith.constant 0 : i32
    return %c0_i32, %c0_i32_0 : i32, i32
  }
  func.func @transform_3(%arg0: i32) -> (i32, i32) {
    %c0_i32 = arith.constant 0 : i32
    %c0_i32_0 = arith.constant 0 : i32
    %c0_i32_1 = arith.constant 0 : i32
    return %c0_i32, %c0_i32_0 : i32, i32
  }
  func.func @transform_4(%arg0: i32) -> (i32, i32) {
    %c0_i32 = arith.constant 0 : i32
    %c0_i32_0 = arith.constant 0 : i32
    %c0_i32_1 = arith.constant 0 : i32
    return %c0_i32, %c0_i32_0 : i32, i32
  }
  func.func @transform_5(%arg0: i32) -> (i32, i32, i32) {
    %c0_i32 = arith.constant 0 : i32
    %c0_i32_0 = arith.constant 0 : i32
    %c0_i32_1 = arith.constant 0 : i32
    %c0_i32_2 = arith.constant 0 : i32
    return %c0_i32, %c0_i32_0, %c0_i32_1 : i32, i32, i32
  }
  func.func @transform_6(%arg0: i32) -> (i32, i32, i32) {
    %c0_i32 = arith.constant 0 : i32
    %c0_i32_0 = arith.constant 0 : i32
    %c0_i32_1 = arith.constant 0 : i32
    %c0_i32_2 = arith.constant 0 : i32
    return %c0_i32, %c0_i32_0, %c0_i32_1 : i32, i32, i32
  }
  func.func @transform_7(%arg0: i32) -> (i32, i32, i32, i32) {
    %c0_i32 = arith.constant 0 : i32
    %c0_i32_0 = arith.constant 0 : i32
    %c0_i32_1 = arith.constant 0 : i32
    %c0_i32_2 = arith.constant 0 : i32
    %c0_i32_3 = arith.constant 0 : i32
    return %c0_i32, %c0_i32_0, %c0_i32_1, %c0_i32_2 : i32, i32, i32, i32
  }
  func.func @transform_8(%arg0: i32) -> (i32, i32, i32, i32) {
    %c0_i32 = arith.constant 0 : i32
    %c0_i32_0 = arith.constant 0 : i32
    %c0_i32_1 = arith.constant 0 : i32
    %c0_i32_2 = arith.constant 0 : i32
    %c0_i32_3 = arith.constant 0 : i32
    return %c0_i32, %c0_i32_0, %c0_i32_1, %c0_i32_2 : i32, i32, i32, i32
  }
  func.func @transform_9(%arg0: i32) -> (i32, i32, i32, i32) {
    %c0_i32 = arith.constant 0 : i32
    %c0_i32_0 = arith.constant 0 : i32
    %c0_i32_1 = arith.constant 0 : i32
    %c0_i32_2 = arith.constant 0 : i32
    %c0_i32_3 = arith.constant 0 : i32
    return %c0_i32, %c0_i32_0, %c0_i32_1, %c0_i32_2 : i32, i32, i32, i32
  }
  func.func @transform_10(%arg0: i32) -> (i32, i32, i32, i32) {
    %c0_i32 = arith.constant 0 : i32
    %c0_i32_0 = arith.constant 0 : i32
    %c0_i32_1 = arith.constant 0 : i32
    %c0_i32_2 = arith.constant 0 : i32
    %c0_i32_3 = arith.constant 0 : i32
    return %c0_i32, %c0_i32_0, %c0_i32_1, %c0_i32_2 : i32, i32, i32, i32
  }
  func.func @transform_11(%arg0: i32) -> (i32, i32, i32) {
    %c0_i32 = arith.constant 0 : i32
    %c0_i32_0 = arith.constant 0 : i32
    %c0_i32_1 = arith.constant 0 : i32
    %c0_i32_2 = arith.constant 0 : i32
    return %c0_i32, %c0_i32_0, %c0_i32_1 : i32, i32, i32
  }
  func.func @transform_12(%arg0: i32) -> (i32, i32, i32) {
    %c0_i32 = arith.constant 0 : i32
    %c0_i32_0 = arith.constant 0 : i32
    %c0_i32_1 = arith.constant 0 : i32
    %c0_i32_2 = arith.constant 0 : i32
    return %c0_i32, %c0_i32_0, %c0_i32_1 : i32, i32, i32
  }
  func.func @transform_13(%arg0: i32) -> (i32, i32, i32) {
    %c0_i32 = arith.constant 0 : i32
    %c0_i32_0 = arith.constant 0 : i32
    %c0_i32_1 = arith.constant 0 : i32
    %c0_i32_2 = arith.constant 0 : i32
    return %c0_i32, %c0_i32_0, %c0_i32_1 : i32, i32, i32
  }
  func.func @transform_14(%arg0: i32) -> (i32, i32, i32) {
    %c0_i32 = arith.constant 0 : i32
    %c0_i32_0 = arith.constant 0 : i32
    %c0_i32_1 = arith.constant 0 : i32
    %c0_i32_2 = arith.constant 0 : i32
    return %c0_i32, %c0_i32_0, %c0_i32_1 : i32, i32, i32
  }
  func.func @transform_15(%arg0: i32) -> (i32, i32, i32) {
    %c0_i32 = arith.constant 0 : i32
    %c0_i32_0 = arith.constant 0 : i32
    %c0_i32_1 = arith.constant 0 : i32
    %c0_i32_2 = arith.constant 0 : i32
    return %c0_i32, %c0_i32_0, %c0_i32_1 : i32, i32, i32
  }
  func.func @transform_16(%arg0: i32) -> (i32, i32, i32) {
    %c0_i32 = arith.constant 0 : i32
    %c0_i32_0 = arith.constant 0 : i32
    %c0_i32_1 = arith.constant 0 : i32
    %c0_i32_2 = arith.constant 0 : i32
    return %c0_i32, %c0_i32_0, %c0_i32_1 : i32, i32, i32
  }
  func.func @transform_17(%arg0: i32) -> (i32, i32, i32) {
    %c0_i32 = arith.constant 0 : i32
    %c0_i32_0 = arith.constant 0 : i32
    %c0_i32_1 = arith.constant 0 : i32
    %c0_i32_2 = arith.constant 0 : i32
    return %c0_i32, %c0_i32_0, %c0_i32_1 : i32, i32, i32
  }
  func.func @transform_18(%arg0: i32) -> (i32, i32) {
    %c0_i32 = arith.constant 0 : i32
    %c0_i32_0 = arith.constant 0 : i32
    %c0_i32_1 = arith.constant 0 : i32
    return %c0_i32, %c0_i32_0 : i32, i32
  }
  func.func @transform_19(%arg0: i32) -> (i32, i32) {
    %c0_i32 = arith.constant 0 : i32
    %c0_i32_0 = arith.constant 0 : i32
    %c0_i32_1 = arith.constant 0 : i32
    return %c0_i32, %c0_i32_0 : i32, i32
  }
  func.func @transform_20(%arg0: i32) -> (i32, i32) {
    %c0_i32 = arith.constant 0 : i32
    %c0_i32_0 = arith.constant 0 : i32
    %c0_i32_1 = arith.constant 0 : i32
    return %c0_i32, %c0_i32_0 : i32, i32
  }
  func.func @transform_21(%arg0: i32) -> (i32, i32) {
    %c0_i32 = arith.constant 0 : i32
    %c0_i32_0 = arith.constant 0 : i32
    %c0_i32_1 = arith.constant 0 : i32
    return %c0_i32, %c0_i32_0 : i32, i32
  }
  func.func @transform_22(%arg0: i32) -> (i32, i32, i32) {
    %c0_i32 = arith.constant 0 : i32
    %c0_i32_0 = arith.constant 0 : i32
    %c0_i32_1 = arith.constant 0 : i32
    return %arg0, %c0_i32, %c0_i32_0 : i32, i32, i32
  }
}

</mosaic_0001>

<bundles_post_ra>
// kernel: forward.1
= control target key start
LH: loop header
LB: loop body
LE: loop exit
PB: predicated region body
PF: predicated region fallthrough
CT: control target
= control target key end

     0   :  { %s6401_s0 = inlined_call_operand.vmem [shape: f32[2,17,64], index: 0, kind: input, shape index: {}]   ;;  %s6402_s1 = inlined_call_operand.vmem [shape: f32[64,32], index: 1, kind: input, shape index: {}]   ;;  %s6403_s2 = inlined_call_operand.vmem [shape: f32[1,32], index: 2, kind: input, shape index: {}]   ;;  %s6404_s3 = inlined_call_operand.vmem [shape: f32[1,32], index: 3, kind: input, shape index: {}]   ;;  %s6405_s4 = inlined_call_operand.vmem [shape: f32[17,32], index: 4, kind: input, shape index: {}]   ;;  %s6406_s5 = inlined_call_operand.vmem [shape: f32[2,1,32], index: 5, kind: input, shape index: {}]   ;;  %s6407_s6 = inlined_call_operand.vmem [shape: f32[2,1,32], index: 6, kind: input, shape index: {}]   ;;  %s6408_s7 = inlined_call_operand.vmem [shape: f32[2,2,32,16], index: 7, kind: input, shape index: {}]   ;;  %s6409_s8 = inlined_call_operand.vmem [shape: f32[2,2,32,16], index: 8, kind: input, shape index: {}]   ;;  %s6410_s9 = inlined_call_operand.vmem [shape: f32[2,2,32,16], index: 9, kind: input, shape index: {}]   ;;  %s6411_s10 = inlined_call_operand.vmem [shape: f32[2,2,16,32], index: 10, kind: input, shape index: {}]   ;;  %s6412_s11 = inlined_call_operand.vmem [shape: f32[2,1,32], index: 11, kind: input, shape index: {}]   ;;  %s6413_s12 = inlined_call_operand.vmem [shape: f32[2,1,32], index: 12, kind: input, shape index: {}]   ;;  %s6414_s13 = inlined_call_operand.vmem [shape: f32[2,1,32], index: 13, kind: input, shape index: {}]   ;;  %s6415_s14 = inlined_call_operand.vmem [shape: f32[2,32,64], index: 14, kind: input, shape index: {}]   ;;  %s6416_s15 = inlined_call_operand.vmem [shape: f32[2,1,64], index: 15, kind: input, shape index: {}]   ;;  %s6417_s16 = inlined_call_operand.vmem [shape: f32[2,64,32], index: 16, kind: input, shape index: {}]   ;;  %s6418_s17 = inlined_call_operand.vmem [shape: f32[2,1,32], index: 17, kind: input, shape index: {}]   ;;  %s6419_s18 = inlined_call_operand.vmem [shape: f32[32,64], index: 18, kind: input, shape index: {}]   ;;  %s6420_s19 = inlined_call_operand.vmem [shape: f32[1,64], index: 19, kind: input, shape index: {}]   ;;  %s6421_s20 = inlined_call_operand.vmem [shape: f32[64,128], index: 20, kind: input, shape index: {}]   ;;  %s6422_s21 = inlined_call_operand.vmem [shape: f32[1,128], index: 21, kind: input, shape index: {}]   ;;  %s6423_s22 = inlined_call_operand.hbm [shape: f32[2,1,128], index: 22, kind: output, shape index: {}]  }
   0x1   :  { %6434 = sst [smem:[#allocation12_spill]] %s6401_s0 }
   0x2   :  { %6435 = sst [smem:[#allocation13_spill]] %s6402_s1 }
   0x3   :  { %6436 = sst [smem:[#allocation14_spill]] %s6403_s2 }
   0x4   :  { %6437 = sst [smem:[#allocation15_spill]] %s6404_s3 }
   0x5   :  { %6438 = sst [smem:[#allocation16_spill]] %s6405_s4 }
   0x6   :  { %6439 = sst [smem:[#allocation17_spill]] %s6406_s5 }
   0x7   :  { %6440 = sst [smem:[#allocation18_spill]] %s6407_s6 }
   0x8   :  { %6441 = sst [smem:[#allocation19_spill]] %s6408_s7 }
   0x9   :  { %6442 = sst [smem:[#allocation20_spill]] %s6409_s8 }
   0xa   :  { %6443 = sst [smem:[#allocation21_spill]] %s6410_s9 }
   0xb   :  { %6444 = sst [smem:[#allocation22_spill]] %s6411_s10 }
   0xc   :  { %27 = vsyncpa [#allocation4], 0 }
   0xd   :  { %29 = vsyncpa [#allocation4 + $0x1], 0  ;;  %s5342_s3 = smov 0   ;;  %s5344_s28 = smov 0  }
   0xe   :  { %s5346_s29 = smov 0   ;;  %s5348_s30 = smov 0  }
   0xf LB: > { %6445 = sst [smem:[#allocation6_spill]] %s5210_s3  ;;  %s5363_s4 = sadd.s32 4294967295, %s5222_s30   ;;  %s5222_s30 = sphi %s5348_s30, %s6467_s30   ;;  %s5218_s29 = sphi %s5346_s29, %s6469_s29   ;;  %s5214_s28 = sphi %s5344_s28, %s6471_s28   ;;  %s5210_s3 = sphi %s5342_s3, %s6470_s3  }
  0x10   : > { %6446 = sst [smem:[#allocation7_spill]] %s5218_s29  ;;  %s4111_s0 = sadd.s32 4294967294, %s5222_s30  }
  0x11   : > { %6447 = sst [smem:[#allocation8_spill]] %s5222_s30  ;;  %s5367_s23 = sadd.s32 1, %s5222_s30  }
  0x12   : > { %6448 = sst [smem:[#allocation9_spill]] %s5367_s23  ;;  %s509_s1 = sadd.s32 1, %s5218_s29 }
  0x13   : > { %s506_s5 = ssub.s32 %s5222_s30, %s5367_s23  ;;  %p519_p0 = scmp.ne.s32.totalorder %s5218_s29, %s5214_s28 }
  0x14   : > { %p507_p1 = scmp.eq.s32.totalorder %s506_s5, 0  ;;  %p520_p2 = scmp.eq.s32.totalorder %s5363_s4, 1 }
  0x15   : > { %p525_p3 = scmp.ne.s32.totalorder %s5214_s28, %s5210_s3  ;;  %p526_p4 = scmp.eq.s32.totalorder %s4111_s0, 1 }
  0x16   : > { %s5378_s24 = scalar_select %p507_p1, %s5218_s29, %s509_s1  }
  0x17   : > { %p5380_p5 = por %p520_p2, %p519_p0  ;;  %p5384_p6 = por %p526_p4, %p525_p3 }
  0x18   : > { %6449 = sst [smem:[#allocation10_spill]] %s5378_s24  ;;  %p4114_p7 = scmp.ge.s32.totalorder %s5222_s30, 1 }
  0x19   : > { %s6451_s25 = scalar_select %p5384_p6, 1, 0 }
  0x1a   : > { %p615_p8 = scmp.lt.s32.totalorder %s5222_s30, 3 }
  0x1b   : > { %6452 = sst [smem:[#allocation11_spill]] %s6451_s25 }
  0x1c   : > { %p616_p9 = pnand %p4114_p7, %p615_p8 }
  0x1d   : > { %s6453_s27 = sld [smem:[#allocation13_spill]] (!%p616_p9)  ;;  %p676_p10 = scmp.lt.s32.totalorder (!%p616_p9), %s5363_s4, 1 }
  0x1e   : > { %619 = sbr.rel (%p616_p9) target bundleno = 6855 (0x1ac7), region = 108  ;;  %s6454_s30 = sld [smem:[#allocation12_spill]] (!%p616_p9) }
  0x1f   : > { %s6455_s23 = sld [smem:[#allocation14_spill]] (!%p616_p9) }
  0x20   : > { %s6456_s26 = sld [smem:[#allocation15_spill]] (!%p616_p9) }
  0x21   : > { %s6457_s24 = sld [smem:[#allocation16_spill]] (!%p616_p9) }
  0x22   : > { %s6458_s7 = sld [smem:[#allocation19_spill]] (!%p616_p9) }
  0x23   : > { %v691_v0 = vld [vmem:[%s6453_s27 + $0x38] sm:$0xff]  ;;  %v5224_v1 = vmov 0.0   ;;  %v690_v2 = vld [vmem:[%s6453_s27 + $0x30] sm:$0xff]  ;;  %vm5225_vm0 = vmmov 0   ;;  %v689_v3 = vld [vmem:[%s6453_s27 + $0x28] sm:$0xff]  ;;  %s677_s2 = scalar_select %p676_p10, %s5363_s4, 1 }
  0x24   : > { %4513 = vmatprep.subr.mxu0 %v5224_v1  ;;  %4529 = vmatprep.mubr.msk.f32.mxu0 %vm5225_vm0, %v5224_v1  ;;  %v688_v4 = vld [vmem:[%s6453_s27 + $0x20] sm:$0xff]  ;;  %v687_v5 = vld [vmem:[%s6453_s27 + $0x18] sm:$0xff]  ;;  %v686_v6 = vld [vmem:[%s6453_s27 + $0x10] sm:$0xff]  ;;  %vm699_vm1 = vcmask 523264   ;;  %vm795_vm2 = vcmask 261120   ;;  %vm798_vm3 = vcmask 253952  }
  0x25   : > { %4514 = vmatpush3.msra.mxu0 %v691_v0  ;;  %4538 = vmatprep.subr.mxu1 %v5224_v1  ;;  %s5034_s5 = smul.u32 24, %s677_s2  ;;  %v685_v7 = vld [vmem:[%s6453_s27 + $0x8] sm:$0xff]  ;;  %v684_v8 = vld [vmem:[%s6453_s27] sm:$0xff]  ;;  %s6459_s9 = sld [smem:[#allocation21_spill]]  ;;  %vm1275_vm4 = vcmask 1040384   ;;  %vm1129_vm5 = vcmask 130048  }
  0x26   : > { %4515 = vmatprep.subr.mxu0 %v5224_v1  ;;  %4546 = vmatprep.mubr.msk.f32.mxu1 %vm5225_vm0, %v5224_v1  ;;  %v4116_v12 = vld [vmem:[%s6455_s23] ss:$0 sm:$0xff]  ;;  %s6460_s23 = sld [smem:[#allocation17_spill]]  ;;  %vm1231_vm6 = vcmask 138240   ;;  %vm1238_vm7 = vcmask 131072   ;;  %s674_s2 = sand.u32 1, %s5214_s28  }
  0x27   : > { %4516 = vmatpush3.msra.mxu0 %v690_v2  ;;  %s680_s29 = scalar_lea.vmem %s6454_s30, %s5034_s5  ;;  %v800_v13 = vld [vmem:[%s6456_s26] sm:$0x1]  ;;  %v790_v22 = vld [vmem:[%s6457_s24 + $0x8] sm:$0xff]  ;;  %v791_v27 = vld [vmem:[%s6457_s24 + $0x10] sm:$0x1]  ;;  %s6461_s26 = sld [smem:[#allocation18_spill]] }
  0x28   : > { %4517 = vmatprep.subr.mxu0 %v5224_v1  ;;  %v681_v9 = vld [vmem:[%s680_s29] sm:$0xff]  ;;  %v682_v10 = vld [vmem:[%s680_s29 + $0x8] sm:$0xff]  ;;  %v683_v11 = vld [vmem:[%s680_s29 + $0x10] sm:$0x1]  ;;  %s6462_s8 = sld [smem:[#allocation20_spill]]  ;;  %s4297_s30 = sshll.u32 %s5363_s4, 4 }
  0x29   : > { %4518 = vmatpush3.msra.mxu0 %v689_v3  ;;  %v801_v14 = vld [vmem:[%s6457_s24] sm:$0x1]  ;;  %v871_v52 = vld [vmem:[%s6458_s7 + $0x18] sm:$0xff]  ;;  %v870_v54 = vld [vmem:[%s6458_s7 + $0x10] sm:$0xff]  ;;  %s6463_s10 = sld [smem:[#allocation22_spill]]  ;;  %s675_s25 = scalar_lea.vmem [#allocation3], %s674_s2 }
  0x2a   : > { %4519 = vmatprep.subr.mxu0 %v5224_v1  ;;  %v789_v16 = vld [vmem:[%s6457_s24] sm:$0xff]  ;;  %v802_v18 = vadd.f32 %v801_v14, %v800_v13  ;;  %4539 = vmatpush3.msra.mxu1 %v871_v52  ;;  %v869_v56 = vld [vmem:[%s6458_s7 + $0x8] sm:$0xff]  ;;  %s4056_s5 = sshll.u32 %s675_s25, 4  ;;  %s5226_s29 = smov [#allocation3]   ;;  %s4057_s5 = int_to_ptr.vmem [resolvable:$true] %s4056_s5 }
  0x2b   : > { %4520 = vmatpush3.msra.mxu0 %v688_v4  ;;  %v1048_v53 = vld [vmem:[%s6459_s9 + $0x18] sm:$0xff]  ;;  %4540 = vmatprep.subr.mxu1 %v5224_v1  ;;  %v1047_v55 = vld [vmem:[%s6459_s9 + $0x10] sm:$0xff]  ;;  %v1046_v57 = vld [vmem:[%s6459_s9 + $0x8] sm:$0xff]  ;;  %s5166_s4 = sshll.u32 %s5226_s29, 4  ;;  %s5167_s4 = int_to_ptr.vmem [resolvable:$false] %s5166_s4 }
  0x2c   : > { %4521 = vmatprep.subr.mxu0 %v5224_v1  ;;  %4541 = vmatpush3.msra.mxu1 %v870_v54  ;;  %v868_v58 = vld [vmem:[%s6458_s7] sm:$0xff]  ;;  %s5168_s3 = scalar_lea.vmem %s5167_s4, 32  ;;  %p5169_p0 = scmp.lt.s32.totalorder %s4057_s5, %s5167_s4 }
  0x2d   : > { %4522 = vmatpush3.msra.mxu0 %v687_v5  ;;  %4542 = vmatprep.subr.mxu1 %v5224_v1  ;;  %v1045_v59 = vld [vmem:[%s6459_s9] sm:$0xff] }
  0x2e   : > { %4523 = vmatprep.subr.mxu0 %v5224_v1  ;;  %4543 = vmatpush3.msra.mxu1 %v869_v56  ;;  %v964_v14 = vld [vmem:[%s6462_s8 + $0x18] sm:$0xff] }
  0x2f   : > { %4524 = vmatpush3.msra.mxu0 %v686_v6  ;;  %4544 = vmatprep.subr.mxu1 %v5224_v1 }
  0x30   : > { %4525 = vmatprep.subr.mxu0 %v5224_v1  ;;  %4545 = vmatpush3.msra.mxu1 %v868_v58 }
  0x31   : > { %4526 = vmatpush3.msra.mxu0 %v685_v7  ;;  %4555 = vmatprep.subr.mxu1 %v5224_v1  ;;  %v4120_v7 = vld [vmem:[%s6460_s23] ss:$0 sm:$0xff] }
  0x32   : > { %4527 = vmatprep.subr.mxu0 %v5224_v1 }
  0x33   : > { %4528 = vmatpush3.msra.mxu0 %v684_v8 }
  0x34   : > { %4530 = vmatmul.mubr.msk.f32.vlgmr.msra.gmra.mxu0 %vm699_vm1, %v681_v9  ;;  %4572 = vmatprep.subr.mxu0 %v5224_v1  ;;  %v4121_v9 = vld [vmem:[%s6461_s26] ss:$0 sm:$0xff] }
  0x35   : > { %4532 = vmatprep.mubr.msk.f32.mxu0 %vm5225_vm0, %v5224_v1  ;;  %4573 = vmatpush3.msra.mxu0 %v1048_v53 }
  0x36   : > { %4574 = vmatprep.subr.mxu0 %v5224_v1 }
  0x37   : > { %4575 = vmatpush3.msra.mxu0 %v1047_v55 }
  0x38   : > { %4533 = vmatmul.mubr.msk.f32.gmra.mxu0 %vm699_vm1, %v682_v10  ;;  %4576 = vmatprep.subr.mxu0 %v5224_v1 }
  0x39   : > { %4535 = vmatprep.mubr.msk.f32.mxu0 %vm5225_vm0, %v5224_v1  ;;  %4577 = vmatpush3.msra.mxu0 %v1046_v57 }
  0x3a   : > { %4578 = vmatprep.subr.mxu0 %v5224_v1 }
  0x3b   : > { %4579 = vmatpush3.msra.mxu0 %v1045_v59 }
  0x3c   : > { %4536 = vmatmul.mubr.msk.f32.gmra.mxu0 %vm699_vm1, %v683_v11  ;;  %4604 = vmatprep.subr.mxu0 %v5224_v1 }
  0x3d   : > { %4580 = vmatprep.mubr.msk.f32.mxu0 %vm5225_vm0, %v5224_v1 }
  0xf4   : > { %v775_v15 = vpop.f32.mrf.mxu0 }
  0xf5   : > { %v776_v17 = vadd.f32 %v4116_v12, %v775_v15 }
  0xf6   : > { %v4531_v19 = vpop.f32.mrf.mxu0 }
  0xf7   : > { %v792_v20 = vadd.f32 %v789_v16, %v776_v17  ;;  %v963_v17 = vld [vmem:[%s6462_s8 + $0x10] sm:$0xff] }
  0xf8   : > { %v780_v21 = vpop.f32.mrf.mxu0 }
  0xf9   : > { %796 = vst.msk [vmem:[#allocation2] sm:$0xff] %vm795_vm2, %v792_v20  ;;  %v781_v23 = vadd.f32 %v4116_v12, %v780_v21  ;;  %v962_v21 = vld [vmem:[%s6462_s8 + $0x8] sm:$0xff] }
  0xfa   : > { %803 = vst.msk [vmem:[#allocation2] sm:$0x1] %vm798_vm3, %v802_v18  ;;  %v4534_v24 = vpop.f32.mrf.mxu0 }
  0xfb   : > { %v793_v25 = vadd.f32 %v790_v22, %v781_v23  ;;  %v961_v23 = vld [vmem:[%s6462_s8] sm:$0xff] }
  0xfc   : > { %v785_v26 = vpop.f32.mrf.mxu0 }
  0xfd   : > { %797 = vst.msk [vmem:[#allocation2 + $0x8] sm:$0xff] %vm795_vm2, %v793_v25  ;;  %v786_v28 = vadd.f32 %v4116_v12, %v785_v26 }
  0xfe   : > { %v4537_v29 = vpop.f32.mrf.mxu0 }
  0xff   : > { %v794_v30 = vadd.f32 %v791_v27, %v786_v28 }
 0x101   : > { %799 = vst.msk [vmem:[#allocation2 + $0x10] sm:$0x1] %vm798_vm3, %v794_v30  ;;  %v5464_v31 = vld [vmem:[#allocation2] sm:$0xff] }
 0x102   : > { %v809_v32 = vsel %vm795_vm2, %v5464_v31, 0.0 }
 0x103   : > { %810 = vadd.xlane.f32.xlu0 %v809_v32 }
 0x104   : > { %v5468_v33 = vld [vmem:[#allocation2 + $0x8] sm:$0xff] }
 0x105   : > { %v812_v34 = vsel %vm795_vm2, %v5468_v33, 0.0 }
 0x107   : > { %813 = vadd.xlane.f32.xlu0 %v812_v34 }
 0x108   : > { %v5472_v35 = vld [vmem:[#allocation2 + $0x10] sm:$0x1] }
 0x109   : > { %v815_v36 = vsel %vm798_vm3, %v5472_v35, 0.0 }
 0x10a   : > { %816 = vadd.xlane.f32.xlu1 %v815_v36 }
 0x18c   : > { %v811_v37 = vpop.xlane.xlu0 %810 }
 0x18d   : > { %v819_v38 = vmul.f32 0.03125, %v811_v37 }
 0x18f   : > { %v822_v39 = vsub.f32 %v5464_v31, %v819_v38 }
 0x190   : > { %v814_v40 = vpop.xlane.xlu0 %813 }
 0x191   : > { %v820_v41 = vmul.f32 0.03125, %v814_v40  ;;  %v825_v42 = vmul.f32 %v822_v39, %v822_v39 }
 0x193   : > { %v823_v43 = vsub.f32 %v5468_v33, %v820_v41  ;;  %v817_v44 = vpop.xlane.xlu1 %816  ;;  %v828_v45 = vsel %vm795_vm2, %v825_v42, 0.0 }
 0x194   : > { %v821_v46 = vmul.f32 0.03125, %v817_v44  ;;  %829 = vadd.xlane.f32.xlu1 %v828_v45 }
 0x195   : > { %v826_v47 = vmul.f32 %v823_v43, %v823_v43 }
 0x196   : > { %v824_v48 = vsub.f32 %v5472_v35, %v821_v46 }
 0x197   : > { %v831_v49 = vsel %vm795_vm2, %v826_v47, 0.0 }
 0x198   : > { %832 = vadd.xlane.f32.xlu0 %v831_v49  ;;  %v827_v50 = vmul.f32 %v824_v48, %v824_v48 }
 0x19a   : > { %v834_v51 = vsel %vm798_vm3, %v827_v50, 0.0 }
 0x19b   : > { %835 = vadd.xlane.f32.xlu1 %v834_v51 }
 0x21d   : > { %v830_v60 = vpop.xlane.xlu1 %829 }
 0x21e   : > { %v837_v61 = vmul.f32 0.03125, %v830_v60 }
 0x220   : > { %v840_v62 = vadd.f32 1e-05, %v837_v61 }
 0x221   : > { %v833_v63 = vpop.xlane.xlu0 %832 }
 0x222   : > { %5076 = vrsqrt.f32 %v840_v62  ;;  %v838_v0 = vmul.f32 0.03125, %v833_v63 }
 0x224   : > { %v841_v2 = vadd.f32 1e-05, %v838_v0  ;;  %v836_v3 = vpop.xlane.xlu1 %835 }
 0x225   : > { %v839_v4 = vmul.f32 0.03125, %v836_v3 }
 0x226   : > { %5078 = vrsqrt.f32 %v841_v2 }
 0x227   : > { %v842_v5 = vadd.f32 1e-05, %v839_v4 }
 0x229   : > { %5080 = vrsqrt.f32 %v842_v5 }
 0x22f   : > { %v5077_v6 = vpop.eup %5076 }
 0x230   : > { %v846_v8 = vmul.f32 %v5077_v6, %v822_v39 }
 0x232   : > { %v855_v10 = vmul.f32 %v4120_v7, %v846_v8 }
 0x233   : > { %v5079_v11 = vpop.eup %5078 }
 0x234   : > { %v847_v12 = vmul.f32 %v5079_v11, %v823_v43  ;;  %v5520_v13 = vadd.f32 %v4121_v9, %v855_v10 }
 0x236   : > { %v5081_v15 = vpop.eup %5080  ;;  %v856_v16 = vmul.f32 %v4120_v7, %v847_v12  ;;  %4547 = vmatmul.mubr.msk.f32.vlgmr.msra.gmra.mxu1 %vm795_vm2, %v5520_v13  ;;  %4581 = vmatmul.mubr.msk.f32.vlgmr.msra.gmra.mxu0 %vm795_vm2, %v5520_v13 }
 0x237   : > { %v848_v18 = vmul.f32 %v5081_v15, %v824_v48  ;;  %4556 = vmatpush3.msra.mxu1 %v964_v14  ;;  %4549 = vmatprep.mubr.msk.f32.mxu1 %vm5225_vm0, %v5224_v1  ;;  %v4148_v15 = vld [vmem:[%s6458_s7 + $0x38] sm:$0xff] }
 0x238   : > { %4557 = vmatprep.subr.mxu1 %v5224_v1  ;;  %4583 = vmatprep.mubr.msk.f32.mxu0 %vm5225_vm0, %v5224_v1  ;;  %v5537_v19 = vadd.f32 %v4121_v9, %v856_v16  ;;  %v4147_v16 = vld [vmem:[%s6458_s7 + $0x30] sm:$0xff] }
 0x239   : > { %v857_v20 = vmul.f32 %v4120_v7, %v848_v18  ;;  %4558 = vmatpush3.msra.mxu1 %v963_v17 }
 0x23a   : > { %4550 = vmatmul.mubr.msk.f32.gmra.mxu1 %vm795_vm2, %v5537_v19  ;;  %4584 = vmatmul.mubr.msk.f32.gmra.mxu0 %vm795_vm2, %v5537_v19 }
 0x23b   : > { %4559 = vmatprep.subr.mxu1 %v5224_v1  ;;  %4552 = vmatprep.mubr.msk.f32.mxu1 %vm5225_vm0, %v5224_v1  ;;  %v5549_v22 = vadd.f32 %v4121_v9, %v857_v20  ;;  %v4146_v20 = vld [vmem:[%s6458_s7 + $0x28] sm:$0xff] }
 0x23c   : > { %4560 = vmatpush3.msra.mxu1 %v962_v21  ;;  %4586 = vmatprep.mubr.msk.f32.mxu0 %vm5225_vm0, %v5224_v1  ;;  %v4145_v21 = vld [vmem:[%s6458_s7 + $0x20] sm:$0xff] }
 0x23d   : > { %4561 = vmatprep.subr.mxu1 %v5224_v1 }
 0x23e   : > { %4553 = vmatmul.mubr.msk.f32.gmra.mxu1 %vm795_vm2, %v5549_v22  ;;  %4587 = vmatmul.mubr.msk.f32.gmra.mxu0 %vm795_vm2, %v5549_v22 }
 0x23f   : > { %4562 = vmatpush3.msra.mxu1 %v961_v23  ;;  %4563 = vmatprep.mubr.msk.f32.mxu1 %vm5225_vm0, %v5224_v1 }
 0x240   : > { %4589 = vmatprep.subr.mxu1 %v5224_v1  ;;  %4610 = vmatprep.mubr.msk.f32.mxu0 %vm5225_vm0, %v5224_v1 }
 0x242   : > { %4564 = vmatmul.mubr.msk.f32.vlgmr.msra.gmra.mxu1 %vm795_vm2, %v5520_v13 }
 0x243   : > { %4566 = vmatprep.mubr.msk.f32.mxu1 %vm5225_vm0, %v5224_v1 }
 0x246   : > { %4567 = vmatmul.mubr.msk.f32.gmra.mxu1 %vm795_vm2, %v5537_v19 }
 0x247   : > { %4569 = vmatprep.mubr.msk.f32.mxu1 %vm5225_vm0, %v5224_v1 }
 0x24a   : > { %4570 = vmatmul.mubr.msk.f32.gmra.mxu1 %vm795_vm2, %v5549_v22 }
 0x24b   : > { %4595 = vmatprep.mubr.msk.f32.mxu1 %vm5225_vm0, %v5224_v1 }
 0x2f6   : > { %v947_v24 = vpop.f32.mrf.mxu1  ;;  %v1115_v25 = vpop.f32.mrf.mxu0 }
 0x2f8   : > { %v4548_v26 = vpop.f32.mrf.mxu1  ;;  %v4582_v27 = vpop.f32.mrf.mxu0 }
 0x2f9   : > { %v1360_v26 = vld [vmem:[%s6463_s10 + $0x8] sm:$0xff]  ;;  %v4161_v27 = vld [vmem:[%s6459_s9 + $0x30] sm:$0xff] }
 0x2fa   : > { %v952_v28 = vpop.f32.mrf.mxu1  ;;  %v1120_v29 = vpop.f32.mrf.mxu0 }
 0x2fc   : > { %v4551_v30 = vpop.f32.mrf.mxu1  ;;  %v4585_v32 = vpop.f32.mrf.mxu0 }
 0x2fd   : > { %v1359_v30 = vld [vmem:[%s6463_s10] sm:$0xff]  ;;  %v4155_v32 = vld [vmem:[%s6462_s8 + $0x38] sm:$0xff] }
 0x2fe   : > { %v957_v34 = vpop.f32.mrf.mxu1  ;;  %v1125_v36 = vpop.f32.mrf.mxu0 }
 0x2ff   : > { %4605 = vmatpush3.msk.msra.mxu0 %vm1275_vm4, %v1125_v36 }
 0x300   : > { %v4554_v37 = vpop.f32.mrf.mxu1  ;;  %v4588_v38 = vpop.f32.mrf.mxu0  ;;  %4606 = vmatprep.subr.mxu0 %v5224_v1 }
 0x301   : > { %4607 = vmatpush3.msra.mxu0 %v1120_v29  ;;  %v4153_v38 = vld [vmem:[%s6462_s8 + $0x28] sm:$0xff] }
 0x302   : > { %v1031_v39 = vpop.f32.mrf.mxu1  ;;  %4608 = vmatprep.subr.mxu0 %v5224_v1 }
 0x303   : > { %4609 = vmatpush3.msra.mxu0 %v1115_v25 }
 0x304   : > { %v4565_v40 = vpop.f32.mrf.mxu1  ;;  %4632 = vmatprep.subr.mxu0 %v5224_v1 }
 0x305   : > { %v4152_v40 = vld [vmem:[%s6462_s8 + $0x20] sm:$0xff] }
 0x306   : > { %v1036_v41 = vpop.f32.mrf.mxu1 }
 0x308   : > { %v4568_v42 = vpop.f32.mrf.mxu1 }
 0x30a   : > { %v1041_v43 = vpop.f32.mrf.mxu1 }
 0x30b   : > { %4590 = vmatpush3.xpose.msk.msra.mxu1 %vm1129_vm5, %v1041_v43 }
 0x30c   : > { %v4571_v44 = vpop.f32.mrf.mxu1  ;;  %4591 = vmatprep.subr.mxu1 %v5224_v1 }
 0x30f   : > { %4592 = vmatpush3.xpose.msk.msra.mxu1 %vm1129_vm5, %v1036_v41 }
 0x310   : > { %4593 = vmatprep.subr.mxu1 %v5224_v1 }
 0x313   : > { %4594 = vmatpush3.xpose.msk.msra.mxu1 %vm1129_vm5, %v1031_v39 }
 0x314   : > { %5028 = vmatprep.subr.mxu1 %v5224_v1 }
 0x316   : > { %4596 = vmatmul.mubr.msk.f32.vlgmr.msra.gmra.mxu1 %vm1129_vm5, %v947_v24 }
 0x317   : > { %5031 = vmatpush3.msk.msra.mxu1 %vm1275_vm4, %v1125_v36  ;;  %4598 = vmatprep.mubr.msk.f32.mxu1 %vm5225_vm0, %v5224_v1  ;;  %v4154_v36 = vld [vmem:[%s6462_s8 + $0x30] sm:$0xff] }
 0x318   : > { %5029 = vmatprep.subr.mxu1 %v5224_v1 }
 0x319   : > { %5032 = vmatpush3.msra.mxu1 %v1120_v29  ;;  %v4159_v29 = vld [vmem:[%s6459_s9 + $0x20] sm:$0xff] }
 0x31a   : > { %4599 = vmatmul.mubr.msk.f32.gmra.mxu1 %vm1129_vm5, %v952_v28  ;;  %5030 = vmatprep.subr.mxu1 %v5224_v1  ;;  %v4160_v28 = vld [vmem:[%s6459_s9 + $0x28] sm:$0xff] }
 0x31b   : > { %5033 = vmatpush3.msra.mxu1 %v1115_v25  ;;  %4601 = vmatprep.mubr.msk.f32.mxu1 %vm5225_vm0, %v5224_v1  ;;  %v4162_v25 = vld [vmem:[%s6459_s9 + $0x38] sm:$0xff] }
 0x31c   : > { %4619 = vmatprep.subr.mxu1 %v5224_v1 }
 0x31e   : > { %4602 = vmatmul.mubr.msk.f32.gmra.mxu1 %vm1129_vm5, %v957_v34 }
 0x31f   : > { %4616 = vmatprep.mubr.msk.f32.mxu1 %vm5225_vm0, %v5224_v1 }
 0x3d6   : > { %v1214_v45 = vpop.f32.mrf.mxu1 }
 0x3d7   : > { %v1228_v46 = vmul.f32 0.17677669, %v1214_v45 }
 0x3d8   : > { %v4597_v47 = vpop.f32.mrf.mxu1 }
 0x3d9   : > { %v1232_v48 = vsel %vm1231_vm6, %v1228_v46, -inf }
 0x3da   : > { %1233 = vmax.xlane.f32.xlu0 %v1232_v48  ;;  %v1219_v49 = vpop.f32.mrf.mxu1 }
 0x3db   : > { %v1229_v50 = vmul.f32 0.17677669, %v1219_v49 }
 0x3dc   : > { %v4600_v51 = vpop.f32.mrf.mxu1 }
 0x3dd   : > { %v1235_v52 = vsel %vm1231_vm6, %v1229_v50, -inf }
 0x3de   : > { %1236 = vmax.xlane.f32.xlu1 %v1235_v52  ;;  %v1224_v53 = vpop.f32.mrf.mxu1 }
 0x3df   : > { %v1230_v54 = vmul.f32 0.17677669, %v1224_v53 }
 0x3e0   : > { %v4603_v55 = vpop.f32.mrf.mxu1 }
 0x3e1   : > { %v1239_v56 = vsel %vm1238_vm7, %v1230_v54, -inf }
 0x3e2   : > { %1240 = vmax.xlane.f32.xlu0 %v1239_v56 }
 0x463   : > { %v1234_v57 = vpop.xlane.xlu0 %1233 }
 0x464   : > { %v1242_v58 = vsub.f32 %v1228_v46, %v1234_v57 }
 0x466   : > { %v1245_v59 = vmul.f32 1.442695, %v1242_v58 }
 0x467   : > { %v1237_v60 = vpop.xlane.xlu1 %1236 }
 0x468   : > { %5082 = vpow2.f32 %v1245_v59  ;;  %v1243_v61 = vsub.f32 %v1229_v50, %v1237_v60 }
 0x46a   : > { %v1247_v62 = vmul.f32 1.442695, %v1243_v61 }
 0x46b   : > { %v1241_v63 = vpop.xlane.xlu0 %1240 }
 0x46c   : > { %5084 = vpow2.f32 %v1247_v62  ;;  %v1244_v0 = vsub.f32 %v1230_v54, %v1241_v63 }
 0x46e   : > { %v1249_v2 = vmul.f32 1.442695, %v1244_v0 }
 0x470   : > { %5086 = vpow2.f32 %v1249_v2 }
 0x475   : > { %v5083_v3 = vpop.eup %5082 }
 0x476   : > { %v1251_v4 = vsel %vm1231_vm6, %v5083_v3, 0.0 }
 0x477   : > { %1252 = vadd.xlane.f32.xlu1 %v1251_v4 }
 0x479   : > { %v5085_v5 = vpop.eup %5084 }
 0x47a   : > { %v1254_v6 = vsel %vm1231_vm6, %v5085_v5, 0.0 }
 0x47b   : > { %1255 = vadd.xlane.f32.xlu0 %v1254_v6 }
 0x47d   : > { %v5087_v7 = vpop.eup %5086 }
 0x47e   : > { %v1257_v8 = vsel %vm1238_vm7, %v5087_v7, 0.0 }
 0x47f   : > { %1258 = vadd.xlane.f32.xlu1 %v1257_v8 }
 0x500   : > { %v1253_v9 = vpop.xlane.xlu1 %1252 }
 0x501   : > { %5088 = vrcp.f32 %v1253_v9 }
 0x504   : > { %v1256_v10 = vpop.xlane.xlu0 %1255 }
 0x505   : > { %5090 = vrcp.f32 %v1256_v10 }
 0x508   : > { %v1259_v11 = vpop.xlane.xlu1 %1258 }
 0x509   : > { %5092 = vrcp.f32 %v1259_v11 }
 0x50e   : > { %v5089_v12 = vpop.eup %5088 }
 0x50f   : > { %v1261_v14 = vmul.f32 %v5089_v12, %v5083_v3 }
 0x511   : > { %4611 = vmatmul.mubr.msk.f32.vlgmr.msra.gmra.mxu0 %vm1231_vm6, %v1261_v14 }
 0x512   : > { %v5091_v17 = vpop.eup %5090  ;;  %4633 = vmatpush3.msra.mxu0 %v4148_v15  ;;  %4613 = vmatprep.mubr.msk.f32.mxu0 %vm5225_vm0, %v5224_v1 }
 0x513   : > { %4634 = vmatprep.subr.mxu0 %v5224_v1  ;;  %v1263_v18 = vmul.f32 %v5091_v17, %v5085_v5 }
 0x514   : > { %4635 = vmatpush3.msra.mxu0 %v4147_v16 }
 0x515   : > { %4614 = vmatmul.mubr.msk.f32.gmra.mxu0 %vm1231_vm6, %v1263_v18  ;;  %4636 = vmatprep.subr.mxu0 %v5224_v1 }
 0x516   : > { %v5093_v23 = vpop.eup %5092  ;;  %4637 = vmatpush3.msra.mxu0 %v4146_v20  ;;  %4640 = vmatprep.mubr.msk.f32.mxu0 %vm5225_vm0, %v5224_v1 }
 0x517   : > { %v1265_v24 = vmul.f32 %v5093_v23, %v5087_v7  ;;  %4638 = vmatprep.subr.mxu0 %v5224_v1 }
 0x518   : > { %4639 = vmatpush3.msra.mxu0 %v4145_v21 }
 0x519   : > { %4617 = vmatmul.mubr.msk.f32.vlgmr.msra.gmra.mxu1 %vm1231_vm6, %v1265_v24  ;;  %4641 = vmatmul.mubr.msk.f32.vlgmr.msra.gmra.mxu0 %vm795_vm2, %v5520_v13 }
 0x51a   : > { %4643 = vmatprep.mubr.msk.f32.mxu0 %vm5225_vm0, %v5224_v1  ;;  %4666 = vmatprep.subr.mxu0 %v5224_v1 }
 0x51b   : > { %4667 = vmatpush3.msra.mxu0 %v4162_v25  ;;  %4620 = vmatpush3.msra.mxu1 %v1360_v26 }
 0x51c   : > { %4668 = vmatprep.subr.mxu0 %v5224_v1  ;;  %4621 = vmatprep.subr.mxu1 %v5224_v1 }
 0x51d   : > { %4644 = vmatmul.mubr.msk.f32.gmra.mxu0 %vm795_vm2, %v5537_v19  ;;  %4623 = vmatprep.mubr.msk.f32.mxu1 %vm5225_vm0, %v5224_v1 }
 0x51e   : > { %4646 = vmatprep.mubr.msk.f32.mxu0 %vm5225_vm0, %v5224_v1  ;;  %4669 = vmatpush3.msra.mxu0 %v4161_v27 }
 0x51f   : > { %4670 = vmatprep.subr.mxu0 %v5224_v1  ;;  %4622 = vmatpush3.msra.mxu1 %v1359_v30 }
 0x520   : > { %4671 = vmatpush3.msra.mxu0 %v4160_v28  ;;  %4649 = vmatprep.subr.mxu1 %v5224_v1 }
 0x521   : > { %4647 = vmatmul.mubr.msk.f32.gmra.mxu0 %vm795_vm2, %v5549_v22  ;;  %4672 = vmatprep.subr.mxu0 %v5224_v1 }
 0x522   : > { %4673 = vmatpush3.msra.mxu0 %v4159_v29  ;;  %4674 = vmatprep.mubr.msk.f32.mxu0 %vm5225_vm0, %v5224_v1 }
 0x523   : > { %4698 = vmatprep.subr.mxu0 %v5224_v1 }
 0x525   : > { %4675 = vmatmul.mubr.msk.f32.vlgmr.msra.gmra.mxu0 %vm795_vm2, %v5520_v13 }
 0x526   : > { %4677 = vmatprep.mubr.msk.f32.mxu0 %vm5225_vm0, %v5224_v1 }
 0x529   : > { %4678 = vmatmul.mubr.msk.f32.gmra.mxu0 %vm795_vm2, %v5537_v19 }
 0x52a   : > { %4680 = vmatprep.mubr.msk.f32.mxu0 %vm5225_vm0, %v5224_v1 }
 0x52d   : > { %4681 = vmatmul.mubr.msk.f32.gmra.mxu0 %vm795_vm2, %v5549_v22 }
 0x52e   : > { %4704 = vmatprep.mubr.msk.f32.mxu0 %vm5225_vm0, %v5224_v1 }
 0x5d1   : > { %v1345_v34 = vpop.f32.mrf.mxu0 }
 0x5d2   : > { %4624 = vmatmul.mubr.msk.f32.vlgmr.msra.gmra.mxu1 %vm1129_vm5, %v1345_v34  ;;  %v4177_v34 = vld [vmem:[%s6463_s10 + $0x18] sm:$0xff] }
 0x5d3   : > { %v4612_v37 = vpop.f32.mrf.mxu0  ;;  %4650 = vmatpush3.msra.mxu1 %v4155_v32  ;;  %4626 = vmatprep.mubr.msk.f32.mxu1 %vm5225_vm0, %v5224_v1 }
 0x5d4   : > { %4651 = vmatprep.subr.mxu1 %v5224_v1 }
 0x5d5   : > { %v1350_v39 = vpop.f32.mrf.mxu0  ;;  %4652 = vmatpush3.msra.mxu1 %v4154_v36  ;;  %v4176_v36 = vld [vmem:[%s6463_s10 + $0x10] sm:$0xff] }
 0x5d6   : > { %4627 = vmatmul.mubr.msk.f32.gmra.mxu1 %vm1129_vm5, %v1350_v39  ;;  %4653 = vmatprep.subr.mxu1 %v5224_v1 }
 0x5d7   : > { %v4615_v41 = vpop.f32.mrf.mxu0  ;;  %4629 = vmatprep.mubr.msk.f32.mxu1 %vm5225_vm0, %v5224_v1  ;;  %4654 = vmatpush3.msra.mxu1 %v4153_v38 }
 0x5d8   : > { %4655 = vmatprep.subr.mxu1 %v5224_v1 }
 0x5d9   : > { %v1355_v42 = vpop.f32.mrf.mxu1  ;;  %v1530_v43 = vpop.f32.mrf.mxu0  ;;  %4656 = vmatpush3.msra.mxu1 %v4152_v40 }
 0x5da   : > { %4630 = vmatmul.mubr.msk.f32.gmra.mxu1 %vm1129_vm5, %v1355_v42  ;;  %4683 = vmatprep.subr.mxu1 %v5224_v1 }
 0x5db   : > { %v4618_v44 = vpop.f32.mrf.mxu1  ;;  %v4642_v45 = vpop.f32.mrf.mxu0  ;;  %4657 = vmatprep.mubr.msk.f32.mxu1 %vm5225_vm0, %v5224_v1 }
 0x5dd   : > { %v1535_v46 = vpop.f32.mrf.mxu0 }
 0x5de   : > { %4658 = vmatmul.mubr.msk.f32.vlgmr.msra.gmra.mxu1 %vm795_vm2, %v5520_v13 }
 0x5df   : > { %v4645_v47 = vpop.f32.mrf.mxu0  ;;  %4660 = vmatprep.mubr.msk.f32.mxu1 %vm5225_vm0, %v5224_v1 }
 0x5e1   : > { %v1540_v48 = vpop.f32.mrf.mxu0 }
 0x5e2   : > { %4661 = vmatmul.mubr.msk.f32.gmra.mxu1 %vm795_vm2, %v5537_v19 }
 0x5e3   : > { %v4648_v49 = vpop.f32.mrf.mxu0  ;;  %4663 = vmatprep.mubr.msk.f32.mxu1 %vm5225_vm0, %v5224_v1 }
 0x5e5   : > { %v1700_v50 = vpop.f32.mrf.mxu0 }
 0x5e6   : > { %4664 = vmatmul.mubr.msk.f32.gmra.mxu1 %vm795_vm2, %v5549_v22 }
 0x5e7   : > { %v4676_v51 = vpop.f32.mrf.mxu0  ;;  %4689 = vmatprep.mubr.msk.f32.mxu1 %vm5225_vm0, %v5224_v1 }
 0x5e9   : > { %v1705_v13 = vpop.f32.mrf.mxu0 }
 0x5eb   : > { %v4679_v52 = vpop.f32.mrf.mxu0 }
 0x5ed   : > { %v1710_v53 = vpop.f32.mrf.mxu0 }
 0x5ee   : > { %4699 = vmatpush3.msk.msra.mxu0 %vm1275_vm4, %v1710_v53 }
 0x5ef   : > { %v4682_v54 = vpop.f32.mrf.mxu0  ;;  %4700 = vmatprep.subr.mxu0 %v5224_v1 }
 0x5f0   : > { %4701 = vmatpush3.msra.mxu0 %v1705_v13  ;;  %v4144_v13 = vld [vmem:[%s6412_s11] ss:$0 sm:$0xff] }
 0x5f1   : > { %4702 = vmatprep.subr.mxu0 %v5224_v1 }
 0x5f2   : > { %4703 = vmatpush3.msra.mxu0 %v1700_v50 }
 0x5f3   : > { %4726 = vmatprep.subr.mxu0 %v5224_v1 }
 0x692   : > { %v5721_v19 = vpop.f32.mrf.mxu1 }
 0x693   : > { %v1456_v52 = vadd.f32 %v4144_v13, %v5721_v19 }
 0x694   : > { %v4625_v22 = vpop.f32.mrf.mxu1 }
 0x696   : > { %v5723_v55 = vpop.f32.mrf.mxu1 }
 0x698   : > { %v4628_v56 = vpop.f32.mrf.mxu1 }
 0x699   : > { %v1457_v56 = vadd.f32 %v4144_v13, %v5723_v55 }
 0x69a   : > { %v5725_v57 = vpop.f32.mrf.mxu1 }
 0x69c   : > { %v4631_v58 = vpop.f32.mrf.mxu1 }
 0x69e   : > { %v1615_v59 = vpop.f32.mrf.mxu1 }
 0x6a0   : > { %v4659_v60 = vpop.f32.mrf.mxu1 }
 0x6a2   : > { %v1620_v61 = vpop.f32.mrf.mxu1 }
 0x6a4   : > { %v4662_v62 = vpop.f32.mrf.mxu1 }
 0x6a6   : > { %v1625_v63 = vpop.f32.mrf.mxu1 }
 0x6a7   : > { %4684 = vmatpush3.xpose.msk.msra.mxu1 %vm1129_vm5, %v1625_v63  ;;  %v1458_v63 = vadd.f32 %v4144_v13, %v5725_v57  ;;  %v2229_v13 = vld [vmem:[%s6417_s16 + $0x28] sm:$0xff] }
 0x6a8   : > { %v4665_v0 = vpop.f32.mrf.mxu1  ;;  %4685 = vmatprep.subr.mxu1 %v5224_v1 }
 0x6ab   : > { %4686 = vmatpush3.xpose.msk.msra.mxu1 %vm1129_vm5, %v1620_v61 }
 0x6ac   : > { %4687 = vmatprep.subr.mxu1 %v5224_v1 }
 0x6af   : > { %4688 = vmatpush3.xpose.msk.msra.mxu1 %vm1129_vm5, %v1615_v59 }
 0x6b0   : > { %4713 = vmatprep.subr.mxu1 %v5224_v1 }
 0x6b2   : > { %4690 = vmatmul.mubr.msk.f32.vlgmr.msra.gmra.mxu1 %vm1129_vm5, %v1530_v43 }
 0x6b3   : > { %4692 = vmatprep.mubr.msk.f32.mxu1 %vm5225_vm0, %v5224_v1  ;;  %4714 = vmatpush3.msra.mxu1 %v4177_v34 }
 0x6b4   : > { %4715 = vmatprep.subr.mxu1 %v5224_v1 }
 0x6b5   : > { %4716 = vmatpush3.msra.mxu1 %v4176_v36 }
 0x6b6   : > { %4693 = vmatmul.mubr.msk.f32.gmra.mxu1 %vm1129_vm5, %v1535_v46  ;;  %4743 = vmatprep.subr.mxu1 %v5224_v1 }
 0x6b7   : > { %4695 = vmatprep.mubr.msk.f32.mxu1 %vm5225_vm0, %v5224_v1 }
 0x6ba   : > { %4696 = vmatmul.mubr.msk.f32.gmra.mxu1 %vm1129_vm5, %v1540_v48 }
 0x6bb   : > { %4717 = vmatprep.mubr.msk.f32.mxu1 %vm5225_vm0, %v5224_v1 }
 0x772   : > { %v1798_v2 = vpop.f32.mrf.mxu1 }
 0x773   : > { %v1812_v3 = vmul.f32 0.17677669, %v1798_v2 }
 0x774   : > { %v4691_v4 = vpop.f32.mrf.mxu1 }
 0x775   : > { %v1815_v5 = vsel %vm1231_vm6, %v1812_v3, -inf }
 0x776   : > { %1816 = vmax.xlane.f32.xlu0 %v1815_v5  ;;  %v1803_v6 = vpop.f32.mrf.mxu1 }
 0x777   : > { %v1813_v7 = vmul.f32 0.17677669, %v1803_v6 }
 0x778   : > { %v4694_v8 = vpop.f32.mrf.mxu1 }
 0x779   : > { %v1818_v9 = vsel %vm1231_vm6, %v1813_v7, -inf }
 0x77a   : > { %1819 = vmax.xlane.f32.xlu1 %v1818_v9  ;;  %v1808_v10 = vpop.f32.mrf.mxu1 }
 0x77b   : > { %v1814_v11 = vmul.f32 0.17677669, %v1808_v10 }
 0x77c   : > { %v4697_v12 = vpop.f32.mrf.mxu1 }
 0x77d   : > { %v1821_v14 = vsel %vm1238_vm7, %v1814_v11, -inf }
 0x77e   : > { %1822 = vmax.xlane.f32.xlu0 %v1821_v14 }
 0x7ff   : > { %v1817_v15 = vpop.xlane.xlu0 %1816 }
 0x800   : > { %v1824_v16 = vsub.f32 %v1812_v3, %v1817_v15 }
 0x802   : > { %v1827_v17 = vmul.f32 1.442695, %v1824_v16 }
 0x803   : > { %v1820_v18 = vpop.xlane.xlu1 %1819 }
 0x804   : > { %5094 = vpow2.f32 %v1827_v17  ;;  %v1825_v20 = vsub.f32 %v1813_v7, %v1820_v18  ;;  %v2100_v18 = vld [vmem:[%s6415_s14 + $0x18] sm:$0xff] }
 0x806   : > { %v1829_v21 = vmul.f32 1.442695, %v1825_v20  ;;  %v2099_v20 = vld [vmem:[%s6415_s14 + $0x10] sm:$0xff] }
 0x807   : > { %v1823_v23 = vpop.xlane.xlu0 %1822 }
 0x808   : > { %5096 = vpow2.f32 %v1829_v21  ;;  %v1826_v24 = vsub.f32 %v1814_v11, %v1823_v23  ;;  %v2098_v21 = vld [vmem:[%s6415_s14 + $0x8] sm:$0xff]  ;;  %v2097_v23 = vld [vmem:[%s6415_s14] sm:$0xff] }
 0x80a   : > { %v1831_v25 = vmul.f32 1.442695, %v1826_v24 }
 0x80c   : > { %5098 = vpow2.f32 %v1831_v25 }
 0x811   : > { %v5095_v26 = vpop.eup %5094 }
 0x812   : > { %v1833_v27 = vsel %vm1231_vm6, %v5095_v26, 0.0 }
 0x813   : > { %1834 = vadd.xlane.f32.xlu1 %v1833_v27 }
 0x815   : > { %v5097_v28 = vpop.eup %5096 }
 0x816   : > { %v1836_v29 = vsel %vm1231_vm6, %v5097_v28, 0.0 }
 0x817   : > { %1837 = vadd.xlane.f32.xlu0 %v1836_v29 }
 0x819   : > { %v5099_v30 = vpop.eup %5098 }
 0x81a   : > { %v1839_v32 = vsel %vm1238_vm7, %v5099_v30, 0.0 }
 0x81b   : > { %1840 = vadd.xlane.f32.xlu1 %v1839_v32 }
 0x89c   : > { %v1835_v37 = vpop.xlane.xlu1 %1834 }
 0x89d   : > { %5100 = vrcp.f32 %v1835_v37  ;;  %v4181_v37 = vld [vmem:[%s6413_s12] ss:$0 sm:$0xff] }
 0x8a0   : > { %v1838_v38 = vpop.xlane.xlu0 %1837 }
 0x8a1   : > { %5102 = vrcp.f32 %v1838_v38 }
 0x8a4   : > { %v1841_v39 = vpop.xlane.xlu1 %1840 }
 0x8a5   : > { %5104 = vrcp.f32 %v1841_v39  ;;  %v4182_v39 = vld [vmem:[%s6414_s13] ss:$0 sm:$0xff] }
 0x8aa   : > { %v5101_v40 = vpop.eup %5100 }
 0x8ab   : > { %v1843_v41 = vmul.f32 %v5101_v40, %v5095_v26 }
 0x8ad   : > { %4705 = vmatmul.mubr.msk.f32.vlgmr.msra.gmra.mxu0 %vm1231_vm6, %v1843_v41 }
 0x8ae   : > { %v5103_v42 = vpop.eup %5102  ;;  %4707 = vmatprep.mubr.msk.f32.mxu0 %vm5225_vm0, %v5224_v1  ;;  %4727 = vmatpush3.msra.mxu0 %v2100_v18 }
 0x8af   : > { %v1845_v43 = vmul.f32 %v5103_v42, %v5097_v28  ;;  %4728 = vmatprep.subr.mxu0 %v5224_v1 }
 0x8b0   : > { %4729 = vmatpush3.msra.mxu0 %v2099_v20 }
 0x8b1   : > { %4708 = vmatmul.mubr.msk.f32.gmra.mxu0 %vm1231_vm6, %v1845_v43  ;;  %4730 = vmatprep.subr.mxu0 %v5224_v1 }
 0x8b2   : > { %v5105_v44 = vpop.eup %5104  ;;  %4710 = vmatprep.mubr.msk.f32.mxu0 %vm5225_vm0, %v5224_v1  ;;  %4731 = vmatpush3.msra.mxu0 %v2098_v21 }
 0x8b3   : > { %v1847_v45 = vmul.f32 %v5105_v44, %v5099_v30  ;;  %4732 = vmatprep.subr.mxu0 %v5224_v1 }
 0x8b4   : > { %4733 = vmatpush3.msra.mxu0 %v2097_v23 }
 0x8b5   : > { %4711 = vmatmul.mubr.msk.f32.gmra.mxu0 %vm1231_vm6, %v1847_v45  ;;  %4768 = vmatprep.subr.mxu0 %v5224_v1 }
 0x8b6   : > { %4734 = vmatprep.mubr.msk.f32.mxu0 %vm5225_vm0, %v5224_v1 }
 0x96d   : > { %v1926_v46 = vpop.f32.mrf.mxu0 }
 0x96e   : > { %4718 = vmatmul.mubr.msk.f32.vlgmr.msra.gmra.mxu1 %vm1129_vm5, %v1926_v46 }
 0x96f   : > { %v4706_v47 = vpop.f32.mrf.mxu0  ;;  %4720 = vmatprep.mubr.msk.f32.mxu1 %vm5225_vm0, %v5224_v1 }
 0x971   : > { %v1931_v48 = vpop.f32.mrf.mxu0 }
 0x972   : > { %4721 = vmatmul.mubr.msk.f32.gmra.mxu1 %vm1129_vm5, %v1931_v48 }
 0x973   : > { %v4709_v49 = vpop.f32.mrf.mxu0  ;;  %4723 = vmatprep.mubr.msk.f32.mxu1 %vm5225_vm0, %v5224_v1 }
 0x975   : > { %v1936_v50 = vpop.f32.mrf.mxu0 }
 0x976   : > { %4724 = vmatmul.mubr.msk.f32.gmra.mxu1 %vm1129_vm5, %v1936_v50  ;;  %v2231_v50 = vld [vmem:[%s6417_s16 + $0x38] sm:$0xff] }
 0x977   : > { %v4712_v51 = vpop.f32.mrf.mxu0  ;;  %4759 = vmatprep.mubr.msk.f32.mxu1 %vm5225_vm0, %v5224_v1  ;;  %4744 = vmatpush3.msra.mxu1 %v2231_v50 }
 0x978   : > { %4745 = vmatprep.subr.mxu1 %v5224_v1  ;;  %v2230_v51 = vld [vmem:[%s6417_s16 + $0x30] sm:$0xff] }
 0x979   : > { %4746 = vmatpush3.msra.mxu1 %v2230_v51 }
 0x97a   : > { %4747 = vmatprep.subr.mxu1 %v5224_v1 }
 0x97b   : > { %4748 = vmatpush3.msra.mxu1 %v2229_v13 }
 0x97c   : > { %4749 = vmatprep.subr.mxu1 %v5224_v1 }
 0xa2e   : > { %v2018_v53 = vpop.f32.mrf.mxu1 }
 0xa2f   : > { %v2032_v54 = vadd.f32 %v2018_v53, %v1456_v52  ;;  %v2228_v52 = vld [vmem:[%s6417_s16 + $0x20] sm:$0xff]  ;;  %v2227_v53 = vld [vmem:[%s6417_s16 + $0x18] sm:$0xff] }
 0xa30   : > { %v4719_v22 = vpop.f32.mrf.mxu1  ;;  %4750 = vmatpush3.msra.mxu1 %v2228_v52 }
 0xa31   : > { %v5780_v58 = vadd.f32 %v2032_v54, %v5464_v31  ;;  %4751 = vmatprep.subr.mxu1 %v5224_v1  ;;  %v2226_v54 = vld [vmem:[%s6417_s16 + $0x10] sm:$0xff]  ;;  %v2225_v22 = vld [vmem:[%s6417_s16 + $0x8] sm:$0xff] }
 0xa32   : > { %v2023_v59 = vpop.f32.mrf.mxu1  ;;  %4752 = vmatpush3.msra.mxu1 %v2227_v53 }
 0xa33   : > { %v2033_v60 = vadd.f32 %v2023_v59, %v1457_v56  ;;  %v2040_v61 = vsel %vm795_vm2, %v5780_v58, 0.0  ;;  %4753 = vmatprep.subr.mxu1 %v5224_v1  ;;  %v2224_v56 = vld [vmem:[%s6417_s16] sm:$0xff] }
 0xa34   : > { %2041 = vadd.xlane.f32.xlu0 %v2040_v61  ;;  %v4722_v62 = vpop.f32.mrf.mxu1  ;;  %4754 = vmatpush3.msra.mxu1 %v2226_v54  ;;  %v4183_v59 = vld [vmem:[%s6416_s15] ss:$0 sm:$0xff] }
 0xa35   : > { %v5786_v0 = vadd.f32 %v2033_v60, %v5468_v33  ;;  %4755 = vmatprep.subr.mxu1 %v5224_v1 }
 0xa36   : > { %v2028_v19 = vpop.f32.mrf.mxu1  ;;  %4756 = vmatpush3.msra.mxu1 %v2225_v22 }
 0xa37   : > { %v2034_v2 = vadd.f32 %v2028_v19, %v1458_v63  ;;  %v2043_v55 = vsel %vm795_vm2, %v5786_v0, 0.0  ;;  %4757 = vmatprep.subr.mxu1 %v5224_v1 }
 0xa38   : > { %2044 = vadd.xlane.f32.xlu1 %v2043_v55  ;;  %v4725_v31 = vpop.f32.mrf.mxu1  ;;  %4758 = vmatpush3.msra.mxu1 %v2224_v56 }
 0xa39   : > { %v5791_v3 = vadd.f32 %v2034_v2, %v5472_v35  ;;  %4785 = vmatprep.subr.mxu1 %v5224_v1 }
 0xa3b   : > { %v2046_v4 = vsel %vm798_vm3, %v5791_v3, 0.0 }
 0xa3c   : > { %2047 = vadd.xlane.f32.xlu0 %v2046_v4 }
 0xabd   : > { %v2042_v5 = vpop.xlane.xlu0 %2041 }
 0xabe   : > { %v2049_v6 = vmul.f32 0.03125, %v2042_v5 }
 0xac0   : > { %v2052_v57 = vsub.f32 %v5780_v58, %v2049_v6 }
 0xac1   : > { %v2045_v33 = vpop.xlane.xlu1 %2044 }
 0xac2   : > { %v2050_v7 = vmul.f32 0.03125, %v2045_v33  ;;  %v2055_v8 = vmul.f32 %v2052_v57, %v2052_v57 }
 0xac4   : > { %v2053_v9 = vsub.f32 %v5786_v0, %v2050_v7  ;;  %v2058_v10 = vsel %vm795_vm2, %v2055_v8, 0.0 }
 0xac5   : > { %2059 = vadd.xlane.f32.xlu1 %v2058_v10  ;;  %v2048_v11 = vpop.xlane.xlu0 %2047 }
 0xac6   : > { %v2051_v12 = vmul.f32 0.03125, %v2048_v11  ;;  %v2056_v35 = vmul.f32 %v2053_v9, %v2053_v9 }
 0xac8   : > { %v2054_v14 = vsub.f32 %v5791_v3, %v2051_v12  ;;  %v2061_v15 = vsel %vm795_vm2, %v2056_v35, 0.0 }
 0xac9   : > { %2062 = vadd.xlane.f32.xlu0 %v2061_v15 }
 0xaca   : > { %v2057_v16 = vmul.f32 %v2054_v14, %v2054_v14 }
 0xacc   : > { %v2064_v17 = vsel %vm798_vm3, %v2057_v16, 0.0 }
 0xacd   : > { %2065 = vadd.xlane.f32.xlu1 %v2064_v17 }
 0xb4e   : > { %v2060_v24 = vpop.xlane.xlu1 %2059 }
 0xb4f   : > { %v2067_v25 = vmul.f32 0.03125, %v2060_v24 }
 0xb51   : > { %v2070_v26 = vadd.f32 1e-05, %v2067_v25 }
 0xb52   : > { %v2063_v27 = vpop.xlane.xlu0 %2062 }
 0xb53   : > { %5106 = vrsqrt.f32 %v2070_v26  ;;  %v2068_v28 = vmul.f32 0.03125, %v2063_v27 }
 0xb55   : > { %v2071_v29 = vadd.f32 1e-05, %v2068_v28 }
 0xb56   : > { %v2066_v30 = vpop.xlane.xlu1 %2065 }
 0xb57   : > { %5108 = vrsqrt.f32 %v2071_v29  ;;  %v2069_v32 = vmul.f32 0.03125, %v2066_v30 }
 0xb59   : > { %v2072_v34 = vadd.f32 1e-05, %v2069_v32 }
 0xb5b   : > { %5110 = vrsqrt.f32 %v2072_v34  ;;  %v4187_v34 = vld [vmem:[%s6418_s17] ss:$0 sm:$0xff] }
 0xb60   : > { %v5107_v36 = vpop.eup %5106 }
 0xb61   : > { %v2076_v38 = vmul.f32 %v5107_v36, %v2052_v57 }
 0xb63   : > { %v2085_v40 = vmul.f32 %v4181_v37, %v2076_v38 }
 0xb64   : > { %v5109_v41 = vpop.eup %5108 }
 0xb65   : > { %v2094_v42 = vadd.f32 %v4182_v39, %v2085_v40  ;;  %v2077_v43 = vmul.f32 %v5109_v41, %v2053_v9 }
 0xb67   : > { %4735 = vmatmul.mubr.msk.f32.vlgmr.msra.gmra.mxu0 %vm795_vm2, %v2094_v42  ;;  %v2086_v44 = vmul.f32 %v4181_v37, %v2077_v43 }
 0xb68   : > { %v5111_v45 = vpop.eup %5110  ;;  %4737 = vmatprep.mubr.msk.f32.mxu0 %vm5225_vm0, %v5224_v1 }
 0xb69   : > { %v2095_v46 = vadd.f32 %v4182_v39, %v2086_v44  ;;  %v2078_v47 = vmul.f32 %v5111_v45, %v2054_v14 }
 0xb6b   : > { %4738 = vmatmul.mubr.msk.f32.gmra.mxu0 %vm795_vm2, %v2095_v46  ;;  %v2087_v48 = vmul.f32 %v4181_v37, %v2078_v47 }
 0xb6c   : > { %4740 = vmatprep.mubr.msk.f32.mxu0 %vm5225_vm0, %v5224_v1 }
 0xb6d   : > { %v2096_v49 = vadd.f32 %v4182_v39, %v2087_v48 }
 0xb6f   : > { %4741 = vmatmul.mubr.msk.f32.gmra.mxu0 %vm795_vm2, %v2096_v49 }
 0xb70   : > { %4776 = vmatprep.mubr.msk.f32.mxu0 %vm5225_vm0, %v5224_v1 }
 0xc27   : > { %v2183_v60 = vpop.f32.mrf.mxu0 }
 0xc28   : > { %v2184_v61 = vadd.f32 %v4183_v59, %v2183_v60 }
 0xc29   : > { %v4736_v62 = vpop.f32.mrf.mxu0 }
 0xc2a   : > { %v2200_v63 = vmul.f32 0.044715, %v2184_v61  ;;  %v2197_v20 = vmul.f32 0.5, %v2184_v61 }
 0xc2b   : > { %v2188_v19 = vpop.f32.mrf.mxu0 }
 0xc2c   : > { %v2203_v2 = vmul.f32 %v2200_v63, %v2184_v61  ;;  %v2189_v55 = vadd.f32 %v4183_v59, %v2188_v19 }
 0xc2d   : > { %v4739_v31 = vpop.f32.mrf.mxu0 }
 0xc2e   : > { %v2206_v4 = vmul.f32 %v2203_v2, %v2184_v61  ;;  %v2201_v5 = vmul.f32 0.044715, %v2189_v55  ;;  %v2198_v25 = vmul.f32 0.5, %v2189_v55  ;;  %v4206_v31 = vld [vmem:[%s6462_s8 + $0x58] sm:$0xff] }
 0xc2f   : > { %v2193_v6 = vpop.f32.mrf.mxu0 }
 0xc30   : > { %v2209_v57 = vadd.f32 %v2206_v4, %v2184_v61  ;;  %v2204_v33 = vmul.f32 %v2201_v5, %v2189_v55  ;;  %v2194_v7 = vadd.f32 %v4183_v59, %v2193_v6  ;;  %v4199_v4 = vld [vmem:[%s6458_s7 + $0x58] sm:$0xff]  ;;  %v4205_v5 = vld [vmem:[%s6462_s8 + $0x50] sm:$0xff] }
 0xc31   : > { %v4742_v8 = vpop.f32.mrf.mxu0  ;;  %4769 = vmatpush3.msra.mxu0 %v4199_v4  ;;  %v4198_v6 = vld [vmem:[%s6458_s7 + $0x50] sm:$0xff] }
 0xc32   : > { %v2212_v9 = vmul.f32 0.7978846, %v2209_v57  ;;  %v2207_v10 = vmul.f32 %v2204_v33, %v2189_v55  ;;  %v2202_v11 = vmul.f32 0.044715, %v2194_v7  ;;  %v2199_v29 = vmul.f32 0.5, %v2194_v7  ;;  %4770 = vmatprep.subr.mxu0 %v5224_v1  ;;  %v4204_v57 = vld [vmem:[%s6462_s8 + $0x48] sm:$0xff] }
 0xc33   : > { %4771 = vmatpush3.msra.mxu0 %v4198_v6  ;;  %v4197_v33 = vld [vmem:[%s6458_s7 + $0x48] sm:$0xff]  ;;  %v4196_v8 = vld [vmem:[%s6458_s7 + $0x40] sm:$0xff] }
 0xc34   : > { %5112 = vtanh.f32 %v2212_v9  ;;  %v2210_v12 = vadd.f32 %v2207_v10, %v2189_v55  ;;  %v2205_v35 = vmul.f32 %v2202_v11, %v2194_v7  ;;  %4772 = vmatprep.subr.mxu0 %v5224_v1 }
 0xc35   : > { %4773 = vmatpush3.msra.mxu0 %v4197_v33 }
 0xc36   : > { %v2208_v14 = vmul.f32 %v2205_v35, %v2194_v7  ;;  %v2213_v15 = vmul.f32 0.7978846, %v2210_v12  ;;  %4774 = vmatprep.subr.mxu0 %v5224_v1 }
 0xc37   : > { %4775 = vmatpush3.msra.mxu0 %v4196_v8 }
 0xc38   : > { %v2211_v16 = vadd.f32 %v2208_v14, %v2194_v7  ;;  %5114 = vtanh.f32 %v2213_v15  ;;  %v4203_v7 = vld [vmem:[%s6462_s8 + $0x40] sm:$0xff]  ;;  %4802 = vmatprep.subr.mxu0 %v5224_v1 }
 0xc3a   : > { %v2214_v17 = vmul.f32 0.7978846, %v2211_v16 }
 0xc3c   : > { %5116 = vtanh.f32 %v2214_v17 }
 0xc41   : > { %v5113_v18 = vpop.eup %5112 }
 0xc42   : > { %v2218_v21 = vadd.f32 1.0, %v5113_v18 }
 0xc44   : > { %v2221_v23 = vmul.f32 %v2218_v21, %v2197_v20  ;;  %v4193_v20 = vld [vmem:[%s6460_s23 + $0x1] ss:$0 sm:$0xff] }
 0xc45   : > { %v5115_v24 = vpop.eup %5114 }
 0xc46   : > { %4760 = vmatmul.mubr.msk.f32.vlgmr.msra.gmra.mxu1 %vm699_vm1, %v2221_v23  ;;  %v2219_v26 = vadd.f32 1.0, %v5115_v24  ;;  %v4194_v23 = vld [vmem:[%s6461_s26 + $0x1] ss:$0 sm:$0xff] }
 0xc47   : > { %4762 = vmatprep.mubr.msk.f32.mxu1 %vm5225_vm0, %v5224_v1  ;;  %4786 = vmatpush3.msra.mxu1 %v4206_v31 }
 0xc48   : > { %v2222_v27 = vmul.f32 %v2219_v26, %v2198_v25  ;;  %4787 = vmatprep.subr.mxu1 %v5224_v1 }
 0xc49   : > { %v5117_v28 = vpop.eup %5116  ;;  %4788 = vmatpush3.msra.mxu1 %v4205_v5 }
 0xc4a   : > { %4763 = vmatmul.mubr.msk.f32.gmra.mxu1 %vm699_vm1, %v2222_v27  ;;  %v2220_v30 = vadd.f32 1.0, %v5117_v28  ;;  %4789 = vmatprep.subr.mxu1 %v5224_v1  ;;  %v4213_v28 = vld [vmem:[%s6459_s9 + $0x58] sm:$0xff] }
 0xc4b   : > { %4765 = vmatprep.mubr.msk.f32.mxu1 %vm5225_vm0, %v5224_v1  ;;  %4790 = vmatpush3.msra.mxu1 %v4204_v57 }
 0xc4c   : > { %v2223_v32 = vmul.f32 %v2220_v30, %v2199_v29  ;;  %4791 = vmatprep.subr.mxu1 %v5224_v1 }
 0xc4d   : > { %4792 = vmatpush3.msra.mxu1 %v4203_v7 }
 0xc4e   : > { %4766 = vmatmul.mubr.msk.f32.gmra.mxu1 %vm699_vm1, %v2223_v32  ;;  %4819 = vmatprep.subr.mxu1 %v5224_v1 }
 0xc4f   : > { %4793 = vmatprep.mubr.msk.f32.mxu1 %vm5225_vm0, %v5224_v1 }
 0xd06   : > { %v2314_v36 = vpop.f32.mrf.mxu1 }
 0xd07   : > { %v2315_v37 = vadd.f32 %v4187_v34, %v2314_v36  ;;  %v4212_v36 = vld [vmem:[%s6459_s9 + $0x50] sm:$0xff] }
 0xd08   : > { %v4761_v38 = vpop.f32.mrf.mxu1 }
 0xd09   : > { %v2328_v39 = vadd.f32 %v2315_v37, %v5780_v58 }
 0xd0a   : > { %v2319_v40 = vpop.f32.mrf.mxu1 }
 0xd0b   : > { %2331 = vst.msk [vmem:[#allocation2] sm:$0xff] %vm795_vm2, %v2328_v39  ;;  %v2320_v41 = vadd.f32 %v4187_v34, %v2319_v40  ;;  %v4211_v39 = vld [vmem:[%s6459_s9 + $0x48] sm:$0xff]  ;;  %v4210_v40 = vld [vmem:[%s6459_s9 + $0x40] sm:$0xff] }
 0xd0c   : > { %v4764_v42 = vpop.f32.mrf.mxu1 }
 0xd0d   : > { %v2329_v43 = vadd.f32 %v2320_v41, %v5786_v0 }
 0xd0e   : > { %v2324_v44 = vpop.f32.mrf.mxu1 }
 0xd0f   : > { %2332 = vst.msk [vmem:[#allocation2 + $0x8] sm:$0xff] %vm795_vm2, %v2329_v43  ;;  %v2325_v45 = vadd.f32 %v4187_v34, %v2324_v44 }
 0xd10   : > { %v4767_v46 = vpop.f32.mrf.mxu1 }
 0xd11   : > { %v2330_v47 = vadd.f32 %v2325_v45, %v5791_v3 }
 0xd12   : > { %v5884_v48 = vld [vmem:[#allocation2] sm:$0xff] }
 0xd13   : > { %2333 = vst.msk [vmem:[#allocation2 + $0x10] sm:$0x1] %vm798_vm3, %v2330_v47  ;;  %v2341_v58 = vsel %vm795_vm2, %v5884_v48, 0.0 }
 0xd14   : > { %2342 = vadd.xlane.f32.xlu0 %v2341_v58 }
 0xd16   : > { %v5889_v49 = vld [vmem:[#allocation2 + $0x8] sm:$0xff] }
 0xd17   : > { %v2344_v0 = vsel %vm795_vm2, %v5889_v49, 0.0 }
 0xd18   : > { %2345 = vadd.xlane.f32.xlu1 %v2344_v0 }
 0xd1a   : > { %v5893_v50 = vld [vmem:[#allocation2 + $0x10] sm:$0x1] }
 0xd1b   : > { %v2347_v51 = vsel %vm798_vm3, %v5893_v50, 0.0 }
 0xd1c   : > { %2348 = vadd.xlane.f32.xlu0 %v2347_v51 }
 0xd9d   : > { %v2343_v3 = vpop.xlane.xlu0 %2342 }
 0xd9e   : > { %v2350_v13 = vmul.f32 0.03125, %v2343_v3 }
 0xda0   : > { %v2353_v52 = vsub.f32 %v5884_v48, %v2350_v13 }
 0xda1   : > { %v2346_v53 = vpop.xlane.xlu1 %2345 }
 0xda2   : > { %v2351_v54 = vmul.f32 0.03125, %v2346_v53  ;;  %v2356_v22 = vmul.f32 %v2353_v52, %v2353_v52 }
 0xda4   : > { %v2354_v56 = vsub.f32 %v5889_v49, %v2351_v54  ;;  %v2359_v59 = vsel %vm795_vm2, %v2356_v22, 0.0 }
 0xda5   : > { %2360 = vadd.xlane.f32.xlu1 %v2359_v59  ;;  %v2349_v60 = vpop.xlane.xlu0 %2348 }
 0xda6   : > { %v2352_v61 = vmul.f32 0.03125, %v2349_v60  ;;  %v2357_v62 = vmul.f32 %v2354_v56, %v2354_v56 }
 0xda8   : > { %v2355_v63 = vsub.f32 %v5893_v50, %v2352_v61  ;;  %v2362_v19 = vsel %vm795_vm2, %v2357_v62, 0.0 }
 0xda9   : > { %2363 = vadd.xlane.f32.xlu0 %v2362_v19 }
 0xdaa   : > { %v2358_v2 = vmul.f32 %v2355_v63, %v2355_v63 }
 0xdac   : > { %v2365_v55 = vsel %vm798_vm3, %v2358_v2, 0.0 }
 0xdad   : > { %2366 = vadd.xlane.f32.xlu1 %v2365_v55 }
 0xe2e   : > { %v2361_v9 = vpop.xlane.xlu1 %2360 }
 0xe2f   : > { %v2368_v10 = vmul.f32 0.03125, %v2361_v9 }
 0xe31   : > { %v2371_v11 = vadd.f32 1e-05, %v2368_v10 }
 0xe32   : > { %v2364_v12 = vpop.xlane.xlu0 %2363 }
 0xe33   : > { %5118 = vrsqrt.f32 %v2371_v11  ;;  %v2369_v35 = vmul.f32 0.03125, %v2364_v12 }
 0xe35   : > { %v2372_v14 = vadd.f32 1e-05, %v2369_v35 }
 0xe36   : > { %v2367_v15 = vpop.xlane.xlu1 %2366 }
 0xe37   : > { %5120 = vrsqrt.f32 %v2372_v14  ;;  %v2370_v16 = vmul.f32 0.03125, %v2367_v15 }
 0xe39   : > { %v2373_v17 = vadd.f32 1e-05, %v2370_v16 }
 0xe3b   : > { %5122 = vrsqrt.f32 %v2373_v17 }
 0xe40   : > { %v5119_v18 = vpop.eup %5118 }
 0xe41   : > { %v2377_v21 = vmul.f32 %v5119_v18, %v2353_v52 }
 0xe43   : > { %v2386_v24 = vmul.f32 %v4193_v20, %v2377_v21 }
 0xe44   : > { %v5121_v25 = vpop.eup %5120 }
 0xe45   : > { %v2378_v26 = vmul.f32 %v5121_v25, %v2354_v56  ;;  %v5941_v27 = vadd.f32 %v4194_v23, %v2386_v24  ;;  %v4227_v24 = vld [vmem:[%s6463_s10 + $0x20] sm:$0xff] }
 0xe47   : > { %v2387_v29 = vmul.f32 %v4193_v20, %v2378_v26  ;;  %4777 = vmatmul.mubr.msk.f32.vlgmr.msra.gmra.mxu0 %vm795_vm2, %v5941_v27  ;;  %4794 = vmatmul.mubr.msk.f32.vlgmr.msra.gmra.mxu1 %vm795_vm2, %v5941_v27 }
 0xe48   : > { %v5123_v30 = vpop.eup %5122  ;;  %4779 = vmatprep.mubr.msk.f32.mxu0 %vm5225_vm0, %v5224_v1  ;;  %4796 = vmatprep.mubr.msk.f32.mxu1 %vm5225_vm0, %v5224_v1 }
 0xe49   : > { %v2379_v32 = vmul.f32 %v5123_v30, %v2355_v63  ;;  %v5954_v34 = vadd.f32 %v4194_v23, %v2387_v29  ;;  %4803 = vmatpush3.msra.mxu0 %v4213_v28 }
 0xe4a   : > { %4804 = vmatprep.subr.mxu0 %v5224_v1 }
 0xe4b   : > { %v2388_v37 = vmul.f32 %v4193_v20, %v2379_v32  ;;  %4780 = vmatmul.mubr.msk.f32.gmra.mxu0 %vm795_vm2, %v5954_v34  ;;  %4797 = vmatmul.mubr.msk.f32.gmra.mxu1 %vm795_vm2, %v5954_v34  ;;  %v4236_v32 = vld [vmem:[%s6458_s7 + $0x78] sm:$0xff] }
 0xe4c   : > { %4782 = vmatprep.mubr.msk.f32.mxu0 %vm5225_vm0, %v5224_v1  ;;  %4799 = vmatprep.mubr.msk.f32.mxu1 %vm5225_vm0, %v5224_v1 }
 0xe4d   : > { %4805 = vmatpush3.msra.mxu0 %v4212_v36  ;;  %v5968_v38 = vadd.f32 %v4194_v23, %v2388_v37  ;;  %v4228_v23 = vld [vmem:[%s6463_s10 + $0x28] sm:$0xff]  ;;  %v4235_v36 = vld [vmem:[%s6458_s7 + $0x70] sm:$0xff] }
 0xe4e   : > { %4806 = vmatprep.subr.mxu0 %v5224_v1 }
 0xe4f   : > { %4783 = vmatmul.mubr.msk.f32.gmra.mxu0 %vm795_vm2, %v5968_v38  ;;  %4800 = vmatmul.mubr.msk.f32.gmra.mxu1 %vm795_vm2, %v5968_v38 }
 0xe50   : > { %4807 = vmatpush3.msra.mxu0 %v4211_v39  ;;  %4810 = vmatprep.mubr.msk.f32.mxu0 %vm5225_vm0, %v5224_v1 }
 0xe51   : > { %4808 = vmatprep.subr.mxu0 %v5224_v1  ;;  %4825 = vmatprep.mubr.msk.f32.mxu1 %vm5225_vm0, %v5224_v1 }
 0xe52   : > { %4809 = vmatpush3.msra.mxu0 %v4210_v40  ;;  %v4234_v40 = vld [vmem:[%s6458_s7 + $0x68] sm:$0xff] }
 0xe53   : > { %4811 = vmatmul.mubr.msk.f32.vlgmr.msra.gmra.mxu0 %vm795_vm2, %v5941_v27  ;;  %4834 = vmatprep.subr.mxu0 %v5224_v1 }
 0xe54   : > { %4813 = vmatprep.mubr.msk.f32.mxu0 %vm5225_vm0, %v5224_v1 }
 0xe57   : > { %4814 = vmatmul.mubr.msk.f32.gmra.mxu0 %vm795_vm2, %v5954_v34 }
 0xe58   : > { %4816 = vmatprep.mubr.msk.f32.mxu0 %vm5225_vm0, %v5224_v1 }
 0xe5b   : > { %4817 = vmatmul.mubr.msk.f32.gmra.mxu0 %vm795_vm2, %v5968_v38 }
 0xe5c   : > { %4840 = vmatprep.mubr.msk.f32.mxu0 %vm5225_vm0, %v5224_v1 }
 0xf07   : > { %v2480_v41 = vpop.f32.mrf.mxu0  ;;  %v2565_v42 = vpop.f32.mrf.mxu1 }
 0xf09   : > { %v4778_v43 = vpop.f32.mrf.mxu0  ;;  %v4795_v44 = vpop.f32.mrf.mxu1 }
 0xf0a   : > { %v4250_v44 = vld [vmem:[%s6459_s9 + $0x78] sm:$0xff] }
 0xf0b   : > { %v2485_v45 = vpop.f32.mrf.mxu0  ;;  %v2570_v46 = vpop.f32.mrf.mxu1 }
 0xf0d   : > { %v4781_v47 = vpop.f32.mrf.mxu0  ;;  %v4798_v58 = vpop.f32.mrf.mxu1 }
 0xf0e   : > { %v4247_v47 = vld [vmem:[%s6459_s9 + $0x60] sm:$0xff]  ;;  %v4243_v58 = vld [vmem:[%s6462_s8 + $0x78] sm:$0xff] }
 0xf0f   : > { %v2490_v0 = vpop.f32.mrf.mxu0  ;;  %v2575_v51 = vpop.f32.mrf.mxu1 }
 0xf10   : > { %4820 = vmatpush3.xpose.msk.msra.mxu1 %vm1129_vm5, %v2575_v51  ;;  %v4242_v51 = vld [vmem:[%s6462_s8 + $0x70] sm:$0xff] }
 0xf11   : > { %v4784_v3 = vpop.f32.mrf.mxu0  ;;  %v4801_v13 = vpop.f32.mrf.mxu1  ;;  %4821 = vmatprep.subr.mxu1 %v5224_v1 }
 0xf12   : > { %v4241_v13 = vld [vmem:[%s6462_s8 + $0x68] sm:$0xff] }
 0xf13   : > { %v2650_v52 = vpop.f32.mrf.mxu0 }
 0xf14   : > { %4822 = vmatpush3.xpose.msk.msra.mxu1 %vm1129_vm5, %v2570_v46  ;;  %v4248_v46 = vld [vmem:[%s6459_s9 + $0x68] sm:$0xff] }
 0xf15   : > { %v4812_v53 = vpop.f32.mrf.mxu0  ;;  %4823 = vmatprep.subr.mxu1 %v5224_v1 }
 0xf16   : > { %v4240_v53 = vld [vmem:[%s6462_s8 + $0x60] sm:$0xff]  ;;  %s4044_s8 = scalar_lea.sflag [#allocation4], %s674_s2 }
 0xf17   : > { %v2655_v54 = vpop.f32.mrf.mxu0 }
 0xf18   : > { %4824 = vmatpush3.xpose.msk.msra.mxu1 %vm1129_vm5, %v2565_v42 }
 0xf19   : > { %v4815_v22 = vpop.f32.mrf.mxu0  ;;  %4849 = vmatprep.subr.mxu1 %v5224_v1 }
 0xf1b   : > { %v2660_v56 = vpop.f32.mrf.mxu0  ;;  %4826 = vmatmul.mubr.msk.f32.vlgmr.msra.gmra.mxu1 %vm1129_vm5, %v2480_v41  ;;  %v4233_v41 = vld [vmem:[%s6458_s7 + $0x60] sm:$0xff]  ;;  %s6366_s7 = scalar_lea.hbm %s6423_s22, %s4297_s30 }
 0xf1c   : > { %4835 = vmatpush3.msk.msra.mxu0 %vm1275_vm4, %v2660_v56  ;;  %4828 = vmatprep.mubr.msk.f32.mxu1 %vm5225_vm0, %v5224_v1 }
 0xf1d   : > { %v4818_v59 = vpop.f32.mrf.mxu0  ;;  %4836 = vmatprep.subr.mxu0 %v5224_v1  ;;  %4850 = vmatpush3.msra.mxu1 %v4228_v23 }
 0xf1e   : > { %4837 = vmatpush3.msra.mxu0 %v2655_v54  ;;  %4851 = vmatprep.subr.mxu1 %v5224_v1 }
 0xf1f   : > { %4829 = vmatmul.mubr.msk.f32.gmra.mxu1 %vm1129_vm5, %v2485_v45  ;;  %4838 = vmatprep.subr.mxu0 %v5224_v1  ;;  %v4249_v45 = vld [vmem:[%s6459_s9 + $0x70] sm:$0xff]  ;;  %s5162_s9 = scalar_lea.vmem %s4057_s5, 16 }
 0xf20   : > { %4839 = vmatpush3.msra.mxu0 %v2650_v52  ;;  %4831 = vmatprep.mubr.msk.f32.mxu1 %vm5225_vm0, %v5224_v1  ;;  %p5163_p11 = scmp.ne.s32.totalorder %s4057_s5, %s5162_s9  ;;  %p5170_p1 = scmp.lt.s32.totalorder %s5168_s3, %s5162_s9 }
 0xf21   : > { %4862 = vmatprep.subr.mxu0 %v5224_v1  ;;  %4852 = vmatpush3.msra.mxu1 %v4227_v24 }
 0xf22   : > { %4879 = vmatprep.subr.mxu1 %v5224_v1  ;;  %p5164_p12 = pnand %p5163_p11, %p5380_p5  ;;  %p5171_p2 = por %p5170_p1, %p5169_p0 }
 0xf23   : > { %4832 = vmatmul.mubr.msk.f32.gmra.mxu1 %vm1129_vm5, %v2490_v0 }
 0xf24   : > { %4853 = vmatprep.mubr.msk.f32.mxu1 %vm5225_vm0, %v5224_v1  ;;  %p5165_p13 = pneg %p5164_p12 }
 0xf26   : > { %p5172_p3 = pnand %p5171_p2, %p5165_p13 }
 0xfdb   : > { %v2748_v60 = vpop.f32.mrf.mxu1 }
 0xfdc   : > { %v2762_v61 = vmul.f32 0.17677669, %v2748_v60 }
 0xfdd   : > { %v4827_v62 = vpop.f32.mrf.mxu1 }
 0xfde   : > { %v2765_v63 = vsel %vm1231_vm6, %v2762_v61, -inf }
 0xfdf   : > { %2766 = vmax.xlane.f32.xlu0 %v2765_v63  ;;  %v2753_v19 = vpop.f32.mrf.mxu1 }
 0xfe0   : > { %v2763_v2 = vmul.f32 0.17677669, %v2753_v19 }
 0xfe1   : > { %v4830_v55 = vpop.f32.mrf.mxu1 }
 0xfe2   : > { %v2768_v31 = vsel %vm1231_vm6, %v2763_v2, -inf }
 0xfe3   : > { %2769 = vmax.xlane.f32.xlu1 %v2768_v31  ;;  %v2758_v4 = vpop.f32.mrf.mxu1 }
 0xfe4   : > { %v2764_v5 = vmul.f32 0.17677669, %v2758_v4 }
 0xfe5   : > { %v4833_v6 = vpop.f32.mrf.mxu1 }
 0xfe6   : > { %v2771_v57 = vsel %vm1238_vm7, %v2764_v5, -inf }
 0xfe7   : > { %2772 = vmax.xlane.f32.xlu0 %v2771_v57 }
0x1068   : > { %v2767_v33 = vpop.xlane.xlu0 %2766 }
0x1069   : > { %v2774_v7 = vsub.f32 %v2762_v61, %v2767_v33  ;;  %v6145_v33 = vld [vmem:[%s6412_s11 + $0x1] ss:$0 sm:$0xff] }
0x106b   : > { %v2777_v8 = vmul.f32 1.442695, %v2774_v7 }
0x106c   : > { %v2770_v9 = vpop.xlane.xlu1 %2769 }
0x106d   : > { %5124 = vpow2.f32 %v2777_v8  ;;  %v2775_v10 = vsub.f32 %v2763_v2, %v2770_v9 }
0x106f   : > { %v2779_v11 = vmul.f32 1.442695, %v2775_v10 }
0x1070   : > { %v2773_v12 = vpop.xlane.xlu0 %2772 }
0x1071   : > { %5126 = vpow2.f32 %v2779_v11  ;;  %v2776_v35 = vsub.f32 %v2764_v5, %v2773_v12 }
0x1073   : > { %v2781_v14 = vmul.f32 1.442695, %v2776_v35 }
0x1075   : > { %5128 = vpow2.f32 %v2781_v14 }
0x107a   : > { %v5125_v15 = vpop.eup %5124 }
0x107b   : > { %v2783_v16 = vsel %vm1231_vm6, %v5125_v15, 0.0 }
0x107c   : > { %2784 = vadd.xlane.f32.xlu1 %v2783_v16 }
0x107e   : > { %v5127_v17 = vpop.eup %5126 }
0x107f   : > { %v2786_v18 = vsel %vm1231_vm6, %v5127_v17, 0.0 }
0x1080   : > { %2787 = vadd.xlane.f32.xlu0 %v2786_v18 }
0x1082   : > { %v5129_v20 = vpop.eup %5128 }
0x1083   : > { %v2789_v21 = vsel %vm1238_vm7, %v5129_v20, 0.0 }
0x1084   : > { %2790 = vadd.xlane.f32.xlu1 %v2789_v21 }
0x1105   : > { %v2785_v25 = vpop.xlane.xlu1 %2784 }
0x1106   : > { %5130 = vrcp.f32 %v2785_v25 }
0x1109   : > { %v2788_v26 = vpop.xlane.xlu0 %2787 }
0x110a   : > { %5132 = vrcp.f32 %v2788_v26 }
0x110d   : > { %v2791_v28 = vpop.xlane.xlu1 %2790 }
0x110e   : > { %5134 = vrcp.f32 %v2791_v28 }
0x1113   : > { %v5131_v29 = vpop.eup %5130 }
0x1114   : > { %v2793_v30 = vmul.f32 %v5131_v29, %v5125_v15 }
0x1116   : > { %4841 = vmatmul.mubr.msk.f32.vlgmr.msra.gmra.mxu0 %vm1231_vm6, %v2793_v30 }
0x1117   : > { %v5133_v37 = vpop.eup %5132  ;;  %4843 = vmatprep.mubr.msk.f32.mxu0 %vm5225_vm0, %v5224_v1  ;;  %4863 = vmatpush3.msra.mxu0 %v4236_v32 }
0x1118   : > { %v2795_v39 = vmul.f32 %v5133_v37, %v5127_v17  ;;  %4864 = vmatprep.subr.mxu0 %v5224_v1 }
0x1119   : > { %4865 = vmatpush3.msra.mxu0 %v4235_v36 }
0x111a   : > { %4844 = vmatmul.mubr.msk.f32.gmra.mxu0 %vm1231_vm6, %v2795_v39  ;;  %4866 = vmatprep.subr.mxu0 %v5224_v1 }
0x111b   : > { %v5135_v42 = vpop.eup %5134  ;;  %4846 = vmatprep.mubr.msk.f32.mxu0 %vm5225_vm0, %v5224_v1  ;;  %4867 = vmatpush3.msra.mxu0 %v4234_v40 }
0x111c   : > { %v2797_v43 = vmul.f32 %v5135_v42, %v5129_v20  ;;  %4868 = vmatprep.subr.mxu0 %v5224_v1 }
0x111d   : > { %4869 = vmatpush3.msra.mxu0 %v4233_v41 }
0x111e   : > { %4847 = vmatmul.mubr.msk.f32.gmra.mxu0 %vm1231_vm6, %v2797_v43  ;;  %4896 = vmatprep.subr.mxu0 %v5224_v1 }
0x111f   : > { %4870 = vmatprep.mubr.msk.f32.mxu0 %vm5225_vm0, %v5224_v1 }
0x1122   : > { %4871 = vmatmul.mubr.msk.f32.vlgmr.msra.gmra.mxu0 %vm795_vm2, %v5941_v27 }
0x1123   : > { %4873 = vmatprep.mubr.msk.f32.mxu0 %vm5225_vm0, %v5224_v1  ;;  %4897 = vmatpush3.msra.mxu0 %v4250_v44 }
0x1124   : > { %4898 = vmatprep.subr.mxu0 %v5224_v1 }
0x1125   : > { %4899 = vmatpush3.msra.mxu0 %v4249_v45 }
0x1126   : > { %4874 = vmatmul.mubr.msk.f32.gmra.mxu0 %vm795_vm2, %v5954_v34  ;;  %4900 = vmatprep.subr.mxu0 %v5224_v1 }
0x1127   : > { %4876 = vmatprep.mubr.msk.f32.mxu0 %vm5225_vm0, %v5224_v1  ;;  %4901 = vmatpush3.msra.mxu0 %v4248_v46 }
0x1128   : > { %4902 = vmatprep.subr.mxu0 %v5224_v1 }
0x1129   : > { %4903 = vmatpush3.msra.mxu0 %v4247_v47 }
0x112a   : > { %4877 = vmatmul.mubr.msk.f32.gmra.mxu0 %vm795_vm2, %v5968_v38  ;;  %4928 = vmatprep.subr.mxu0 %v5224_v1 }
0x112b   : > { %4904 = vmatprep.mubr.msk.f32.mxu0 %vm5225_vm0, %v5224_v1 }
0x112e   : > { %4905 = vmatmul.mubr.msk.f32.vlgmr.msra.gmra.mxu0 %vm795_vm2, %v5941_v27 }
0x112f   : > { %4907 = vmatprep.mubr.msk.f32.mxu0 %vm5225_vm0, %v5224_v1 }
0x1132   : > { %4908 = vmatmul.mubr.msk.f32.gmra.mxu0 %vm795_vm2, %v5954_v34 }
0x1133   : > { %4910 = vmatprep.mubr.msk.f32.mxu0 %vm5225_vm0, %v5224_v1 }
0x1136   : > { %4911 = vmatmul.mubr.msk.f32.gmra.mxu0 %vm795_vm2, %v5968_v38 }
0x1137   : > { %4934 = vmatprep.mubr.msk.f32.mxu0 %vm5225_vm0, %v5224_v1 }
0x11d6   : > { %v2876_v0 = vpop.f32.mrf.mxu0 }
0x11d7   : > { %4854 = vmatmul.mubr.msk.f32.vlgmr.msra.gmra.mxu1 %vm1129_vm5, %v2876_v0 }
0x11d8   : > { %v4842_v3 = vpop.f32.mrf.mxu0  ;;  %4880 = vmatpush3.msra.mxu1 %v4243_v58  ;;  %4856 = vmatprep.mubr.msk.f32.mxu1 %vm5225_vm0, %v5224_v1 }
0x11d9   : > { %4881 = vmatprep.subr.mxu1 %v5224_v1 }
0x11da   : > { %v2881_v52 = vpop.f32.mrf.mxu0  ;;  %4882 = vmatpush3.msra.mxu1 %v4242_v51 }
0x11db   : > { %4857 = vmatmul.mubr.msk.f32.gmra.mxu1 %vm1129_vm5, %v2881_v52  ;;  %4883 = vmatprep.subr.mxu1 %v5224_v1 }
0x11dc   : > { %v4845_v54 = vpop.f32.mrf.mxu0  ;;  %4859 = vmatprep.mubr.msk.f32.mxu1 %vm5225_vm0, %v5224_v1  ;;  %4884 = vmatpush3.msra.mxu1 %v4241_v13 }
0x11dd   : > { %4885 = vmatprep.subr.mxu1 %v5224_v1 }
0x11de   : > { %v2886_v22 = vpop.f32.mrf.mxu0  ;;  %4886 = vmatpush3.msra.mxu1 %v4240_v53 }
0x11df   : > { %4860 = vmatmul.mubr.msk.f32.gmra.mxu1 %vm1129_vm5, %v2886_v22  ;;  %4913 = vmatprep.subr.mxu1 %v5224_v1 }
0x11e0   : > { %v4848_v56 = vpop.f32.mrf.mxu0  ;;  %4887 = vmatprep.mubr.msk.f32.mxu1 %vm5225_vm0, %v5224_v1 }
0x11e1   : > { %v4265_v56 = vld [vmem:[%s6463_s10 + $0x38] sm:$0xff] }
0x11e2   : > { %v3062_v59 = vpop.f32.mrf.mxu0 }
0x11e3   : > { %4888 = vmatmul.mubr.msk.f32.vlgmr.msra.gmra.mxu1 %vm795_vm2, %v5941_v27 }
0x11e4   : > { %v4872_v60 = vpop.f32.mrf.mxu0  ;;  %4890 = vmatprep.mubr.msk.f32.mxu1 %vm5225_vm0, %v5224_v1 }
0x11e6   : > { %v3067_v61 = vpop.f32.mrf.mxu0 }
0x11e7   : > { %4891 = vmatmul.mubr.msk.f32.gmra.mxu1 %vm795_vm2, %v5954_v34 }
0x11e8   : > { %v4875_v62 = vpop.f32.mrf.mxu0  ;;  %4893 = vmatprep.mubr.msk.f32.mxu1 %vm5225_vm0, %v5224_v1 }
0x11ea   : > { %v3072_v63 = vpop.f32.mrf.mxu0 }
0x11eb   : > { %4894 = vmatmul.mubr.msk.f32.gmra.mxu1 %vm795_vm2, %v5968_v38 }
0x11ec   : > { %v4878_v19 = vpop.f32.mrf.mxu0  ;;  %4919 = vmatprep.mubr.msk.f32.mxu1 %vm5225_vm0, %v5224_v1 }
0x11ee   : > { %v3232_v27 = vpop.f32.mrf.mxu0 }
0x11f0   : > { %v4906_v2 = vpop.f32.mrf.mxu0 }
0x11f2   : > { %v3237_v55 = vpop.f32.mrf.mxu0 }
0x11f4   : > { %v4909_v31 = vpop.f32.mrf.mxu0 }
0x11f6   : > { %v3242_v4 = vpop.f32.mrf.mxu0 }
0x11f7   : > { %4929 = vmatpush3.msk.msra.mxu0 %vm1275_vm4, %v3242_v4 }
0x11f8   : > { %v4912_v34 = vpop.f32.mrf.mxu0  ;;  %4930 = vmatprep.subr.mxu0 %v5224_v1 }
0x11f9   : > { %4931 = vmatpush3.msra.mxu0 %v3237_v55 }
0x11fa   : > { %4932 = vmatprep.subr.mxu0 %v5224_v1 }
0x11fb   : > { %4933 = vmatpush3.msra.mxu0 %v3232_v27 }
0x11fc   : > { %4956 = vmatprep.subr.mxu0 %v5224_v1 }
0x1297   : > { %v6138_v38 = vpop.f32.mrf.mxu1 }
0x1298   : > { %v2988_v4 = vadd.f32 %v6145_v33, %v6138_v38 }
0x1299   : > { %v4855_v5 = vpop.f32.mrf.mxu1 }
0x129b   : > { %v6140_v6 = vpop.f32.mrf.mxu1 }
0x129d   : > { %v4858_v57 = vpop.f32.mrf.mxu1 }
0x129f   : > { %v2978_v7 = vpop.f32.mrf.mxu1 }
0x12a0   : > { %v6148_v8 = vadd.f32 %v6145_v33, %v2978_v7  ;;  %v2989_v7 = vadd.f32 %v6145_v33, %v6140_v6 }
0x12a1   : > { %v4861_v9 = vpop.f32.mrf.mxu1 }
0x12a3   : > { %v3147_v10 = vpop.f32.mrf.mxu1 }
0x12a5   : > { %v4889_v11 = vpop.f32.mrf.mxu1 }
0x12a7   : > { %v3152_v12 = vpop.f32.mrf.mxu1 }
0x12a9   : > { %v4892_v35 = vpop.f32.mrf.mxu1 }
0x12ab   : > { %v3157_v14 = vpop.f32.mrf.mxu1 }
0x12ac   : > { %4914 = vmatpush3.xpose.msk.msra.mxu1 %vm1129_vm5, %v3157_v14 }
0x12ad   : > { %v4895_v15 = vpop.f32.mrf.mxu1  ;;  %4915 = vmatprep.subr.mxu1 %v5224_v1 }
0x12b0   : > { %4916 = vmatpush3.xpose.msk.msra.mxu1 %vm1129_vm5, %v3152_v12 }
0x12b1   : > { %4917 = vmatprep.subr.mxu1 %v5224_v1 }
0x12b4   : > { %4918 = vmatpush3.xpose.msk.msra.mxu1 %vm1129_vm5, %v3147_v10 }
0x12b5   : > { %4943 = vmatprep.subr.mxu1 %v5224_v1 }
0x12b7   : > { %4920 = vmatmul.mubr.msk.f32.vlgmr.msra.gmra.mxu1 %vm1129_vm5, %v3062_v59  ;;  %v4264_v59 = vld [vmem:[%s6463_s10 + $0x30] sm:$0xff] }
0x12b8   : > { %4922 = vmatprep.mubr.msk.f32.mxu1 %vm5225_vm0, %v5224_v1  ;;  %4944 = vmatpush3.msra.mxu1 %v4265_v56  ;;  %v4289_v56 = vld [vmem:[%s6417_s16 + $0x78] sm:$0xff] }
0x12b9   : > { %4945 = vmatprep.subr.mxu1 %v5224_v1 }
0x12ba   : > { %4946 = vmatpush3.msra.mxu1 %v4264_v59  ;;  %v4288_v59 = vld [vmem:[%s6417_s16 + $0x70] sm:$0xff] }
0x12bb   : > { %4923 = vmatmul.mubr.msk.f32.gmra.mxu1 %vm1129_vm5, %v3067_v61  ;;  %4973 = vmatprep.subr.mxu1 %v5224_v1 }
0x12bc   : > { %4925 = vmatprep.mubr.msk.f32.mxu1 %vm5225_vm0, %v5224_v1 }
0x12bf   : > { %4926 = vmatmul.mubr.msk.f32.gmra.mxu1 %vm1129_vm5, %v3072_v63 }
0x12c0   : > { %4947 = vmatprep.mubr.msk.f32.mxu1 %vm5225_vm0, %v5224_v1 }
0x1377   : > { %v3330_v16 = vpop.f32.mrf.mxu1 }
0x1378   : > { %v3344_v17 = vmul.f32 0.17677669, %v3330_v16 }
0x1379   : > { %v4921_v18 = vpop.f32.mrf.mxu1 }
0x137a   : > { %v3347_v20 = vsel %vm1231_vm6, %v3344_v17, -inf }
0x137b   : > { %3348 = vmax.xlane.f32.xlu0 %v3347_v20  ;;  %v3335_v21 = vpop.f32.mrf.mxu1 }
0x137c   : > { %v3345_v23 = vmul.f32 0.17677669, %v3335_v21 }
0x137d   : > { %v4924_v24 = vpop.f32.mrf.mxu1 }
0x137e   : > { %v3350_v25 = vsel %vm1231_vm6, %v3345_v23, -inf }
0x137f   : > { %3351 = vmax.xlane.f32.xlu0 %v3350_v25  ;;  %v3340_v26 = vpop.f32.mrf.mxu1 }
0x1380   : > { %v3346_v41 = vmul.f32 0.17677669, %v3340_v26 }
0x1381   : > { %v4927_v28 = vpop.f32.mrf.mxu1 }
0x1382   : > { %v3353_v45 = vsel %vm1238_vm7, %v3346_v41, -inf }
0x1404   : > { %v3349_v29 = vpop.xlane.xlu0 %3348 }
0x1405   : > { %v3356_v30 = vsub.f32 %v3344_v17, %v3349_v29  ;;  %v4276_v29 = vld [vmem:[%s6415_s14 + $0x38] sm:$0xff] }
0x1407   : > { %v3359_v32 = vmul.f32 1.442695, %v3356_v30  ;;  %v4275_v30 = vld [vmem:[%s6415_s14 + $0x30] sm:$0xff] }
0x1408   : > { %v3352_v36 = vpop.xlane.xlu0 %3351 }
0x1409   : > { %5136 = vpow2.f32 %v3359_v32  ;;  %v3357_v37 = vsub.f32 %v3345_v23, %v3352_v36 }
0x140b   : > { %v3361_v39 = vmul.f32 1.442695, %v3357_v37 }
0x140d   : > { %5138 = vpow2.f32 %v3361_v39 }
0x1416   : > { %v5137_v40 = vpop.eup %5136 }
0x1417   : > { %v3365_v42 = vsel %vm1231_vm6, %v5137_v40, 0.0 }
0x1418   : > { %3366 = vadd.xlane.f32.xlu1 %v3365_v42 }
0x141a   : > { %v5139_v43 = vpop.eup %5138 }
0x141b   : > { %v3368_v44 = vsel %vm1231_vm6, %v5139_v43, 0.0 }
0x141c   : > { %3369 = vadd.xlane.f32.xlu0 %v3368_v44  ;;  %3354 = vmax.xlane.f32.xlu1 %v3353_v45  ;;  %v4271_v45 = vld [vmem:[%s6413_s12 + $0x1] ss:$0 sm:$0xff] }
0x14a1   : > { %v3367_v46 = vpop.xlane.xlu1 %3366 }
0x14a2   : > { %5140 = vrcp.f32 %v3367_v46 }
0x14a5   : > { %v3370_v47 = vpop.xlane.xlu0 %3369  ;;  %v3355_v58 = vpop.xlane.xlu1 %3354 }
0x14a6   : > { %5142 = vrcp.f32 %v3370_v47  ;;  %v3358_v0 = vsub.f32 %v3346_v41, %v3355_v58  ;;  %v4272_v58 = vld [vmem:[%s6414_s13 + $0x1] ss:$0 sm:$0xff] }
0x14a8   : > { %v3363_v51 = vmul.f32 1.442695, %v3358_v0 }
0x14aa   : > { %5144 = vpow2.f32 %v3363_v51 }
0x14af   : > { %v5141_v3 = vpop.eup %5140 }
0x14b0   : > { %v3375_v13 = vmul.f32 %v5141_v3, %v5137_v40 }
0x14b2   : > { %4935 = vmatmul.mubr.msk.f32.vlgmr.msra.gmra.mxu0 %vm1231_vm6, %v3375_v13 }
0x14b3   : > { %v5143_v52 = vpop.eup %5142  ;;  %4937 = vmatprep.mubr.msk.f32.mxu0 %vm5225_vm0, %v5224_v1  ;;  %4957 = vmatpush3.msra.mxu0 %v4276_v29 }
0x14b4   : > { %v3377_v53 = vmul.f32 %v5143_v52, %v5139_v43  ;;  %4958 = vmatprep.subr.mxu0 %v5224_v1 }
0x14b5   : > { %4959 = vmatpush3.msra.mxu0 %v4275_v30 }
0x14b6   : > { %4938 = vmatmul.mubr.msk.f32.gmra.mxu0 %vm1231_vm6, %v3377_v53  ;;  %4960 = vmatprep.subr.mxu0 %v5224_v1 }
0x14b7   : > { %v5145_v54 = vpop.eup %5144  ;;  %4940 = vmatprep.mubr.msk.f32.mxu0 %vm5225_vm0, %v5224_v1 }
0x14b8   : > { %v3371_v22 = vsel %vm1238_vm7, %v5145_v54, 0.0 }
0x14b9   : > { %3372 = vadd.xlane.f32.xlu1 %v3371_v22 }
0x1542   : > { %v3373_v60 = vpop.xlane.xlu1 %3372 }
0x1543   : > { %5146 = vrcp.f32 %v3373_v60  ;;  %v4287_v60 = vld [vmem:[%s6417_s16 + $0x68] sm:$0xff] }
0x1550   : > { %v5147_v61 = vpop.eup %5146 }
0x1551   : > { %v3379_v62 = vmul.f32 %v5147_v61, %v5145_v54  ;;  %v4286_v61 = vld [vmem:[%s6417_s16 + $0x60] sm:$0xff] }
0x1553   : > { %4941 = vmatmul.mubr.msk.f32.gmra.mxu0 %vm1231_vm6, %v3379_v62  ;;  %v4285_v62 = vld [vmem:[%s6417_s16 + $0x58] sm:$0xff] }
0x1554   : > { %4964 = vmatprep.mubr.msk.f32.mxu0 %vm5225_vm0, %v5224_v1 }
0x1572   : > { %v3458_v63 = vpop.f32.mrf.mxu0 }
0x1573   : > { %4948 = vmatmul.mubr.msk.f32.vlgmr.msra.gmra.mxu1 %vm1129_vm5, %v3458_v63  ;;  %v4284_v63 = vld [vmem:[%s6417_s16 + $0x50] sm:$0xff] }
0x1574   : > { %v4936_v19 = vpop.f32.mrf.mxu0  ;;  %4950 = vmatprep.mubr.msk.f32.mxu1 %vm5225_vm0, %v5224_v1  ;;  %4974 = vmatpush3.msra.mxu1 %v4289_v56 }
0x1575   : > { %4975 = vmatprep.subr.mxu1 %v5224_v1  ;;  %v4283_v19 = vld [vmem:[%s6417_s16 + $0x48] sm:$0xff] }
0x1576   : > { %v3463_v27 = vpop.f32.mrf.mxu0  ;;  %4976 = vmatpush3.msra.mxu1 %v4288_v59 }
0x1577   : > { %4951 = vmatmul.mubr.msk.f32.gmra.mxu1 %vm1129_vm5, %v3463_v27  ;;  %4977 = vmatprep.subr.mxu1 %v5224_v1  ;;  %v4282_v27 = vld [vmem:[%s6417_s16 + $0x40] sm:$0xff] }
0x1578   : > { %v4939_v2 = vpop.f32.mrf.mxu0  ;;  %4953 = vmatprep.mubr.msk.f32.mxu1 %vm5225_vm0, %v5224_v1  ;;  %4978 = vmatpush3.msra.mxu1 %v4287_v60 }
0x1579   : > { %4979 = vmatprep.subr.mxu1 %v5224_v1 }
0x157a   : > { %4980 = vmatpush3.msra.mxu1 %v4286_v61 }
0x157b   : > { %4981 = vmatprep.subr.mxu1 %v5224_v1 }
0x157c   : > { %4982 = vmatpush3.msra.mxu1 %v4285_v62 }
0x157d   : > { %4983 = vmatprep.subr.mxu1 %v5224_v1 }
0x157e   : > { %4984 = vmatpush3.msra.mxu1 %v4284_v63 }
0x157f   : > { %4985 = vmatprep.subr.mxu1 %v5224_v1 }
0x1580   : > { %4986 = vmatpush3.msra.mxu1 %v4283_v19  ;;  %v3967_v19 = vld [vmem:[%s6421_s20 + $0x38] sm:$0xff] }
0x1581   : > { %4987 = vmatprep.subr.mxu1 %v5224_v1 }
0x1582   : > { %4988 = vmatpush3.msra.mxu1 %v4282_v27  ;;  %v3964_v27 = vld [vmem:[%s6421_s20 + $0x20] sm:$0xff] }
0x1613   : > { %v3468_v55 = vpop.f32.mrf.mxu0 }
0x1614   : > { %4954 = vmatmul.mubr.msk.f32.gmra.mxu1 %vm1129_vm5, %v3468_v55 }
0x1615   : > { %v4942_v31 = vpop.f32.mrf.mxu0  ;;  %4989 = vmatprep.mubr.msk.f32.mxu1 %vm5225_vm0, %v5224_v1 }
0x1633   : > { %v3550_v34 = vpop.f32.mrf.mxu1 }
0x1634   : > { %v3564_v5 = vadd.f32 %v3550_v34, %v2988_v4 }
0x1635   : > { %v4949_v57 = vpop.f32.mrf.mxu1 }
0x1636   : > { %v6202_v9 = vadd.f32 %v3564_v5, %v5884_v48 }
0x1637   : > { %v3555_v10 = vpop.f32.mrf.mxu1 }
0x1638   : > { %v3565_v11 = vadd.f32 %v3555_v10, %v2989_v7  ;;  %v3574_v12 = vsel %vm795_vm2, %v6202_v9, 0.0  ;;  %v4278_v7 = vld [vmem:[%s6416_s15 + $0x1] ss:$0 sm:$0xff] }
0x1639   : > { %3575 = vadd.xlane.f32.xlu0 %v3574_v12  ;;  %v4952_v35 = vpop.f32.mrf.mxu1 }
0x163a   : > { %v6207_v14 = vadd.f32 %v3565_v11, %v5889_v49 }
0x163c   : > { %v3577_v38 = vsel %vm795_vm2, %v6207_v14, 0.0 }
0x163d   : > { %3578 = vadd.xlane.f32.xlu0 %v3577_v38 }
0x16c2   : > { %v3576_v15 = vpop.xlane.xlu0 %3575 }
0x16c3   : > { %v3583_v16 = vmul.f32 0.03125, %v3576_v15 }
0x16c5   : > { %v3586_v6 = vsub.f32 %v6202_v9, %v3583_v16 }
0x16c6   : > { %v3579_v48 = vpop.xlane.xlu0 %3578 }
0x16c7   : > { %v3584_v33 = vmul.f32 0.03125, %v3579_v48  ;;  %v3589_v17 = vmul.f32 %v3586_v6, %v3586_v6 }
0x16c9   : > { %v3587_v18 = vsub.f32 %v6207_v14, %v3584_v33  ;;  %v3592_v20 = vsel %vm795_vm2, %v3589_v17, 0.0 }
0x16ca   : > { %3593 = vadd.xlane.f32.xlu1 %v3592_v20 }
0x16cb   : > { %v3590_v21 = vmul.f32 %v3587_v18, %v3587_v18 }
0x16cd   : > { %v3595_v49 = vsel %vm795_vm2, %v3590_v21, 0.0 }
0x16ce   : > { %3596 = vadd.xlane.f32.xlu0 %v3595_v49 }
0x16d4   : > { %v3560_v23 = vpop.f32.mrf.mxu1 }
0x16d5   : > { %v3566_v24 = vadd.f32 %v3560_v23, %v6148_v8  ;;  %v4273_v8 = vld [vmem:[%s6415_s14 + $0x20] sm:$0xff] }
0x16d6   : > { %v4955_v25 = vpop.f32.mrf.mxu1 }
0x16d7   : > { %v6217_v26 = vadd.f32 %v3566_v24, %v5893_v50  ;;  %v4274_v50 = vld [vmem:[%s6415_s14 + $0x28] sm:$0xff] }
0x16d8   : > { %4961 = vmatpush3.msra.mxu0 %v4274_v50 }
0x16d9   : > { %v3580_v28 = vsel %vm798_vm3, %v6217_v26, 0.0  ;;  %4962 = vmatprep.subr.mxu0 %v5224_v1 }
0x16da   : > { %3581 = vadd.xlane.f32.xlu1 %v3580_v28  ;;  %4963 = vmatpush3.msra.mxu0 %v4273_v8 }
0x16db   : > { %4998 = vmatprep.subr.mxu0 %v5224_v1 }
0x1753   : > { %v3594_v32 = vpop.xlane.xlu1 %3593 }
0x1754   : > { %v3601_v36 = vmul.f32 0.03125, %v3594_v32 }
0x1756   : > { %v3604_v37 = vadd.f32 1e-05, %v3601_v36  ;;  %v3876_v36 = vld [vmem:[%s6419_s18 + $0x18] sm:$0xff] }
0x1757   : > { %v3597_v39 = vpop.xlane.xlu0 %3596 }
0x1758   : > { %5148 = vrsqrt.f32 %v3604_v37  ;;  %v3602_v40 = vmul.f32 0.03125, %v3597_v39  ;;  %v3875_v37 = vld [vmem:[%s6419_s18 + $0x10] sm:$0xff]  ;;  %v3874_v39 = vld [vmem:[%s6419_s18 + $0x8] sm:$0xff] }
0x175a   : > { %v3605_v41 = vadd.f32 1e-05, %v3602_v40  ;;  %v3873_v40 = vld [vmem:[%s6419_s18] sm:$0xff] }
0x175c   : > { %5150 = vrsqrt.f32 %v3605_v41 }
0x1763   : > { %v3582_v42 = vpop.xlane.xlu1 %3581 }
0x1764   : > { %v3585_v43 = vmul.f32 0.03125, %v3582_v42 }
0x1765   : > { %v5149_v44 = vpop.eup %5148 }
0x1766   : > { %v3610_v46 = vmul.f32 %v5149_v44, %v3586_v6  ;;  %v3588_v47 = vsub.f32 %v6217_v26, %v3585_v43 }
0x1768   : > { %v3619_v0 = vmul.f32 %v4271_v45, %v3610_v46  ;;  %v3591_v51 = vmul.f32 %v3588_v47, %v3588_v47 }
0x1769   : > { %v5151_v3 = vpop.eup %5150 }
0x176a   : > { %v3598_v13 = vsel %vm798_vm3, %v3591_v51, 0.0  ;;  %v3628_v52 = vadd.f32 %v4272_v58, %v3619_v0  ;;  %v3611_v53 = vmul.f32 %v5151_v3, %v3587_v18 }
0x176b   : > { %3599 = vadd.xlane.f32.xlu1 %v3598_v13 }
0x176c   : > { %4965 = vmatmul.mubr.msk.f32.vlgmr.msra.gmra.mxu0 %vm795_vm2, %v3628_v52  ;;  %v3620_v54 = vmul.f32 %v4271_v45, %v3611_v53  ;;  %v4291_v52 = vld [vmem:[%s6418_s17 + $0x1] ss:$0 sm:$0xff] }
0x176d   : > { %4967 = vmatprep.mubr.msk.f32.mxu0 %vm5225_vm0, %v5224_v1  ;;  %4999 = vmatpush3.msra.mxu0 %v3876_v36 }
0x176e   : > { %v3629_v22 = vadd.f32 %v4272_v58, %v3620_v54  ;;  %5000 = vmatprep.subr.mxu0 %v5224_v1 }
0x176f   : > { %5001 = vmatpush3.msra.mxu0 %v3875_v37 }
0x1770   : > { %4968 = vmatmul.mubr.msk.f32.gmra.mxu0 %vm795_vm2, %v3629_v22  ;;  %5002 = vmatprep.subr.mxu0 %v5224_v1 }
0x1771   : > { %4970 = vmatprep.mubr.msk.f32.mxu0 %vm5225_vm0, %v5224_v1  ;;  %5003 = vmatpush3.msra.mxu0 %v3874_v39 }
0x1772   : > { %5004 = vmatprep.subr.mxu0 %v5224_v1 }
0x1773   : > { %5005 = vmatpush3.msra.mxu0 %v3873_v40 }
0x1774   : > { %5009 = vmatprep.subr.mxu0 %v5224_v1 }
0x17f4   : > { %v3600_v2 = vpop.xlane.xlu1 %3599 }
0x17f5   : > { %v3603_v55 = vmul.f32 0.03125, %v3600_v2  ;;  %v3963_v2 = vld [vmem:[%s6421_s20 + $0x18] sm:$0xff] }
0x17f7   : > { %v3606_v31 = vadd.f32 1e-05, %v3603_v55  ;;  %v3962_v55 = vld [vmem:[%s6421_s20 + $0x10] sm:$0xff] }
0x17f9   : > { %5152 = vrsqrt.f32 %v3606_v31  ;;  %v3961_v31 = vld [vmem:[%s6421_s20 + $0x8] sm:$0xff] }
0x1806   : > { %v5153_v4 = vpop.eup %5152 }
0x1807   : > { %v3612_v34 = vmul.f32 %v5153_v4, %v3588_v47  ;;  %v3960_v4 = vld [vmem:[%s6421_s20] sm:$0xff] }
0x1809   : > { %v3621_v5 = vmul.f32 %v4271_v45, %v3612_v34 }
0x180b   : > { %v3630_v57 = vadd.f32 %v4272_v58, %v3621_v5 }
0x180d   : > { %4971 = vmatmul.mubr.msk.f32.gmra.mxu0 %vm795_vm2, %v3630_v57 }
0x180e   : > { %5006 = vmatprep.mubr.msk.f32.mxu0 %vm5225_vm0, %v5224_v1 }
0x182c   : > { %v3719_v10 = vpop.f32.mrf.mxu0 }
0x182d   : > { %v3720_v11 = vadd.f32 %v4278_v7, %v3719_v10  ;;  %v3877_v10 = vld [vmem:[%s6420_s19] sm:$0x1] }
0x182e   : > { %v4966_v12 = vpop.f32.mrf.mxu0 }
0x182f   : > { %v3736_v35 = vmul.f32 0.044715, %v3720_v11  ;;  %v3733_v25 = vmul.f32 0.5, %v3720_v11 }
0x1830   : > { %v3724_v38 = vpop.f32.mrf.mxu0 }
0x1831   : > { %v3739_v15 = vmul.f32 %v3736_v35, %v3720_v11  ;;  %v3725_v16 = vadd.f32 %v4278_v7, %v3724_v38 }
0x1832   : > { %v4969_v6 = vpop.f32.mrf.mxu0 }
0x1833   : > { %v3742_v48 = vmul.f32 %v3739_v15, %v3720_v11  ;;  %v3737_v33 = vmul.f32 0.044715, %v3725_v16  ;;  %v3734_v50 = vmul.f32 0.5, %v3725_v16 }
0x1835   : > { %v3745_v17 = vadd.f32 %v3742_v48, %v3720_v11  ;;  %v3740_v18 = vmul.f32 %v3737_v33, %v3725_v16 }
0x1837   : > { %v3748_v20 = vmul.f32 0.7978846, %v3745_v17  ;;  %v3743_v21 = vmul.f32 %v3740_v18, %v3725_v16  ;;  %v3968_v18 = vld [vmem:[%s6422_s21] sm:$0x1] }
0x1839   : > { %5154 = vtanh.f32 %v3748_v20  ;;  %v3746_v49 = vadd.f32 %v3743_v21, %v3725_v16 }
0x183b   : > { %v3749_v23 = vmul.f32 0.7978846, %v3746_v49 }
0x183d   : > { %5156 = vtanh.f32 %v3749_v23 }
0x1846   : > { %v5155_v24 = vpop.eup %5154 }
0x1847   : > { %v3754_v28 = vadd.f32 1.0, %v5155_v24 }
0x1849   : > { %v3757_v29 = vmul.f32 %v3754_v28, %v3733_v25 }
0x184a   : > { %v5157_v30 = vpop.eup %5156 }
0x184b   : > { %4990 = vmatmul.mubr.msk.f32.vlgmr.msra.gmra.mxu1 %vm699_vm1, %v3757_v29  ;;  %v3755_v8 = vadd.f32 1.0, %v5157_v30 }
0x184c   : > { %4992 = vmatprep.mubr.msk.f32.mxu1 %vm5225_vm0, %v5224_v1 }
0x184d   : > { %v3758_v32 = vmul.f32 %v3755_v8, %v3734_v50 }
0x184f   : > { %4993 = vmatmul.mubr.msk.f32.gmra.mxu1 %vm699_vm1, %v3758_v32 }
0x1850   : > { %4995 = vmatprep.mubr.msk.f32.mxu1 %vm5225_vm0, %v5224_v1 }
0x18cd   : > { %v3729_v41 = vpop.f32.mrf.mxu0 }
0x18ce   : > { %v3730_v42 = vadd.f32 %v4278_v7, %v3729_v41 }
0x18cf   : > { %v4972_v43 = vpop.f32.mrf.mxu0 }
0x18d0   : > { %v3738_v44 = vmul.f32 0.044715, %v3730_v42  ;;  %v3735_v51 = vmul.f32 0.5, %v3730_v42 }
0x18d2   : > { %v3741_v45 = vmul.f32 %v3738_v44, %v3730_v42 }
0x18d4   : > { %v3744_v46 = vmul.f32 %v3741_v45, %v3730_v42 }
0x18d6   : > { %v3747_v47 = vadd.f32 %v3744_v46, %v3730_v42 }
0x18d8   : > { %v3750_v58 = vmul.f32 0.7978846, %v3747_v47 }
0x18da   : > { %5158 = vtanh.f32 %v3750_v58 }
0x18e7   : > { %v5159_v0 = vpop.eup %5158 }
0x18e8   : > { %v3756_v3 = vadd.f32 1.0, %v5159_v0 }
0x18ea   : > { %v3759_v13 = vmul.f32 %v3756_v3, %v3735_v51 }
0x18ec   : > { %4996 = vmatmul.mubr.msk.f32.gmra.mxu1 %vm699_vm1, %v3759_v13 }
0x190b   : > { %v3852_v53 = vpop.f32.mrf.mxu1 }
0x190c   : > { %v3853_v54 = vadd.f32 %v4291_v52, %v3852_v53 }
0x190d   : > { %v4991_v22 = vpop.f32.mrf.mxu1 }
0x190e   : > { %v3866_v56 = vadd.f32 %v3853_v54, %v6202_v9  ;;  %v3966_v9 = vld [vmem:[%s6421_s20 + $0x30] sm:$0xff] }
0x190f   : > { %v3857_v59 = vpop.f32.mrf.mxu1 }
0x1910   : > { %3869 = vst.msk [vmem:[#allocation2] sm:$0xff] %vm795_vm2, %v3866_v56  ;;  %v3858_v60 = vadd.f32 %v4291_v52, %v3857_v59 }
0x1911   : > { %v4994_v61 = vpop.f32.mrf.mxu1 }
0x1912   : > { %v3867_v62 = vadd.f32 %v3858_v60, %v6207_v14  ;;  %v3965_v14 = vld [vmem:[%s6421_s20 + $0x28] sm:$0xff] }
0x1914   : > { %3870 = vst.msk [vmem:[#allocation2 + $0x8] sm:$0xff] %vm795_vm2, %v3867_v62 }
0x1917   : > { %v3872_v63 = vld [vmem:[#allocation2] sm:$0x1] }
0x1918   : > { %5007 = vmatmul.mubr.msk.f32.vlgmr.msra.gmra.mxu0 %vm795_vm2, %v3872_v63 }
0x1919   : > { %5025 = vmatprep.mubr.msk.f32.mxu0 %vm5225_vm0, %v5224_v1  ;;  %5010 = vmatpush3.msra.mxu0 %v3967_v19 }
0x191a   : > { %5011 = vmatprep.subr.mxu0 %v5224_v1 }
0x191b   : > { %5012 = vmatpush3.msra.mxu0 %v3966_v9 }
0x191c   : > { %5013 = vmatprep.subr.mxu0 %v5224_v1 }
0x191d   : > { %5014 = vmatpush3.msra.mxu0 %v3965_v14 }
0x191e   : > { %5015 = vmatprep.subr.mxu0 %v5224_v1 }
0x191f   : > { %5016 = vmatpush3.msra.mxu0 %v3964_v27 }
0x1920   : > { %5017 = vmatprep.subr.mxu0 %v5224_v1 }
0x1921   : > { %5018 = vmatpush3.msra.mxu0 %v3963_v2 }
0x1922   : > { %5019 = vmatprep.subr.mxu0 %v5224_v1 }
0x1923   : > { %5020 = vmatpush3.msra.mxu0 %v3962_v55 }
0x1924   : > { %5021 = vmatprep.subr.mxu0 %v5224_v1 }
0x1925   : > { %5022 = vmatpush3.msra.mxu0 %v3961_v31 }
0x1926   : > { %5023 = vmatprep.subr.mxu0 %v5224_v1 }
0x1927   : > { %5024 = vmatpush3.msra.mxu0 %v3960_v4 }
0x19ac   : > { %v3862_v34 = vpop.f32.mrf.mxu1 }
0x19ad   : > { %v3863_v5 = vadd.f32 %v4291_v52, %v3862_v34 }
0x19ae   : > { %v4997_v57 = vpop.f32.mrf.mxu1 }
0x19af   : > { %v3868_v7 = vadd.f32 %v3863_v5, %v6217_v26 }
0x19b1   : > { %3871 = vst.msk [vmem:[#allocation2 + $0x10] sm:$0x1] %vm798_vm3, %v3868_v7 }
0x19d8   : > { %v3947_v11 = vpop.f32.mrf.mxu0 }
0x19d9   : > { %v3948_v12 = vadd.f32 %v3947_v11, %v3877_v10 }
0x19da   : > { %v5008_v35 = vpop.f32.mrf.mxu0 }
0x19db   : > { %v3952_v38 = vmul.f32 0.044715, %v3948_v12  ;;  %v3951_v33 = vmul.f32 0.5, %v3948_v12 }
0x19dd   : > { %v3953_v15 = vmul.f32 %v3952_v38, %v3948_v12 }
0x19df   : > { %v3954_v1 = vmul.f32 %v3953_v15, %v3948_v12 }
0x19e1   : > { %v3955_v16 = vadd.f32 %v3954_v1, %v3948_v12 }
0x19e3   : > { %v3956_v6 = vmul.f32 0.7978846, %v3955_v16 }
0x19e5   : > { %5160 = vtanh.f32 %v3956_v6 }
0x19f2   : > { %v5161_v48 = vpop.eup %5160 }
0x19f3   : > { %v3958_v26 = vadd.f32 1.0, %v5161_v48 }
0x19f5   : > { %v3959_v17 = vmul.f32 %v3958_v26, %v3951_v33 }
0x19f7   : > { %5026 = vmatmul.mubr.msk.f32.vlgmr.msra.gmra.mxu0 %vm699_vm1, %v3959_v17 }
0x1ab7   : > { %v4038_v20 = vpop.f32.mrf.mxu0 }
0x1ab8   : > { %v4039_v21 = vadd.f32 %v4038_v20, %v3968_v18 }
0x1ab9   : > { %v5027_v49 = vpop.f32.mrf.mxu0 }
0x1aba   : > { %4042 = vst [vmem:[%s675_s25] sm:$0x1] %v4039_v21 }
0x1abb   : > { %5175 = shalt.err (!%p5172_p3)
}
0x1abc   : > { %s5176_s30 = scalar_lea.hbm %s6366_s7, 16  ;;  %s5180_s0 = scalar_lea.hbm %s6423_s22, 32 }
0x1abd   : > { %p5177_p4 = scmp.ne.s32.totalorder %s6366_s7, %s5176_s30  ;;  %p5181_p9 = scmp.lt.s32.totalorder %s6366_s7, %s6423_s22 }
0x1abe   : > { %p5182_p10 = scmp.lt.s32.totalorder %s5180_s0, %s5176_s30 }
0x1abf   : > { %p5178_p7 = pnand %p5177_p4, %p5380_p5 }
0x1ac0   : > { %p5183_p11 = por %p5182_p10, %p5181_p9 }
0x1ac1   : > { %p5179_p8 = pneg %p5178_p7 }
0x1ac3   : > { %p5184_p12 = pnand %p5183_p11, %p5179_p8 }
0x1ac5   : > { %5187 = shalt.err (!%p5184_p12)
}
0x1ac6   : > { %5035 = dma.vmem_to_hbm [thread:$0]  (%p5380_p5), %s4057_s5, 16, %s6366_s7, %s4044_s8  }
0x1ac7 PF: > { %s6464_s9 = sld [smem:[#allocation8_spill]] }
0x1ac8   : > { %s6465_s4 = sld [smem:[#allocation6_spill]] }
0x1acd   : > { %p5041_p13 = scmp.ge.s32.totalorder %s6464_s9, 2 }
0x1ace   : > { %s4068_s10 = sand.u32 1, %s6465_s4  }
0x1acf   : > { %p5038_p0 = pnand %p5041_p13, %p5384_p6  ;;  %s4069_s2 = scalar_lea.sflag [#allocation4], %s4068_s10 }
0x1ad1   : > { %p5039_p1 = pneg %p5038_p0 }
0x1ad3   : > { %5205 = dma.done.wait (%p5039_p1), %s4069_s2, 16  }
0x1ad4   : > { %5207 = vsyncadd (%p5039_p1), %s4069_s2, 4294967280  ;;  %s6467_s30 = sld [smem:[#allocation9_spill]]  ;;  %s6470_s3 = smov %s5214_s28 }
0x1ad5   : > { %s6468_s25 = sld [smem:[#allocation7_spill]] }
0x1ad6   : > { %s6469_s29 = sld [smem:[#allocation10_spill]] }
0x1ada   : > { %p32_p2 = scmp.ge.s32.totalorder %s6467_s30, 4  }
0x1adb   : > { %s6471_s28 = smov %s6468_s25 }
0x1adc   :  { %34 = sbr.rel (!%p32_p2) target bundleno = 15 (0xf), region = 164 }
0x1ae1   :  { %4073 = vsyncpa [#allocation4], 1 }
0x1ae2   :  { %4075 = vsyncpa [#allocation4 + $0x1], 1 }

</bundles_post_ra>
